<compile_context>
chip_gen: v6e
topology: v6e:2x2x1
jax: 0.10.0
libtpu: 0.0.40
codegen_flags: <defaults>
</compile_context>

<pallas_src>
import jax
import jax.numpy as jnp
from jax.experimental import pallas as pl
from jax.experimental.pallas import tpu as pltpu

EPS = 1e-5


# ---------------------------------------------------------------------------
# Fused kernel: BN1 (batch stats) -> ReLU -> 1x1 conv -> BN2 (batch stats)
# Layout: channels on sublanes, flattened (N*H*W) on lanes.
# ---------------------------------------------------------------------------
def _fused_kernel(x_ref, g1_ref, b1_ref, w_ref, g2_ref, b2_ref, o_ref):
    x = x_ref[...]                                   # (Cin, L) f32
    inv_n = 1.0 / x.shape[1]

    # ---- BN1 statistics (single pass over x, no centered temps) ------------
    s1 = jnp.sum(x, axis=1, keepdims=True)           # (Cin, 1)
    sq1 = jnp.sum(x * x, axis=1, keepdims=True)      # (Cin, 1)
    mean1 = s1 * inv_n
    var1 = sq1 * inv_n - mean1 * mean1

    scale1 = g1_ref[...] * jax.lax.rsqrt(var1 + EPS)     # (Cin, 1)
    shift1 = b1_ref[...] - mean1 * scale1                # mean folded into affine
    xr = jnp.maximum(x * scale1 + shift1, 0.0)           # BN1 + ReLU, (Cin, L)

    # ---- 1x1 conv as one wide MXU matmul, written directly into o_ref ------
    wt = w_ref[...]                                       # (Cout, Cin)
    o_ref[...] = jnp.dot(wt, xr, preferred_element_type=jnp.float32)

    # ---- BN2 statistics ------------------------------------------------------
    inv_m = 1.0 / o_ref.shape[1]
    # mean2 without reducing y: sum_l y = W @ (sum_l xr)  -> tiny MXU matvec.
    s_xr = jnp.sum(xr, axis=1, keepdims=True)             # (Cin, 1)
    mean2 = jnp.dot(wt, s_xr, preferred_element_type=jnp.float32) * inv_m  # (Cout,1)

    y = o_ref[...]                                         # (Cout, L)
    sq2 = jnp.sum(y * y, axis=1, keepdims=True)            # (Cout, 1)
    var2 = sq2 * inv_m - mean2 * mean2

    scale2 = g2_ref[...] * jax.lax.rsqrt(var2 + EPS)       # (Cout, 1)
    shift2 = b2_ref[...] - mean2 * scale2
    o_ref[...] = y * scale2 + shift2                        # overwrite in place


# ---------------------------------------------------------------------------
# Forward pass (single pallas_call, channel-major, no scratch)
# ---------------------------------------------------------------------------
def forward(x_nchw, params):
    N, Cin, H, W = x_nchw.shape
    Cout = params["w_t"].shape[0]
    HW = H * W
    L = N * HW

    # Channel-major 2D slab (Cin, N*HW).  Free reshape for N == 1 (the spec
    # case); for N > 1 a single XLA transpose outside the kernel.
    if N == 1:
        x2 = x_nchw.reshape(Cin, L)
    else:
        x2 = jnp.transpose(x_nchw.reshape(N, Cin, HW), (1, 0, 2)).reshape(Cin, L)

    g1 = params["gamma1"].reshape(Cin, 1)
    b1 = params["beta1"].reshape(Cin, 1)
    g2 = params["gamma2"].reshape(Cout, 1)
    b2 = params["beta2"].reshape(Cout, 1)
    wt = params["w_t"]                              # (Cout, Cin)

    # VMEM budget from the actual working set (inputs/outputs double-buffered
    # by Pallas + compiler temps), capped well under v7x's 64 MiB physical.
    x_bytes = Cin * L * 4
    o_bytes = Cout * L * 4
    vmem_limit = int(min(96 * 1024 * 1024,
                         4 * (x_bytes + o_bytes) + 8 * 1024 * 1024))

    out2 = pl.pallas_call(
        _fused_kernel,
        out_shape=jax.ShapeDtypeStruct((Cout, L), jnp.float32),
        grid=(1,),
        in_specs=[
            pl.BlockSpec((Cin, L), lambda i: (0, 0)),
            pl.BlockSpec((Cin, 1), lambda i: (0, 0)),
            pl.BlockSpec((Cin, 1), lambda i: (0, 0)),
            pl.BlockSpec((Cout, Cin), lambda i: (0, 0)),
            pl.BlockSpec((Cout, 1), lambda i: (0, 0)),
            pl.BlockSpec((Cout, 1), lambda i: (0, 0)),
        ],
        out_specs=pl.BlockSpec((Cout, L), lambda i: (0, 0)),
        compiler_params=pltpu.CompilerParams(
            dimension_semantics=("arbitrary",),
            vmem_limit_bytes=vmem_limit,
        ),
    )(x2, g1, b1, wt, g2, b2)

    if N == 1:
        return out2.reshape(N, Cout, H, W)
    return jnp.transpose(out2.reshape(Cout, N, HW), (1, 0, 2)).reshape(N, Cout, H, W)


# ---------------------------------------------------------------------------
# Pure-JAX reference of the PyTorch forward (training-mode BN)
# ---------------------------------------------------------------------------
def reference(x, params):
    def bn(t, gamma, beta):
        mean = jnp.mean(t, axis=(0, 2, 3), keepdims=True)
        var = jnp.var(t, axis=(0, 2, 3), keepdims=True)      # biased variance
        return ((t - mean) * jax.lax.rsqrt(var + EPS)
                * gamma[None, :, None, None] + beta[None, :, None, None])

    h = jnp.maximum(bn(x, params["gamma1"], params["beta1"]), 0.0)
    y = jnp.einsum("oc,nchw->nohw", params["w_t"], h)         # 1x1 conv, no bias
    return bn(y, params["gamma2"], params["beta2"])


if __name__ == "__main__":
    key = jax.random.PRNGKey(0)
    k1, k2, k3, k4, k5, k6 = jax.random.split(key, 6)

    # Channels fixed by the module (240 -> 192); batch=1 as in the spec,
    # small spatial for the test.
    N, Cin, H, W, Cout = 1, 240, 16, 16, 192
    x = jax.random.normal(k1, (N, Cin, H, W), dtype=jnp.float32)

    params = {
        "gamma1": jax.random.normal(k2, (Cin,), dtype=jnp.float32),
        "beta1":  jax.random.normal(k3, (Cin,), dtype=jnp.float32),
        # conv weight (Cout, Cin, 1, 1) stored as (Cout, Cin)
        "w_t":    jax.random.normal(k4, (Cout, Cin), dtype=jnp.float32) * 0.05,
        "gamma2": jax.random.normal(k5, (Cout,), dtype=jnp.float32),
        "beta2":  jax.random.normal(k6, (Cout,), dtype=jnp.float32),
    }

    out = jax.block_until_ready(jax.jit(forward)(x, params))
    ref = reference(x, params)

    assert out.shape == (N, Cout, H, W)
    if not jnp.allclose(out, ref, rtol=2e-3, atol=2e-3):
        raise SystemExit("result mismatch vs JAX reference")
    print("KERNEL_OK")
</pallas_src>

<mosaic_0001>
module attributes {stable_mosaic.version = 11 : i64} {
  func.func @_fused_kernel(%arg0: i32, %arg1: memref<240x256xf32, #tpu.memory_space<vmem>>, %arg2: memref<240x1xf32, #tpu.memory_space<vmem>>, %arg3: memref<240x1xf32, #tpu.memory_space<vmem>>, %arg4: memref<192x240xf32, #tpu.memory_space<vmem>>, %arg5: memref<192x1xf32, #tpu.memory_space<vmem>>, %arg6: memref<192x1xf32, #tpu.memory_space<vmem>>, %arg7: memref<192x256xf32, #tpu.memory_space<vmem>>) attributes {dimension_semantics = [#tpu.dimension_semantics<arbitrary>], iteration_bounds = array<i64: 1>, scalar_prefetch = 0 : i64, scratch_operands = 0 : i64, tpu.core_type = #tpu.core_type<tc>, window_params = [{pipeline_mode = #tpu.pipeline_mode<synchronous>, transform_indices = @transform_0, window_bounds = array<i64: 240, 256>}, {pipeline_mode = #tpu.pipeline_mode<synchronous>, transform_indices = @transform_1, window_bounds = array<i64: 240, 1>}, {pipeline_mode = #tpu.pipeline_mode<synchronous>, transform_indices = @transform_2, window_bounds = array<i64: 240, 1>}, {pipeline_mode = #tpu.pipeline_mode<synchronous>, transform_indices = @transform_3, window_bounds = array<i64: 192, 240>}, {pipeline_mode = #tpu.pipeline_mode<synchronous>, transform_indices = @transform_4, window_bounds = array<i64: 192, 1>}, {pipeline_mode = #tpu.pipeline_mode<synchronous>, transform_indices = @transform_5, window_bounds = array<i64: 192, 1>}, {pipeline_mode = #tpu.pipeline_mode<synchronous>, transform_indices = @transform_6, window_bounds = array<i64: 192, 256>}]} {
    %c0 = arith.constant 0 : index
    %c0_0 = arith.constant 0 : index
    %0 = vector.load %arg1[%c0, %c0_0] : memref<240x256xf32, #tpu.memory_space<vmem>>, vector<240x256xf32>
    %cst = arith.constant dense<0.000000e+00> : vector<240xf32>
    %1 = vector.multi_reduction <add>, %0, %cst [1] : vector<240x256xf32> to vector<240xf32>
    %2 = vector.shape_cast %1 : vector<240xf32> to vector<240x1xf32>
    %3 = arith.mulf %0, %0 : vector<240x256xf32>
    %cst_1 = arith.constant dense<0.000000e+00> : vector<240xf32>
    %4 = vector.multi_reduction <add>, %3, %cst_1 [1] : vector<240x256xf32> to vector<240xf32>
    %5 = vector.shape_cast %4 : vector<240xf32> to vector<240x1xf32>
    %cst_2 = arith.constant 3.906250e-03 : f32
    %6 = vector.broadcast %cst_2 : f32 to vector<240x1xf32>
    %7 = arith.mulf %2, %6 : vector<240x1xf32>
    %cst_3 = arith.constant 3.906250e-03 : f32
    %8 = vector.broadcast %cst_3 : f32 to vector<240x1xf32>
    %9 = arith.mulf %5, %8 : vector<240x1xf32>
    %10 = arith.mulf %7, %7 : vector<240x1xf32>
    %11 = arith.subf %9, %10 : vector<240x1xf32>
    %c0_4 = arith.constant 0 : index
    %c0_5 = arith.constant 0 : index
    %12 = vector.load %arg2[%c0_4, %c0_5] : memref<240x1xf32, #tpu.memory_space<vmem>>, vector<240x1xf32>
    %cst_6 = arith.constant 9.99999974E-6 : f32
    %13 = vector.broadcast %cst_6 : f32 to vector<240x1xf32>
    %14 = arith.addf %11, %13 : vector<240x1xf32>
    %15 = math.rsqrt %14 : vector<240x1xf32>
    %16 = arith.mulf %12, %15 : vector<240x1xf32>
    %c0_7 = arith.constant 0 : index
    %c0_8 = arith.constant 0 : index
    %17 = vector.load %arg3[%c0_7, %c0_8] : memref<240x1xf32, #tpu.memory_space<vmem>>, vector<240x1xf32>
    %18 = arith.mulf %7, %16 : vector<240x1xf32>
    %19 = arith.subf %17, %18 : vector<240x1xf32>
    %20 = vector.broadcast %16 : vector<240x1xf32> to vector<240x256xf32>
    %21 = arith.mulf %0, %20 : vector<240x256xf32>
    %22 = vector.broadcast %19 : vector<240x1xf32> to vector<240x256xf32>
    %23 = arith.addf %21, %22 : vector<240x256xf32>
    %cst_9 = arith.constant 0.000000e+00 : f32
    %24 = vector.broadcast %cst_9 : f32 to vector<240x256xf32>
    %25 = arith.maximumf %23, %24 : vector<240x256xf32>
    %c0_10 = arith.constant 0 : index
    %c0_11 = arith.constant 0 : index
    %26 = vector.load %arg4[%c0_10, %c0_11] : memref<192x240xf32, #tpu.memory_space<vmem>>, vector<192x240xf32>
    %cst_12 = arith.constant dense<0.000000e+00> : vector<192x256xf32>
    %27 = tpu.matmul %26, %25, %cst_12 {dimension_numbers = #tpu.dot_dimension_numbers<[1], [0], [0], [1], [0, 0, 1, 1], [], []>} : vector<192x240xf32>, vector<240x256xf32>, vector<192x256xf32> -> vector<192x256xf32>
    %c0_13 = arith.constant 0 : index
    %c0_14 = arith.constant 0 : index
    %28 = vector.load %arg7[%c0_13, %c0_14] : memref<192x256xf32, #tpu.memory_space<vmem>>, vector<192x256xf32>
    tpu.vector_store %arg7[%c0_13, %c0_14], %27 {strides = array<i32>} : memref<192x256xf32, #tpu.memory_space<vmem>>, vector<192x256xf32>,
    %cst_15 = arith.constant dense<0.000000e+00> : vector<240xf32>
    %29 = vector.multi_reduction <add>, %25, %cst_15 [1] : vector<240x256xf32> to vector<240xf32>
    %30 = vector.shape_cast %29 : vector<240xf32> to vector<240x1xf32>
    %cst_16 = arith.constant dense<0.000000e+00> : vector<192x1xf32>
    %31 = tpu.matmul %26, %30, %cst_16 {dimension_numbers = #tpu.dot_dimension_numbers<[1], [0], [0], [1], [0, 0, 1, 1], [], []>} : vector<192x240xf32>, vector<240x1xf32>, vector<192x1xf32> -> vector<192x1xf32>
    %cst_17 = arith.constant 3.906250e-03 : f32
    %32 = vector.broadcast %cst_17 : f32 to vector<192x1xf32>
    %33 = arith.mulf %31, %32 : vector<192x1xf32>
    %c0_18 = arith.constant 0 : index
    %c0_19 = arith.constant 0 : index
    %34 = vector.load %arg7[%c0_18, %c0_19] : memref<192x256xf32, #tpu.memory_space<vmem>>, vector<192x256xf32>
    %35 = arith.mulf %34, %34 : vector<192x256xf32>
    %cst_20 = arith.constant dense<0.000000e+00> : vector<192xf32>
    %36 = vector.multi_reduction <add>, %35, %cst_20 [1] : vector<192x256xf32> to vector<192xf32>
    %37 = vector.shape_cast %36 : vector<192xf32> to vector<192x1xf32>
    %cst_21 = arith.constant 3.906250e-03 : f32
    %38 = vector.broadcast %cst_21 : f32 to vector<192x1xf32>
    %39 = arith.mulf %37, %38 : vector<192x1xf32>
    %40 = arith.mulf %33, %33 : vector<192x1xf32>
    %41 = arith.subf %39, %40 : vector<192x1xf32>
    %c0_22 = arith.constant 0 : index
    %c0_23 = arith.constant 0 : index
    %42 = vector.load %arg5[%c0_22, %c0_23] : memref<192x1xf32, #tpu.memory_space<vmem>>, vector<192x1xf32>
    %cst_24 = arith.constant 9.99999974E-6 : f32
    %43 = vector.broadcast %cst_24 : f32 to vector<192x1xf32>
    %44 = arith.addf %41, %43 : vector<192x1xf32>
    %45 = math.rsqrt %44 : vector<192x1xf32>
    %46 = arith.mulf %42, %45 : vector<192x1xf32>
    %c0_25 = arith.constant 0 : index
    %c0_26 = arith.constant 0 : index
    %47 = vector.load %arg6[%c0_25, %c0_26] : memref<192x1xf32, #tpu.memory_space<vmem>>, vector<192x1xf32>
    %48 = arith.mulf %33, %46 : vector<192x1xf32>
    %49 = arith.subf %47, %48 : vector<192x1xf32>
    %50 = vector.broadcast %46 : vector<192x1xf32> to vector<192x256xf32>
    %51 = arith.mulf %34, %50 : vector<192x256xf32>
    %52 = vector.broadcast %49 : vector<192x1xf32> to vector<192x256xf32>
    %53 = arith.addf %51, %52 : vector<192x256xf32>
    %c0_27 = arith.constant 0 : index
    %c0_28 = arith.constant 0 : index
    %54 = vector.load %arg7[%c0_27, %c0_28] : memref<192x256xf32, #tpu.memory_space<vmem>>, vector<192x256xf32>
    tpu.vector_store %arg7[%c0_27, %c0_28], %53 {strides = array<i32>} : memref<192x256xf32, #tpu.memory_space<vmem>>, vector<192x256xf32>,
    return
  }
  func.func @transform_0(%arg0: i32) -> (i32, i32) {
    %c0_i32 = arith.constant 0 : i32
    %c0_i32_0 = arith.constant 0 : i32
    %c0_i32_1 = arith.constant 0 : i32
    return %c0_i32, %c0_i32_0 : i32, i32
  }
  func.func @transform_1(%arg0: i32) -> (i32, i32) {
    %c0_i32 = arith.constant 0 : i32
    %c0_i32_0 = arith.constant 0 : i32
    %c0_i32_1 = arith.constant 0 : i32
    return %c0_i32, %c0_i32_0 : i32, i32
  }
  func.func @transform_2(%arg0: i32) -> (i32, i32) {
    %c0_i32 = arith.constant 0 : i32
    %c0_i32_0 = arith.constant 0 : i32
    %c0_i32_1 = arith.constant 0 : i32
    return %c0_i32, %c0_i32_0 : i32, i32
  }
  func.func @transform_3(%arg0: i32) -> (i32, i32) {
    %c0_i32 = arith.constant 0 : i32
    %c0_i32_0 = arith.constant 0 : i32
    %c0_i32_1 = arith.constant 0 : i32
    return %c0_i32, %c0_i32_0 : i32, i32
  }
  func.func @transform_4(%arg0: i32) -> (i32, i32) {
    %c0_i32 = arith.constant 0 : i32
    %c0_i32_0 = arith.constant 0 : i32
    %c0_i32_1 = arith.constant 0 : i32
    return %c0_i32, %c0_i32_0 : i32, i32
  }
  func.func @transform_5(%arg0: i32) -> (i32, i32) {
    %c0_i32 = arith.constant 0 : i32
    %c0_i32_0 = arith.constant 0 : i32
    %c0_i32_1 = arith.constant 0 : i32
    return %c0_i32, %c0_i32_0 : i32, i32
  }
  func.func @transform_6(%arg0: i32) -> (i32, i32) {
    %c0_i32 = arith.constant 0 : i32
    %c0_i32_0 = arith.constant 0 : i32
    %c0_i32_1 = arith.constant 0 : i32
    return %c0_i32, %c0_i32_0 : i32, i32
  }
}

</mosaic_0001>

<bundles_post_ra>
// kernel: forward.1
= control target key start
LH: loop header
LB: loop body
LE: loop exit
PB: predicated region body
PF: predicated region fallthrough
CT: control target
= control target key end

     0   :  { %vm1181_vm0 = vcmask 916480   ;;  %s4801_s0 = inlined_call_operand.vmem [shape: f32[240,256], index: 0, kind: input, shape index: {}]   ;;  %s4802_s1 = inlined_call_operand.vmem [shape: f32[240,1], index: 1, kind: input, shape index: {}]   ;;  %s4803_s2 = inlined_call_operand.vmem [shape: f32[240,1], index: 2, kind: input, shape index: {}]   ;;  %s4804_s3 = inlined_call_operand.vmem [shape: f32[192,240], index: 3, kind: input, shape index: {}]   ;;  %s4805_s4 = inlined_call_operand.vmem [shape: f32[192,1], index: 4, kind: input, shape index: {}]   ;;  %s4806_s5 = inlined_call_operand.vmem [shape: f32[192,1], index: 5, kind: input, shape index: {}]   ;;  %s4807_s6 = inlined_call_operand.vmem [shape: f32[192,256], index: 6, kind: output, shape index: {}]  }
   0x1   :  { %v2866_v0 = vld [vmem:[%s4801_s0 + $0x20] sm:$0xff]  ;;  %v2871_v1 = vld [vmem:[%s4801_s0 + $0x28] sm:$0xff]  ;;  %v2888_v5 = vld [vmem:[%s4801_s0 + $0x30] sm:$0xff] }
   0x2   :  { %v2876_v2 = vld [vmem:[%s4801_s0] sm:$0xff]  ;;  %v89_v3 = vadd.f32 %v2871_v1, %v2866_v0  ;;  %v2883_v4 = vld [vmem:[%s4801_s0 + $0x8] sm:$0xff]  ;;  %v2893_v6 = vld [vmem:[%s4801_s0 + $0x38] sm:$0xff] }
   0x3   :  { %v83_v7 = vadd.f32 %v2883_v4, %v2876_v2  ;;  %v2900_v8 = vld [vmem:[%s4801_s0 + $0x10] sm:$0xff]  ;;  %v2905_v9 = vld [vmem:[%s4801_s0 + $0x18] sm:$0xff]  ;;  %v92_v10 = vadd.f32 %v2893_v6, %v2888_v5  ;;  %v2924_v14 = vld [vmem:[%s4801_s0 + $0x40] sm:$0xff] }
   0x4   :  { %90 = vadd.xlane.f32.xlu1 %v89_v3  ;;  %v86_v11 = vadd.f32 %v2905_v9, %v2900_v8  ;;  %v2914_v12 = vld [vmem:[%s4801_s0 + $0x50] sm:$0xff]  ;;  %v2919_v13 = vld [vmem:[%s4801_s0 + $0x58] sm:$0xff]  ;;  %v2929_v15 = vld [vmem:[%s4801_s0 + $0x48] sm:$0xff] }
   0x5   :  { %84 = vadd.xlane.f32.xlu0 %v83_v7  ;;  %v98_v16 = vadd.f32 %v2919_v13, %v2914_v12  ;;  %v95_v17 = vadd.f32 %v2929_v15, %v2924_v14  ;;  %v2938_v18 = vld [vmem:[%s4801_s0 + $0x70] sm:$0xff]  ;;  %v2943_v19 = vld [vmem:[%s4801_s0 + $0x78] sm:$0xff]  ;;  %v2948_v20 = vld [vmem:[%s4801_s0 + $0x60] sm:$0xff] }
   0x6   :  { %v2953_v21 = vld [vmem:[%s4801_s0 + $0x68] sm:$0xff]  ;;  %v104_v22 = vadd.f32 %v2943_v19, %v2938_v18  ;;  %v41_v24 = vld [vmem:[%s4801_s0 + $0x90] sm:$0xff]  ;;  %v42_v25 = vld [vmem:[%s4801_s0 + $0x98] sm:$0xff] }
   0x7   :  { %v101_v23 = vadd.f32 %v2953_v21, %v2948_v20  ;;  %v39_v26 = vld [vmem:[%s4801_s0 + $0x80] sm:$0xff]  ;;  %v40_v27 = vld [vmem:[%s4801_s0 + $0x88] sm:$0xff]  ;;  %v110_v28 = vadd.f32 %v42_v25, %v41_v24  ;;  %v45_v30 = vld [vmem:[%s4801_s0 + $0xb0] sm:$0xff] }
   0x8   :  { %93 = vadd.xlane.f32.xlu1 %v92_v10  ;;  %v107_v29 = vadd.f32 %v40_v27, %v39_v26  ;;  %v46_v31 = vld [vmem:[%s4801_s0 + $0xb8] sm:$0xff]  ;;  %v43_v32 = vld [vmem:[%s4801_s0 + $0xa0] sm:$0xff]  ;;  %v44_v33 = vld [vmem:[%s4801_s0 + $0xa8] sm:$0xff]  ;;  %v195_v62 = vmul.f32 %v45_v30, %v45_v30  ;;  %v189_v7 = vmul.f32 %v39_v26, %v39_v26  ;;  %v190_v10 = vmul.f32 %v40_v27, %v40_v27 }
   0x9   :  { %87 = vadd.xlane.f32.xlu0 %v86_v11  ;;  %v116_v34 = vadd.f32 %v46_v31, %v45_v30  ;;  %v113_v35 = vadd.f32 %v44_v33, %v43_v32  ;;  %v53_v36 = vld [vmem:[%s4801_s0 + $0xf0] sm:$0xff]  ;;  %v54_v37 = vld [vmem:[%s4801_s0 + $0xf8] sm:$0xff]  ;;  %v47_v38 = vld [vmem:[%s4801_s0 + $0xc0] sm:$0xff]  ;;  %v193_v59 = vmul.f32 %v43_v32, %v43_v32  ;;  %v194_v60 = vmul.f32 %v44_v33, %v44_v33 }
   0xa   :  { %v48_v39 = vld [vmem:[%s4801_s0 + $0xc8] sm:$0xff]  ;;  %v128_v40 = vadd.f32 %v54_v37, %v53_v36  ;;  %v203_v41 = vmul.f32 %v53_v36, %v53_v36  ;;  %v204_v42 = vmul.f32 %v54_v37, %v54_v37  ;;  %v51_v44 = vld [vmem:[%s4801_s0 + $0xe0] sm:$0xff]  ;;  %v49_v50 = vld [vmem:[%s4801_s0 + $0xd0] sm:$0xff]  ;;  %v197_v53 = vmul.f32 %v47_v38, %v47_v38 }
   0xb   :  { %v119_v43 = vadd.f32 %v48_v39, %v47_v38  ;;  %v52_v45 = vld [vmem:[%s4801_s0 + $0xe8] sm:$0xff]  ;;  %v201_v47 = vmul.f32 %v51_v44, %v51_v44  ;;  %v50_v51 = vld [vmem:[%s4801_s0 + $0xd8] sm:$0xff]  ;;  %v198_v54 = vmul.f32 %v48_v39, %v48_v39  ;;  %v199_v56 = vmul.f32 %v49_v50, %v49_v50 }
   0xc   :  { %99 = vadd.xlane.f32.xlu1 %v98_v16  ;;  %v278_v46 = vadd.f32 %v204_v42, %v203_v41  ;;  %v202_v48 = vmul.f32 %v52_v45, %v52_v45  ;;  %v125_v49 = vadd.f32 %v52_v45, %v51_v44  ;;  %v122_v55 = vadd.f32 %v50_v51, %v49_v50  ;;  %v80_v37 = vld [vmem:[%s4801_s0 + $0x1c8] sm:$0xff] }
   0xd   :  { %96 = vadd.xlane.f32.xlu0 %v95_v17  ;;  %v200_v57 = vmul.f32 %v50_v51, %v50_v51  ;;  %v269_v58 = vadd.f32 %v198_v54, %v197_v53  ;;  %v196_v63 = vmul.f32 %v46_v31, %v46_v31  ;;  %v263_v3 = vadd.f32 %v194_v60, %v193_v59  ;;  %v73_v53 = vld [vmem:[%s4801_s0 + $0x190] sm:$0xff]  ;;  %v74_v54 = vld [vmem:[%s4801_s0 + $0x198] sm:$0xff]  ;;  %v71_v59 = vld [vmem:[%s4801_s0 + $0x180] sm:$0xff] }
   0xe   :  { %v275_v52 = vadd.f32 %v202_v48, %v201_v47  ;;  %v191_v16 = vmul.f32 %v41_v24, %v41_v24  ;;  %v192_v17 = vmul.f32 %v42_v25, %v42_v25  ;;  %v187_v30 = vmul.f32 %v2938_v18, %v2938_v18  ;;  %v75_v47 = vld [vmem:[%s4801_s0 + $0x1a0] sm:$0xff]  ;;  %v76_v48 = vld [vmem:[%s4801_s0 + $0x1a8] sm:$0xff] }
   0xf   :  { %v272_v61 = vadd.f32 %v200_v57, %v199_v56  ;;  %v266_v11 = vadd.f32 %v196_v63, %v195_v62  ;;  %v188_v26 = vmul.f32 %v2943_v19, %v2943_v19  ;;  %v181_v24 = vmul.f32 %v2924_v14, %v2924_v14  ;;  %v72_v60 = vld [vmem:[%s4801_s0 + $0x188] sm:$0xff] }
  0x10   :  { %105 = vadd.xlane.f32.xlu1 %v104_v22  ;;  %v257_v22 = vadd.f32 %v190_v10, %v189_v7  ;;  %v182_v25 = vmul.f32 %v2929_v15, %v2929_v15  ;;  %v184_v31 = vmul.f32 %v2919_v13, %v2919_v13  ;;  %v177_v19 = vmul.f32 %v2866_v0, %v2866_v0  ;;  %v69_v7 = vld [vmem:[%s4801_s0 + $0x170] sm:$0xff]  ;;  %v70_v10 = vld [vmem:[%s4801_s0 + $0x178] sm:$0xff] }
  0x11   :  { %102 = vadd.xlane.f32.xlu0 %v101_v23  ;;  %v185_v23 = vmul.f32 %v2948_v20, %v2948_v20  ;;  %v254_v20 = vadd.f32 %v188_v26, %v187_v30  ;;  %v178_v32 = vmul.f32 %v2871_v1, %v2871_v1  ;;  %v179_v15 = vmul.f32 %v2888_v5, %v2888_v5  ;;  %v81_v1 = vld [vmem:[%s4801_s0 + $0x1d0] sm:$0xff]  ;;  %v82_v5 = vld [vmem:[%s4801_s0 + $0x1d8] sm:$0xff] }
  0x12   :  { %v245_v18 = vadd.f32 %v182_v25, %v181_v24  ;;  %v180_v33 = vmul.f32 %v2893_v6, %v2893_v6  ;;  %v176_v0 = vmul.f32 %v2905_v9, %v2905_v9  ;;  %v170_v6 = vadd.f32 %v82_v5, %v81_v1  ;;  %v79_v9 = vld [vmem:[%s4801_s0 + $0x1c0] sm:$0xff]  ;;  %v65_v24 = vld [vmem:[%s4801_s0 + $0x150] sm:$0xff]  ;;  %v66_v25 = vld [vmem:[%s4801_s0 + $0x158] sm:$0xff] }
  0x13   :  { %v173_v36 = vmul.f32 %v2876_v2, %v2876_v2  ;;  %v167_v38 = vadd.f32 %v80_v37, %v79_v9  ;;  %v2826_v39 = vmov 0   ;;  %v231_v41 = vmul.f32 %v81_v1, %v81_v1  ;;  %v77_v2 = vld [vmem:[%s4801_s0 + $0x1b0] sm:$0xff] }
  0x14   :  { %111 = vadd.xlane.f32.xlu1 %v110_v28  ;;  %v186_v28 = vmul.f32 %v2953_v21, %v2953_v21  ;;  %v183_v21 = vmul.f32 %v2914_v12, %v2914_v12  ;;  %v239_v12 = vadd.f32 %v178_v32, %v177_v19  ;;  %v242_v13 = vadd.f32 %v180_v33, %v179_v15  ;;  %v63_v19 = vld [vmem:[%s4801_s0 + $0x140] sm:$0xff]  ;;  %v64_v32 = vld [vmem:[%s4801_s0 + $0x148] sm:$0xff] }
  0x15   :  { %108 = vadd.xlane.f32.xlu0 %v107_v29  ;;  %v260_v29 = vadd.f32 %v192_v17, %v191_v16  ;;  %v232_v42 = vmul.f32 %v82_v5, %v82_v5  ;;  %2657 = vset.pattern.permute.xlu1 %v2826_v39  ;;  %v229_v45 = vmul.f32 %v79_v9, %v79_v9 }
  0x16   :  { %v251_v27 = vadd.f32 %v186_v28, %v185_v23  ;;  %v248_v14 = vadd.f32 %v184_v31, %v183_v21  ;;  %2656 = vset.pattern.permute.xlu0 %v2826_v39  ;;  %v227_v51 = vmul.f32 %v77_v2, %v77_v2  ;;  %v225_v57 = vmul.f32 %v75_v47, %v75_v47  ;;  %v67_v23 = vld [vmem:[%s4801_s0 + $0x160] sm:$0xff]  ;;  %v68_v28 = vld [vmem:[%s4801_s0 + $0x168] sm:$0xff]  ;;  %v57_v39 = vld [vmem:[%s4801_s0 + $0x110] sm:$0xff] }
  0x17   :  { %v320_v44 = vadd.f32 %v232_v42, %v231_v41  ;;  %v223_v63 = vmul.f32 %v73_v53, %v73_v53  ;;  %v221_v17 = vmul.f32 %v71_v59, %v71_v59  ;;  %v219_v26 = vmul.f32 %v69_v7, %v69_v7 }
  0x18   :  { %117 = vadd.xlane.f32.xlu1 %v116_v34  ;;  %v175_v34 = vmul.f32 %v2900_v8, %v2900_v8  ;;  %v174_v8 = vmul.f32 %v2883_v4, %v2883_v4  ;;  %v78_v4 = vld [vmem:[%s4801_s0 + $0x1b8] sm:$0xff]  ;;  %v217_v31 = vmul.f32 %v67_v23, %v67_v23  ;;  %v215_v33 = vmul.f32 %v65_v24, %v65_v24 }
  0x19   :  { %114 = vadd.xlane.f32.xlu0 %v113_v35  ;;  %v213_v5 = vmul.f32 %v63_v19, %v63_v19 }
  0x1a   :  { %v236_v35 = vadd.f32 %v176_v0, %v175_v34  ;;  %v62_v34 = vld [vmem:[%s4801_s0 + $0x138] sm:$0xff] }
  0x1c   :  { %129 = vadd.xlane.f32.xlu1 %v128_v40  ;;  %v233_v40 = vadd.f32 %v174_v8, %v173_v36  ;;  %v60_v36 = vld [vmem:[%s4801_s0 + $0x128] sm:$0xff] }
  0x1d   :  { %120 = vadd.xlane.f32.xlu0 %v119_v43  ;;  %v164_v43 = vadd.f32 %v78_v4, %v77_v2 }
  0x20   :  { %279 = vadd.xlane.f32.xlu1 %v278_v46  ;;  %v230_v46 = vmul.f32 %v80_v37, %v80_v37 }
  0x21   :  { %126 = vadd.xlane.f32.xlu0 %v125_v49  ;;  %v161_v49 = vadd.f32 %v76_v48, %v75_v47 }
  0x22   :  { %v317_v50 = vadd.f32 %v230_v46, %v229_v45 }
  0x24   :  { %276 = vadd.xlane.f32.xlu1 %v275_v52  ;;  %v228_v52 = vmul.f32 %v78_v4, %v78_v4  ;;  %v210_v4 = vmul.f32 %v60_v36, %v60_v36 }
  0x25   :  { %123 = vadd.xlane.f32.xlu0 %v122_v55  ;;  %v158_v55 = vadd.f32 %v74_v54, %v73_v53 }
  0x26   :  { %v314_v56 = vadd.f32 %v228_v52, %v227_v51 }
  0x28   :  { %270 = vadd.xlane.f32.xlu1 %v269_v58  ;;  %v226_v58 = vmul.f32 %v76_v48, %v76_v48 }
  0x29   :  { %273 = vadd.xlane.f32.xlu0 %v272_v61  ;;  %v155_v61 = vadd.f32 %v72_v60, %v71_v59 }
  0x2a   :  { %v311_v62 = vadd.f32 %v226_v58, %v225_v57 }
  0x2c   :  { %264 = vadd.xlane.f32.xlu1 %v263_v3  ;;  %v224_v3 = vmul.f32 %v74_v54, %v74_v54 }
  0x2d   :  { %267 = vadd.xlane.f32.xlu0 %v266_v11  ;;  %v152_v11 = vadd.f32 %v70_v10, %v69_v7 }
  0x2e   :  { %v308_v16 = vadd.f32 %v224_v3, %v223_v63 }
  0x30   :  { %258 = vadd.xlane.f32.xlu1 %v257_v22  ;;  %v222_v22 = vmul.f32 %v72_v60, %v72_v60 }
  0x31   :  { %261 = vadd.xlane.f32.xlu0 %v260_v29  ;;  %v149_v29 = vadd.f32 %v68_v28, %v67_v23 }
  0x32   :  { %v305_v30 = vadd.f32 %v222_v22, %v221_v17 }
  0x34   :  { %252 = vadd.xlane.f32.xlu1 %v251_v27  ;;  %v220_v27 = vmul.f32 %v70_v10, %v70_v10 }
  0x35   :  { %255 = vadd.xlane.f32.xlu0 %v254_v20  ;;  %v146_v20 = vadd.f32 %v66_v25, %v65_v24 }
  0x36   :  { %v302_v21 = vadd.f32 %v220_v27, %v219_v26 }
  0x38   :  { %246 = vadd.xlane.f32.xlu1 %v245_v18  ;;  %v218_v18 = vmul.f32 %v68_v28, %v68_v28 }
  0x39   :  { %249 = vadd.xlane.f32.xlu0 %v248_v14  ;;  %v143_v14 = vadd.f32 %v64_v32, %v63_v19 }
  0x3a   :  { %v299_v15 = vadd.f32 %v218_v18, %v217_v31 }
  0x3c   :  { %240 = vadd.xlane.f32.xlu1 %v239_v12  ;;  %v216_v12 = vmul.f32 %v66_v25, %v66_v25 }
  0x3d   :  { %243 = vadd.xlane.f32.xlu0 %v242_v13  ;;  %v61_v13 = vld [vmem:[%s4801_s0 + $0x130] sm:$0xff] }
  0x3e   :  { %v140_v0 = vadd.f32 %v62_v34, %v61_v13  ;;  %v296_v1 = vadd.f32 %v216_v12, %v215_v33  ;;  %v211_v37 = vmul.f32 %v61_v13, %v61_v13 }
  0x40   :  { %171 = vadd.xlane.f32.xlu1 %v170_v6  ;;  %v214_v6 = vmul.f32 %v64_v32, %v64_v32 }
  0x41   :  { %237 = vadd.xlane.f32.xlu0 %v236_v35  ;;  %v59_v35 = vld [vmem:[%s4801_s0 + $0x120] sm:$0xff] }
  0x42   :  { %v137_v8 = vadd.f32 %v60_v36, %v59_v35  ;;  %v293_v9 = vadd.f32 %v214_v6, %v213_v5  ;;  %v209_v2 = vmul.f32 %v59_v35, %v59_v35 }
  0x44   :  { %168 = vadd.xlane.f32.xlu1 %v167_v38  ;;  %v212_v38 = vmul.f32 %v62_v34, %v62_v34  ;;  %v287_v48 = vadd.f32 %v210_v4, %v209_v2 }
  0x45   :  { %234 = vadd.xlane.f32.xlu0 %v233_v40  ;;  %v58_v40 = vld [vmem:[%s4801_s0 + $0x118] sm:$0xff] }
  0x46   :  { %v134_v41 = vadd.f32 %v58_v40, %v57_v39  ;;  %v290_v42 = vadd.f32 %v212_v38, %v211_v37 }
  0x48   :  { %165 = vadd.xlane.f32.xlu1 %v164_v43  ;;  %v55_v43 = vld [vmem:[%s4801_s0 + $0x100] sm:$0xff] }
  0x49   :  { %321 = vadd.xlane.f32.xlu0 %v320_v44  ;;  %v56_v44 = vld [vmem:[%s4801_s0 + $0x108] sm:$0xff]  ;;  %v205_v46 = vmul.f32 %v55_v43, %v55_v43 }
  0x4a   :  { %v131_v45 = vadd.f32 %v56_v44, %v55_v43  ;;  %v206_v47 = vmul.f32 %v56_v44, %v56_v44  ;;  %v458_v44 = vld [vmem:[%s4802_s1 + $0x78] sm:$0xff] }
  0x4c   :  { %162 = vadd.xlane.f32.xlu1 %v161_v49  ;;  %v207_v49 = vmul.f32 %v57_v39, %v57_v39  ;;  %v281_v51 = vadd.f32 %v206_v47, %v205_v46 }
  0x4d   :  { %318 = vadd.xlane.f32.xlu0 %v317_v50  ;;  %v208_v50 = vmul.f32 %v58_v40, %v58_v40 }
  0x4f   :  { %v284_v52 = vadd.f32 %v208_v50, %v207_v49 }
  0x50   :  { %159 = vadd.xlane.f32.xlu1 %v158_v55 }
  0x51   :  { %315 = vadd.xlane.f32.xlu0 %v314_v56 }
  0x54   :  { %156 = vadd.xlane.f32.xlu1 %v155_v61 }
  0x55   :  { %312 = vadd.xlane.f32.xlu0 %v311_v62 }
  0x58   :  { %153 = vadd.xlane.f32.xlu1 %v152_v11 }
  0x59   :  { %309 = vadd.xlane.f32.xlu0 %v308_v16 }
  0x5c   :  { %150 = vadd.xlane.f32.xlu1 %v149_v29 }
  0x5d   :  { %306 = vadd.xlane.f32.xlu0 %v305_v30 }
  0x60   :  { %147 = vadd.xlane.f32.xlu1 %v146_v20 }
  0x61   :  { %303 = vadd.xlane.f32.xlu0 %v302_v21 }
  0x64   :  { %144 = vadd.xlane.f32.xlu1 %v143_v14 }
  0x65   :  { %300 = vadd.xlane.f32.xlu0 %v299_v15 }
  0x68   :  { %141 = vadd.xlane.f32.xlu1 %v140_v0 }
  0x69   :  { %297 = vadd.xlane.f32.xlu0 %v296_v1 }
  0x6c   :  { %138 = vadd.xlane.f32.xlu1 %v137_v8 }
  0x6d   :  { %294 = vadd.xlane.f32.xlu0 %v293_v9 }
  0x70   :  { %135 = vadd.xlane.f32.xlu1 %v134_v41 }
  0x71   :  { %291 = vadd.xlane.f32.xlu0 %v290_v42 }
  0x74   :  { %132 = vadd.xlane.f32.xlu1 %v131_v45 }
  0x75   :  { %288 = vadd.xlane.f32.xlu0 %v287_v48 }
  0x78   :  { %282 = vadd.xlane.f32.xlu1 %v281_v51 }
  0x79   :  { %285 = vadd.xlane.f32.xlu0 %v284_v52  ;;  %v457_v52 = vld [vmem:[%s4802_s1 + $0x70] sm:$0xff] }
  0x8d   :  { %v3123_v53 = vpop.xlane.xlu1 %90 }
  0x8e   :  { %v3125_v54 = vpop.xlane.xlu0 %84 }
  0x91   :  { %v3127_v55 = vpop.xlane.xlu1 %93 }
  0x92   :  { %v3129_v56 = vpop.xlane.xlu0 %87 }
  0x95   :  { %v3131_v57 = vpop.xlane.xlu1 %99 }
  0x96   :  { %v3133_v58 = vpop.xlane.xlu0 %96 }
  0x99   :  { %v3135_v59 = vpop.xlane.xlu1 %105 }
  0x9a   :  { %v3137_v60 = vpop.xlane.xlu0 %102 }
  0x9d   :  { %v112_v61 = vpop.xlane.xlu1 %111 }
  0x9e   :  { %v3139_v62 = vpop.xlane.xlu0 %108  ;;  %v3163_v38 = vmul.f32 0.00390625, %v112_v61 }
  0xa0   :  { %v392_v46 = vmul.f32 %v3163_v38, %v3163_v38 }
  0xa1   :  { %v118_v63 = vpop.xlane.xlu1 %117 }
  0xa2   :  { %v115_v3 = vpop.xlane.xlu0 %114  ;;  %v3153_v19 = vmul.f32 0.00390625, %v118_v63 }
  0xa3   :  { %v3159_v0 = vmul.f32 0.00390625, %v115_v3 }
  0xa4   :  { %v394_v6 = vmul.f32 %v3153_v19, %v3153_v19 }
  0xa5   :  { %v130_v7 = vpop.xlane.xlu1 %129  ;;  %v393_v39 = vmul.f32 %v3159_v0, %v3159_v0 }
  0xa6   :  { %v3141_v10 = vmul.f32 0.00390625, %v130_v7  ;;  %v121_v11 = vpop.xlane.xlu0 %120 }
  0xa7   :  { %v3147_v26 = vmul.f32 0.00390625, %v121_v11 }
  0xa8   :  { %v398_v16 = vmul.f32 %v3141_v10, %v3141_v10 }
  0xa9   :  { %v280_v17 = vpop.xlane.xlu1 %279  ;;  %v395_v32 = vmul.f32 %v3147_v26, %v3147_v26 }
  0xaa   :  { %v368_v22 = vmul.f32 0.00390625, %v280_v17  ;;  %v127_v23 = vpop.xlane.xlu0 %126 }
  0xab   :  { %v3145_v28 = vmul.f32 0.00390625, %v127_v23 }
  0xac   :  { %v428_v29 = vsub.f32 %v368_v22, %v398_v16  ;;  %v456_v16 = vld [vmem:[%s4802_s1 + $0x68] sm:$0xff] }
  0xad   :  { %v277_v30 = vpop.xlane.xlu1 %276  ;;  %v397_v24 = vmul.f32 %v3145_v28, %v3145_v28 }
  0xae   :  { %v488_v27 = vadd.f32 1e-05, %v428_v29  ;;  %v367_v25 = vmul.f32 0.00390625, %v277_v30  ;;  %v124_v20 = vpop.xlane.xlu0 %123  ;;  %v3189_v30 = vmul.f32 0.00390625, %v3139_v62 }
  0xaf   :  { %v3151_v21 = vmul.f32 0.00390625, %v124_v20 }
  0xb0   :  { %2658 = vrsqrt.f32 %v488_v27  ;;  %v427_v31 = vsub.f32 %v367_v25, %v397_v24  ;;  %v455_v27 = vld [vmem:[%s4802_s1 + $0x60] sm:$0xff]  ;;  %v391_v62 = vmul.f32 %v3189_v30, %v3189_v30 }
  0xb1   :  { %v271_v18 = vpop.xlane.xlu1 %270  ;;  %v396_v12 = vmul.f32 %v3151_v21, %v3151_v21 }
  0xb2   :  { %v487_v14 = vadd.f32 1e-05, %v427_v31  ;;  %v365_v15 = vmul.f32 0.00390625, %v271_v18  ;;  %v274_v33 = vpop.xlane.xlu0 %273  ;;  %v3200_v31 = vmul.f32 0.00390625, %v3125_v54 }
  0xb3   :  { %v366_v13 = vmul.f32 0.00390625, %v274_v33 }
  0xb4   :  { %2660 = vrsqrt.f32 %v487_v14  ;;  %v425_v34 = vsub.f32 %v365_v15, %v395_v32  ;;  %v454_v14 = vld [vmem:[%s4802_s1 + $0x58] sm:$0xff]  ;;  %v3210_v15 = vmul.f32 0.00390625, %v3135_v59  ;;  %v453_v59 = vld [vmem:[%s4802_s1 + $0x50] sm:$0xff] }
  0xb5   :  { %v426_v1 = vsub.f32 %v366_v13, %v396_v12  ;;  %v265_v5 = vpop.xlane.xlu1 %264  ;;  %v383_v13 = vmul.f32 %v3200_v31, %v3200_v31 }
  0xb6   :  { %v268_v35 = vpop.xlane.xlu0 %267  ;;  %v485_v36 = vadd.f32 1e-05, %v425_v34  ;;  %v363_v9 = vmul.f32 0.00390625, %v265_v5 }
  0xb7   :  { %v486_v8 = vadd.f32 1e-05, %v426_v1  ;;  %v364_v37 = vmul.f32 0.00390625, %v268_v35  ;;  %v3220_v35 = vmul.f32 0.00390625, %v3137_v60 }
  0xb8   :  { %v423_v2 = vsub.f32 %v363_v9, %v393_v39 }
  0xb9   :  { %2662 = vrsqrt.f32 %v486_v8  ;;  %v424_v40 = vsub.f32 %v364_v37, %v394_v6  ;;  %v259_v41 = vpop.xlane.xlu1 %258 }
  0xba   :  { %v262_v42 = vpop.xlane.xlu0 %261  ;;  %2664 = vrsqrt.f32 %v485_v36  ;;  %v483_v50 = vadd.f32 1e-05, %v423_v2  ;;  %v361_v25 = vmul.f32 0.00390625, %v259_v41  ;;  %v390_v36 = vmul.f32 %v3210_v15, %v3210_v15 }
  0xbb   :  { %v484_v4 = vadd.f32 1e-05, %v424_v40  ;;  %v362_v43 = vmul.f32 0.00390625, %v262_v42 }
  0xbc   :  { %v421_v12 = vsub.f32 %v361_v25, %v391_v62  ;;  %v3270_v25 = vmul.f32 0.00390625, %v3127_v55  ;;  %v576_v55 = vld [vmem:[%s4803_s2 + $0x68] sm:$0xff] }
  0xbd   :  { %v2659_v45 = vpop.eup %2658  ;;  %v253_v47 = vpop.xlane.xlu1 %252  ;;  %2666 = vrsqrt.f32 %v484_v4  ;;  %v422_v51 = vsub.f32 %v362_v43, %v392_v46  ;;  %v389_v4 = vmul.f32 %v3220_v35, %v3220_v35  ;;  %v452_v43 = vld [vmem:[%s4802_s1 + $0x48] sm:$0xff] }
  0xbe   :  { %v256_v48 = vpop.xlane.xlu0 %255  ;;  %v3172_v49 = vmul.f32 %v2659_v45, %v458_v44  ;;  %2668 = vrsqrt.f32 %v483_v50  ;;  %v481_v9 = vadd.f32 1e-05, %v421_v12  ;;  %v359_v37 = vmul.f32 0.00390625, %v253_v47 }
  0xbf   :  { %v482_v7 = vadd.f32 1e-05, %v422_v51  ;;  %v360_v34 = vmul.f32 0.00390625, %v256_v48  ;;  %v3240_v44 = vmul.f32 0.00390625, %v3131_v57  ;;  %v578_v57 = vld [vmem:[%s4803_s2 + $0x78] sm:$0xff] }
  0xc0   :  { %730 = vperm.xlu1 %2657, %v3172_v49   ;;  %v419_v45 = vsub.f32 %v359_v37, %v389_v4  ;;  %v608_v51 = vmul.f32 %v3172_v49, %v3141_v10  ;;  %v577_v49 = vld [vmem:[%s4803_s2 + $0x70] sm:$0xff]  ;;  %v451_v37 = vld [vmem:[%s4802_s1 + $0x40] sm:$0xff] }
  0xc1   :  { %v2661_v61 = vpop.eup %2660  ;;  %v247_v11 = vpop.xlane.xlu1 %246  ;;  %2670 = vrsqrt.f32 %v482_v7  ;;  %v420_v40 = vsub.f32 %v360_v34, %v390_v36 }
  0xc2   :  { %v250_v63 = vpop.xlane.xlu0 %249  ;;  %v3178_v3 = vmul.f32 %v2661_v61, %v457_v52  ;;  %v3250_v52 = vmul.f32 0.00390625, %v3133_v58  ;;  %v388_v61 = vmul.f32 %v3240_v44, %v3240_v44 }
  0xc3   :  { %v480_v47 = vadd.f32 1e-05, %v420_v40  ;;  %v358_v48 = vmul.f32 0.00390625, %v250_v63  ;;  %v479_v63 = vadd.f32 1e-05, %v419_v45 }
  0xc4   :  { %725 = vperm.xlu1 %2657, %v3178_v3   ;;  %v607_v58 = vmul.f32 %v3178_v3, %v3145_v28  ;;  %v387_v10 = vmul.f32 %v3250_v52, %v3250_v52 }
  0xc5   :  { %v3194_v24 = vpop.xlane.xlu1 %240 }
  0xc6   :  { %v2663_v17 = vpop.eup %2662  ;;  %v3184_v22 = vpop.xlane.xlu0 %243  ;;  %v637_v3 = vsub.f32 %v577_v49, %v607_v58  ;;  %v355_v34 = vmul.f32 0.00390625, %v3194_v24  ;;  %v575_v24 = vld [vmem:[%s4803_s2 + $0x60] sm:$0xff]  ;;  %v449_v49 = vld [vmem:[%s4802_s1 + $0x30] sm:$0xff] }
  0xc7   :  { %v3186_v23 = vmul.f32 %v2663_v17, %v456_v16  ;;  %v2665_v29 = vpop.eup %2664  ;;  %v357_v16 = vmul.f32 0.00390625, %v247_v11  ;;  %v418_v17 = vsub.f32 %v358_v48, %v388_v61  ;;  %v3273_v11 = vmul.f32 0.00390625, %v3129_v56  ;;  %v443_v56 = vld [vmem:[%s4802_s1] sm:$0xff]  ;;  %v450_v48 = vld [vmem:[%s4802_s1 + $0x38] sm:$0xff] }
  0xc8   :  { %v3202_v18 = vmul.f32 %v2665_v29, %v455_v27  ;;  %v638_v29 = vsub.f32 %v578_v57, %v608_v51  ;;  %v356_v28 = vmul.f32 0.00390625, %v3184_v22  ;;  %v386_v22 = vmul.f32 %v3270_v25, %v3270_v25  ;;  %v574_v51 = vld [vmem:[%s4803_s2 + $0x58] sm:$0xff] }
  0xc9   :  { %720 = vperm.xlu1 %2657, %v3186_v23   ;;  %v3213_v33 = vpop.xlane.xlu1 %171  ;;  %v478_v62 = vadd.f32 1e-05, %v418_v17 }
  0xca   :  { %v3197_v20 = vpop.xlane.xlu0 %237  ;;  %v2667_v32 = vpop.eup %2666  ;;  %v416_v36 = vsub.f32 %v356_v28, %v386_v22 }
  0xcb   :  { %v3217_v5 = vmul.f32 %v2667_v32, %v454_v14  ;;  %v2669_v6 = vpop.eup %2668  ;;  %v417_v32 = vsub.f32 %v357_v16, %v387_v10  ;;  %v606_v14 = vmul.f32 %v3186_v23, %v3151_v21  ;;  %v384_v23 = vmul.f32 %v3273_v11, %v3273_v11 }
  0xcc   :  { %v3230_v42 = vmul.f32 %v2669_v6, %v453_v59 }
  0xcd   :  { %715 = vperm.xlu1 %2657, %v3202_v18   ;;  %v3232_v60 = vpop.xlane.xlu1 %168  ;;  %v604_v45 = vmul.f32 %v3217_v5, %v3153_v19 }
  0xce   :  { %v235_v54 = vpop.xlane.xlu0 %234  ;;  %v2671_v2 = vpop.eup %2670  ;;  %v3326_v19 = vmul.f32 0.00390625, %v3232_v60  ;;  %v603_v58 = vmul.f32 %v3230_v42, %v3159_v0 }
  0xcf   :  { %v353_v1 = vmul.f32 0.00390625, %v235_v54  ;;  %v3245_v50 = vmul.f32 %v2671_v2, %v452_v43  ;;  %v3281_v54 = vmul.f32 0.00390625, %v3123_v53  ;;  %v477_v53 = vadd.f32 1e-05, %v417_v32  ;;  %v573_v32 = vld [vmem:[%s4803_s2 + $0x50] sm:$0xff] }
  0xd0   :  { %v476_v2 = vadd.f32 1e-05, %v416_v36 }
  0xd1   :  { %v413_v8 = vsub.f32 %v353_v1, %v383_v13  ;;  %710 = vperm.xlu1 %2657, %v3217_v5   ;;  %v3258_v7 = vpop.xlane.xlu1 %165  ;;  %v354_v13 = vmul.f32 0.00390625, %v3197_v20  ;;  %v605_v1 = vmul.f32 %v3202_v18, %v3147_v26  ;;  %v385_v20 = vmul.f32 %v3281_v54, %v3281_v54 }
  0xd2   :  { %v3228_v39 = vpop.xlane.xlu0 %321  ;;  %v3338_v60 = vmul.f32 0.00390625, %v3258_v7  ;;  %v448_v7 = vld [vmem:[%s4802_s1 + $0x28] sm:$0xff] }
  0xd3   :  { %v473_v41 = vadd.f32 1e-05, %v413_v8  ;;  %v636_v8 = vsub.f32 %v576_v55, %v606_v14  ;;  %v414_v26 = vsub.f32 %v354_v13, %v384_v23  ;;  %v415_v40 = vsub.f32 %v355_v34, %v385_v20 }
  0xd4   :  { %v635_v43 = vsub.f32 %v575_v24, %v605_v1  ;;  %v382_v5 = vmul.f32 0.00390625, %v3228_v39  ;;  %v411_v39 = vmul.f32 %v3326_v19, %v3326_v19  ;;  %v602_v14 = vmul.f32 %v3245_v50, %v3163_v38 }
  0xd5   :  { %2672 = vrsqrt.f32 %v473_v41  ;;  %705 = vperm.xlu1 %2657, %v3230_v42   ;;  %v3278_v12 = vpop.xlane.xlu1 %162  ;;  %v3311_v41 = vmul.f32 0.00390625, %v3213_v33  ;;  %v474_v61 = vadd.f32 1e-05, %v414_v26  ;;  %v475_v33 = vadd.f32 1e-05, %v415_v40 }
  0xd6   :  { %2674 = vrsqrt.f32 %v481_v9  ;;  %v3243_v46 = vpop.xlane.xlu0 %318  ;;  %v3357_v38 = vmul.f32 0.00390625, %v3278_v12 }
  0xd7   :  { %2676 = vrsqrt.f32 %v480_v47  ;;  %v381_v0 = vmul.f32 0.00390625, %v3243_v46  ;;  %v410_v46 = vmul.f32 %v3338_v60, %v3338_v60 }
  0xd8   :  { %2678 = vrsqrt.f32 %v479_v63  ;;  %v412_v63 = vmul.f32 %v3311_v41, %v3311_v41 }
  0xd9   :  { %700 = vperm.xlu1 %2657, %v3245_v50   ;;  %2680 = vrsqrt.f32 %v478_v62  ;;  %v160_v18 = vpop.xlane.xlu1 %159  ;;  %v441_v23 = vsub.f32 %v381_v0, %v411_v39 }
  0xda   :  { %v3267_v27 = vpop.xlane.xlu0 %315  ;;  %2682 = vrsqrt.f32 %v477_v53  ;;  %v442_v62 = vsub.f32 %v382_v5, %v412_v63  ;;  %v3366_v20 = vmul.f32 0.00390625, %v160_v18  ;;  %v446_v18 = vld [vmem:[%s4802_s1 + $0x18] sm:$0xff] }
  0xdb   :  { %2684 = vrsqrt.f32 %v476_v2  ;;  %v380_v22 = vmul.f32 0.00390625, %v3267_v27  ;;  %v571_v27 = vld [vmem:[%s4803_s2 + $0x40] sm:$0xff]  ;;  %v501_v12 = vadd.f32 1e-05, %v441_v23 }
  0xdc   :  { %2686 = vrsqrt.f32 %v474_v61 }
  0xdd   :  { %940 = vperm.xlu1 %2657, %v638_v29   ;;  %v634_v29 = vsub.f32 %v574_v51, %v604_v45  ;;  %v157_v10 = vpop.xlane.xlu1 %156  ;;  %2688 = vrsqrt.f32 %v475_v33  ;;  %v444_v33 = vld [vmem:[%s4802_s1 + $0x8] sm:$0xff] }
  0xde   :  { %v3297_v6 = vpop.xlane.xlu0 %312 }
  0xe1   :  { %935 = vperm.xlu1 %2657, %v637_v3   ;;  %v633_v3 = vsub.f32 %v573_v32, %v603_v58  ;;  %v154_v13 = vpop.xlane.xlu1 %153  ;;  %v569_v58 = vld [vmem:[%s4803_s2 + $0x30] sm:$0xff] }
  0xe2   :  { %v2673_v21 = vpop.eup %2672  ;;  %v3321_v57 = vpop.xlane.xlu0 %309 }
  0xe3   :  { %v2675_v59 = vpop.eup %2674  ;;  %v3299_v9 = vmul.f32 %v2673_v21, %v443_v56  ;;  %v572_v56 = vld [vmem:[%s4803_s2 + $0x48] sm:$0xff]  ;;  %v502_v21 = vadd.f32 1e-05, %v442_v62  ;;  %v378_v51 = vmul.f32 0.00390625, %v3321_v57  ;;  %v3396_v62 = vmul.f32 0.00390625, %v154_v13 }
  0xe4   :  { %v541_v4 = vmul.f32 %v2675_v59, %v451_v37  ;;  %v2677_v47 = vpop.eup %2676  ;;  %v632_v34 = vsub.f32 %v572_v56, %v602_v14  ;;  %v447_v59 = vld [vmem:[%s4802_s1 + $0x20] sm:$0xff]  ;;  %v409_v37 = vmul.f32 %v3357_v38, %v3357_v38  ;;  %v568_v14 = vld [vmem:[%s4803_s2 + $0x28] sm:$0xff] }
  0xe5   :  { %930 = vperm.xlu1 %2657, %v636_v8   ;;  %655 = vperm.xlu0 %2656, %v3299_v9   ;;  %v2679_v16 = vpop.eup %2678  ;;  %v540_v17 = vmul.f32 %v2677_v47, %v450_v48  ;;  %v440_v8 = vsub.f32 %v380_v22, %v410_v46  ;;  %2690 = vrsqrt.f32 %v502_v21  ;;  %v151_v2 = vpop.xlane.xlu1 %150  ;;  %v408_v47 = vmul.f32 %v3366_v20, %v3366_v20  ;;  %v567_v22 = vld [vmem:[%s4803_s2 + $0x20] sm:$0xff] }
  0xe6   :  { %v3343_v42 = vpop.xlane.xlu0 %306  ;;  %v539_v28 = vmul.f32 %v2679_v16, %v449_v49  ;;  %v2681_v55 = vpop.eup %2680  ;;  %v601_v1 = vmul.f32 %v541_v4, %v3189_v30  ;;  %v379_v30 = vmul.f32 0.00390625, %v3297_v6  ;;  %2692 = vrsqrt.f32 %v501_v12  ;;  %v566_v12 = vld [vmem:[%s4803_s2 + $0x18] sm:$0xff] }
  0xe7   :  { %v2683_v50 = vpop.eup %2682  ;;  %v538_v53 = vmul.f32 %v2681_v55, %v448_v7  ;;  %v600_v40 = vmul.f32 %v540_v17, %v3210_v15  ;;  %v500_v45 = vadd.f32 1e-05, %v440_v8  ;;  %v3380_v15 = vmul.f32 0.00390625, %v157_v10 }
  0xe8   :  { %v537_v24 = vmul.f32 %v2683_v50, %v447_v59  ;;  %v631_v26 = vsub.f32 %v571_v27, %v601_v1  ;;  %v439_v48 = vsub.f32 %v379_v30, %v409_v37  ;;  %v599_v16 = vmul.f32 %v539_v28, %v3220_v35  ;;  %v563_v37 = vld [vmem:[%s4803_s2] sm:$0xff] }
  0xe9   :  { %695 = vperm.xlu1 %2657, %v541_v4   ;;  %925 = vperm.xlu0 %2656, %v635_v43   ;;  %v2685_v4 = vpop.eup %2684  ;;  %v570_v43 = vld [vmem:[%s4803_s2 + $0x38] sm:$0xff]  ;;  %2694 = vrsqrt.f32 %v500_v45  ;;  %v148_v57 = vpop.xlane.xlu1 %147  ;;  %v407_v32 = vmul.f32 %v3380_v15, %v3380_v15  ;;  %v438_v39 = vsub.f32 %v378_v51, %v408_v47  ;;  %v377_v35 = vmul.f32 0.00390625, %v3343_v42 }
  0xea   :  { %v304_v36 = vpop.xlane.xlu0 %303  ;;  %v2687_v6 = vpop.eup %2686  ;;  %v536_v63 = vmul.f32 %v2685_v4, %v446_v18  ;;  %v630_v5 = vsub.f32 %v570_v43, %v600_v40  ;;  %v499_v49 = vadd.f32 1e-05, %v439_v48  ;;  %v597_v7 = vmul.f32 %v537_v24, %v3250_v52  ;;  %v564_v52 = vld [vmem:[%s4803_s2 + $0x8] sm:$0xff]  ;;  %v471_v40 = vld [vmem:[%s4802_s1 + $0xe0] sm:$0xff] }
  0xeb   :  { %v534_v10 = vmul.f32 %v2687_v6, %v444_v33  ;;  %v498_v56 = vadd.f32 1e-05, %v438_v39  ;;  %v437_v46 = vsub.f32 %v377_v35, %v407_v32  ;;  %v3409_v21 = vmul.f32 0.00390625, %v151_v2  ;;  %v565_v6 = vld [vmem:[%s4803_s2 + $0x10] sm:$0xff] }
  0xec   :  { %2696 = vrsqrt.f32 %v499_v49  ;;  %v376_v23 = vmul.f32 0.00390625, %v304_v36  ;;  %v627_v1 = vsub.f32 %v567_v22, %v597_v7  ;;  %v596_v59 = vmul.f32 %v536_v63, %v3270_v25 }
  0xed   :  { %690 = vperm.xlu1 %2657, %v540_v17   ;;  %920 = vperm.xlu0 %2656, %v634_v29   ;;  %v2689_v17 = vpop.eup %2688  ;;  %v445_v29 = vld [vmem:[%s4802_s1 + $0x10] sm:$0xff]  ;;  %v594_v42 = vmul.f32 %v534_v10, %v3273_v11  ;;  %v472_v11 = vld [vmem:[%s4802_s1 + $0xe8] sm:$0xff]  ;;  %2698 = vrsqrt.f32 %v498_v56  ;;  %v497_v27 = vadd.f32 1e-05, %v437_v46 }
  0xee   :  { %v301_v61 = vpop.xlane.xlu0 %300  ;;  %v535_v0 = vmul.f32 %v2689_v17, %v445_v29  ;;  %v626_v4 = vsub.f32 %v566_v12, %v596_v59 }
  0xef   :  { %v624_v36 = vsub.f32 %v564_v52, %v594_v42  ;;  %v375_v25 = vmul.f32 0.00390625, %v301_v61  ;;  %2700 = vrsqrt.f32 %v497_v27  ;;  %v470_v61 = vld [vmem:[%s4802_s1 + $0xd8] sm:$0xff] }
  0xf0   :  { %v595_v43 = vmul.f32 %v535_v0, %v3281_v54  ;;  %v590_v42 = vld [vmem:[%s4803_s2 + $0xd8] sm:$0xff] }
  0xf1   :  { %685 = vperm.xlu1 %2657, %v539_v28   ;;  %915 = vperm.xlu0 %2656, %v633_v3   ;;  %v629_v28 = vsub.f32 %v569_v58, %v599_v16  ;;  %v598_v3 = vmul.f32 %v538_v53, %v3240_v44  ;;  %v406_v44 = vmul.f32 %v3396_v62, %v3396_v62  ;;  %v592_v16 = vld [vmem:[%s4803_s2 + $0xe8] sm:$0xff] }
  0xf2   :  { %v298_v55 = vpop.xlane.xlu0 %297  ;;  %v2691_v13 = vpop.eup %2690  ;;  %v625_v29 = vsub.f32 %v565_v6, %v595_v43 }
  0xf3   :  { %v628_v50 = vsub.f32 %v568_v14, %v598_v3  ;;  %v562_v30 = vmul.f32 %v2691_v13, %v472_v11  ;;  %v591_v3 = vld [vmem:[%s4803_s2 + $0xe0] sm:$0xff]  ;;  %v469_v14 = vld [vmem:[%s4802_s1 + $0xd0] sm:$0xff] }
  0xf5   :  { %680 = vperm.xlu1 %2657, %v538_v53   ;;  %910 = vperm.xlu0 %2656, %v632_v34   ;;  %v145_v53 = vpop.xlane.xlu1 %144  ;;  %v593_v34 = vmul.f32 %v3299_v9, %v3200_v31  ;;  %v405_v31 = vmul.f32 %v3409_v21, %v3409_v21  ;;  %v436_v9 = vsub.f32 %v376_v23, %v406_v44 }
  0xf6   :  { %v295_v8 = vpop.xlane.xlu0 %294  ;;  %v3434_v47 = vmul.f32 0.00390625, %v145_v53  ;;  %v622_v48 = vmul.f32 %v562_v30, %v3311_v41 }
  0xf7   :  { %v623_v18 = vsub.f32 %v563_v37, %v593_v34  ;;  %v496_v33 = vadd.f32 1e-05, %v436_v9  ;;  %v435_v54 = vsub.f32 %v375_v25, %v405_v31  ;;  %v589_v37 = vld [vmem:[%s4803_s2 + $0xd0] sm:$0xff] }
  0xf8   :  { %v403_v58 = vmul.f32 %v3434_v47, %v3434_v47 }
  0xf9   :  { %675 = vperm.xlu1 %2657, %v537_v24   ;;  %905 = vperm.xlu0 %2656, %v631_v26   ;;  %v2693_v24 = vpop.eup %2692  ;;  %v3428_v26 = vmul.f32 0.00390625, %v148_v57  ;;  %v142_v2 = vpop.xlane.xlu1 %141  ;;  %2702 = vrsqrt.f32 %v496_v33  ;;  %v495_v39 = vadd.f32 1e-05, %v435_v54  ;;  %v587_v33 = vld [vmem:[%s4803_s2 + $0xc0] sm:$0xff] }
  0xfa   :  { %v2695_v45 = vpop.eup %2694  ;;  %v561_v51 = vmul.f32 %v2693_v24, %v471_v40  ;;  %v292_v17 = vpop.xlane.xlu0 %291  ;;  %v3450_v57 = vmul.f32 0.00390625, %v142_v2 }
  0xfb   :  { %v560_v41 = vmul.f32 %v2695_v45, %v470_v61  ;;  %v2697_v32 = vpop.eup %2696  ;;  %2704 = vrsqrt.f32 %v495_v39  ;;  %v466_v45 = vld [vmem:[%s4802_s1 + $0xb8] sm:$0xff] }
  0xfc   :  { %v621_v49 = vmul.f32 %v561_v51, %v3326_v19  ;;  %v402_v19 = vmul.f32 %v3450_v57, %v3450_v57  ;;  %v559_v22 = vmul.f32 %v2697_v32, %v469_v14  ;;  %v2699_v13 = vpop.eup %2698  ;;  %v464_v32 = vld [vmem:[%s4802_s1 + $0xa8] sm:$0xff]  ;;  %v585_v14 = vld [vmem:[%s4803_s2 + $0xb0] sm:$0xff] }
  0xfd   :  { %670 = vperm.xlu1 %2657, %v536_v63   ;;  %900 = vperm.xlu0 %2656, %v630_v5   ;;  %v404_v63 = vmul.f32 %v3428_v26, %v3428_v26  ;;  %v374_v5 = vmul.f32 0.00390625, %v298_v55  ;;  %v620_v55 = vmul.f32 %v560_v41, %v3338_v60  ;;  %v468_v60 = vld [vmem:[%s4802_s1 + $0xc8] sm:$0xff]  ;;  %v2701_v27 = vpop.eup %2700 }
  0xfe   :  { %v289_v56 = vpop.xlane.xlu0 %288  ;;  %v651_v46 = vsub.f32 %v591_v3, %v621_v49  ;;  %v558_v59 = vmul.f32 %v2699_v13, %v468_v60  ;;  %v586_v49 = vld [vmem:[%s4803_s2 + $0xb8] sm:$0xff] }
  0xff   :  { %v434_v35 = vsub.f32 %v374_v5, %v404_v63  ;;  %v650_v52 = vsub.f32 %v590_v42, %v620_v55  ;;  %v371_v12 = vmul.f32 0.00390625, %v289_v56  ;;  %v465_v5 = vld [vmem:[%s4802_s1 + $0xb0] sm:$0xff]  ;;  %v463_v55 = vld [vmem:[%s4802_s1 + $0xa0] sm:$0xff]  ;;  %v462_v13 = vld [vmem:[%s4802_s1 + $0x98] sm:$0xff] }
 0x100   :  { %v618_v9 = vmul.f32 %v558_v59, %v3366_v20 }
 0x101   :  { %665 = vperm.xlu1 %2657, %v535_v0   ;;  %895 = vperm.xlu0 %2656, %v629_v28   ;;  %v373_v0 = vmul.f32 0.00390625, %v295_v8  ;;  %v139_v28 = vpop.xlane.xlu1 %138  ;;  %v494_v44 = vadd.f32 1e-05, %v434_v35 }
 0x102   :  { %v3462_v7 = vmul.f32 0.00390625, %v139_v28  ;;  %v286_v24 = vpop.xlane.xlu0 %285 }
 0x103   :  { %v433_v23 = vsub.f32 %v373_v0, %v403_v58  ;;  %2706 = vrsqrt.f32 %v494_v44 }
 0x104   :  { %v401_v11 = vmul.f32 %v3462_v7, %v3462_v7 }
 0x105   :  { %660 = vperm.xlu1 %2657, %v534_v10   ;;  %890 = vperm.xlu0 %2656, %v628_v50   ;;  %v652_v10 = vsub.f32 %v592_v16, %v622_v48  ;;  %v372_v50 = vmul.f32 0.00390625, %v292_v17  ;;  %v136_v53 = vpop.xlane.xlu1 %135 }
 0x106   :  { %v3472_v34 = vmul.f32 0.00390625, %v136_v53  ;;  %v431_v2 = vsub.f32 %v371_v12, %v401_v11  ;;  %v2703_v43 = vpop.eup %2702 }
 0x107   :  { %v432_v8 = vsub.f32 %v372_v50, %v402_v19  ;;  %v556_v63 = vmul.f32 %v2703_v43, %v466_v45  ;;  %v579_v43 = vld [vmem:[%s4803_s2 + $0x80] sm:$0xff] }
 0x108   :  { %v2705_v54 = vpop.eup %2704 }
 0x109   :  { %870 = vperm.xlu1 %2657, %v624_v36   ;;  %885 = vperm.xlu0 %2656, %v627_v1   ;;  %v619_v1 = vmul.f32 %v559_v22, %v3357_v38  ;;  %v493_v36 = vadd.f32 1e-05, %v433_v23  ;;  %v400_v38 = vmul.f32 %v3472_v34, %v3472_v34  ;;  %v492_v40 = vadd.f32 1e-05, %v432_v8  ;;  %v133_v6 = vpop.xlane.xlu1 %132 }
 0x10a   :  { %v3497_v16 = vmul.f32 0.00390625, %v133_v6  ;;  %v555_v58 = vmul.f32 %v2705_v54, %v465_v5 }
 0x10b   :  { %v649_v31 = vsub.f32 %v589_v37, %v619_v1  ;;  %2708 = vrsqrt.f32 %v493_v36  ;;  %v460_v36 = vld [vmem:[%s4802_s1 + $0x88] sm:$0xff] }
 0x10c   :  { %2710 = vrsqrt.f32 %v492_v40  ;;  %v399_v39 = vmul.f32 %v3497_v16, %v3497_v16  ;;  %v459_v40 = vld [vmem:[%s4802_s1 + $0x80] sm:$0xff] }
 0x10d   :  { %880 = vperm.xlu0 %2656, %v626_v4   ;;  %865 = vperm.xlu1 %2657, %v623_v18   ;;  %v370_v4 = vmul.f32 0.00390625, %v286_v24  ;;  %v588_v18 = vld [vmem:[%s4803_s2 + $0xc8] sm:$0xff] }
 0x10e   :  { %v648_v48 = vsub.f32 %v588_v18, %v618_v9 }
 0x10f   :  { %v430_v61 = vsub.f32 %v370_v4, %v400_v38 }
 0x111   :  { %875 = vperm.xlu0 %2656, %v625_v29   ;;  %1010 = vperm.xlu1 %2657, %v652_v10   ;;  %v283_v29 = vpop.xlane.xlu1 %282  ;;  %v2707_v10 = vpop.eup %2706 }
 0x112   :  { %v369_v35 = vmul.f32 0.00390625, %v283_v29  ;;  %v554_v28 = vmul.f32 %v2707_v10, %v464_v32 }
 0x114   :  { %v429_v19 = vsub.f32 %v369_v35, %v399_v39 }
 0x115   :  { %800 = vperm.xlu0 %2656, %v562_v30   ;;  %1005 = vperm.xlu1 %2657, %v651_v46   ;;  %v467_v30 = vld [vmem:[%s4802_s1 + $0xc0] sm:$0xff]  ;;  %v614_v46 = vmul.f32 %v554_v28, %v3428_v26 }
 0x116   :  { %v557_v25 = vmul.f32 %v2701_v27, %v467_v30  ;;  %v489_v44 = vadd.f32 1e-05, %v429_v19  ;;  %v583_v26 = vld [vmem:[%s4803_s2 + $0xa0] sm:$0xff] }
 0x118   :  { %v617_v20 = vmul.f32 %v557_v25, %v3380_v15  ;;  %v490_v15 = vadd.f32 1e-05, %v430_v61  ;;  %v2709_v3 = vpop.eup %2708  ;;  %v2766_v61 = vld [vmem:[%s4801_s0 + $0xf0] sm:$0xff] }
 0x119   :  { %795 = vperm.xlu0 %2656, %v561_v51   ;;  %1000 = vperm.xlu1 %2657, %v650_v52   ;;  %v491_v51 = vadd.f32 1e-05, %v431_v2  ;;  %v553_v42 = vmul.f32 %v2709_v3, %v463_v55  ;;  %v461_v52 = vld [vmem:[%s4802_s1 + $0x90] sm:$0xff] }
 0x11a   :  { %v647_v17 = vsub.f32 %v587_v33, %v617_v20 }
 0x11b   :  { %2712 = vrsqrt.f32 %v491_v51  ;;  %v613_v50 = vmul.f32 %v553_v42, %v3434_v47  ;;  %v582_v47 = vld [vmem:[%s4803_s2 + $0x98] sm:$0xff] }
 0x11c   :  { %2714 = vrsqrt.f32 %v490_v15  ;;  %v2768_v15 = vld [vmem:[%s4801_s0 + $0xe0] sm:$0xff] }
 0x11d   :  { %790 = vperm.xlu0 %2656, %v560_v41   ;;  %995 = vperm.xlu1 %2657, %v649_v31   ;;  %v616_v41 = vmul.f32 %v556_v63, %v3396_v62  ;;  %v615_v62 = vmul.f32 %v555_v58, %v3409_v21  ;;  %v584_v21 = vld [vmem:[%s4803_s2 + $0xa8] sm:$0xff]  ;;  %2716 = vrsqrt.f32 %v489_v44  ;;  %v643_v11 = vsub.f32 %v583_v26, %v613_v50 }
 0x11e   :  { %v644_v23 = vsub.f32 %v584_v21, %v614_v46  ;;  %v580_v31 = vld [vmem:[%s4803_s2 + $0x88] sm:$0xff] }
 0x11f   :  { %v646_v0 = vsub.f32 %v586_v49, %v616_v41  ;;  %v645_v56 = vsub.f32 %v585_v14, %v615_v62  ;;  %v2769_v41 = vld [vmem:[%s4801_s0 + $0xe8] sm:$0xff] }
 0x121   :  { %785 = vperm.xlu0 %2656, %v559_v22   ;;  %990 = vperm.xlu1 %2657, %v648_v48   ;;  %v2711_v22 = vpop.eup %2710  ;;  %v1134_v48 = vld [vmem:[%s4804_s3 + $0x8] sm:$0xff] }
 0x122   :  { %v552_v60 = vmul.f32 %v2711_v22, %v462_v13  ;;  %2606 = vmatprep.mubr.msk.f32.mxu0 %vm1181_vm0, %v1134_v48  ;;  %2630 = vmatprep.mubr.msk.f32.mxu1 %vm1181_vm0, %v1134_v48  ;;  %v2772_v22 = vld [vmem:[%s4801_s0 + $0xc0] sm:$0xff]  ;;  %v2773_v13 = vld [vmem:[%s4801_s0 + $0xc8] sm:$0xff]  ;;  %v2778_v48 = vld [vmem:[%s4801_s0 + $0x90] sm:$0xff] }
 0x124   :  { %v612_v1 = vmul.f32 %v552_v60, %v3450_v57  ;;  %v581_v57 = vld [vmem:[%s4803_s2 + $0x90] sm:$0xff] }
 0x125   :  { %780 = vperm.xlu0 %2656, %v558_v59   ;;  %985 = vperm.xlu1 %2657, %v647_v17  }
 0x126   :  { %v642_v8 = vsub.f32 %v582_v47, %v612_v1  ;;  %v2774_v1 = vld [vmem:[%s4801_s0 + $0xb0] sm:$0xff] }
 0x128   :  { %v2713_v53 = vpop.eup %2712 }
 0x129   :  { %775 = vperm.xlu0 %2656, %v557_v25   ;;  %980 = vperm.xlu1 %2657, %v646_v0   ;;  %v551_v59 = vmul.f32 %v2713_v53, %v461_v52  ;;  %v2715_v27 = vpop.eup %2714  ;;  %v2770_v0 = vld [vmem:[%s4801_s0 + $0xd0] sm:$0xff] }
 0x12a   :  { %v550_v37 = vmul.f32 %v2715_v27, %v460_v36  ;;  %v2775_v27 = vld [vmem:[%s4801_s0 + $0xb8] sm:$0xff] }
 0x12b   :  { %v611_v12 = vmul.f32 %v551_v59, %v3462_v7  ;;  %v2717_v7 = vpop.eup %2716 }
 0x12c   :  { %v610_v38 = vmul.f32 %v550_v37, %v3472_v34  ;;  %v549_v2 = vmul.f32 %v2717_v7, %v459_v40 }
 0x12d   :  { %770 = vperm.xlu0 %2656, %v556_v63   ;;  %975 = vperm.xlu1 %2657, %v645_v56   ;;  %v641_v24 = vsub.f32 %v581_v57, %v611_v12  ;;  %v2767_v63 = vld [vmem:[%s4801_s0 + $0xf8] sm:$0xff] }
 0x12e   :  { %v640_v25 = vsub.f32 %v580_v31, %v610_v38  ;;  %v609_v34 = vmul.f32 %v549_v2, %v3497_v16 }
 0x130   :  { %v639_v45 = vsub.f32 %v579_v43, %v609_v34 }
 0x131   :  { %765 = vperm.xlu0 %2656, %v555_v58   ;;  %970 = vperm.xlu1 %2657, %v644_v23  }
 0x135   :  { %760 = vperm.xlu0 %2656, %v554_v28   ;;  %965 = vperm.xlu1 %2657, %v643_v11   ;;  %v2771_v28 = vld [vmem:[%s4801_s0 + $0xd8] sm:$0xff] }
 0x139   :  { %755 = vperm.xlu0 %2656, %v553_v42   ;;  %960 = vperm.xlu1 %2657, %v642_v8  }
 0x13b   :  { %v731_v30 = vpop.permute.xlu1 %730 }
 0x13c   :  { %v833_v33 = vmul.f32 %v2766_v61, %v731_v30  ;;  %v834_v54 = vmul.f32 %v2767_v63, %v731_v30  ;;  %v2779_v61 = vld [vmem:[%s4801_s0 + $0x98] sm:$0xff] }
 0x13d   :  { %750 = vperm.xlu0 %2656, %v552_v60   ;;  %955 = vperm.xlu1 %2657, %v641_v24   ;;  %v2776_v24 = vld [vmem:[%s4801_s0 + $0xa0] sm:$0xff] }
 0x13f   :  { %v726_v9 = vpop.permute.xlu1 %725 }
 0x140   :  { %v831_v29 = vmul.f32 %v2768_v15, %v726_v9  ;;  %v832_v58 = vmul.f32 %v2769_v41, %v726_v9 }
 0x141   :  { %745 = vperm.xlu0 %2656, %v551_v59   ;;  %950 = vperm.xlu1 %2657, %v640_v25   ;;  %v2777_v25 = vld [vmem:[%s4801_s0 + $0xa8] sm:$0xff] }
 0x144   :  { %v721_v4 = vpop.permute.xlu1 %720 }
 0x145   :  { %740 = vperm.xlu0 %2656, %v550_v37   ;;  %v829_v62 = vmul.f32 %v2770_v0, %v721_v4  ;;  %v830_v3 = vmul.f32 %v2771_v28, %v721_v4 }
 0x148   :  { %v716_v18 = vpop.permute.xlu1 %715 }
 0x149   :  { %735 = vperm.xlu0 %2656, %v549_v2   ;;  %v827_v21 = vmul.f32 %v2772_v22, %v716_v18  ;;  %v828_v44 = vmul.f32 %v2773_v13, %v716_v18 }
 0x14c   :  { %v711_v6 = vpop.permute.xlu1 %710 }
 0x14d   :  { %945 = vperm.xlu0 %2656, %v639_v45   ;;  %v825_v59 = vmul.f32 %v2774_v1, %v711_v6  ;;  %v826_v47 = vmul.f32 %v2775_v27, %v711_v6  ;;  %v2827_v6 = vmov 0.0  }
 0x14e   :  { %1601 = vmatprep.subr.mxu1 %v2827_v6 }
 0x150   :  { %v3556_v20 = vpop.permute.xlu1 %705 }
 0x151   :  { %v823_v38 = vmul.f32 %v2776_v24, %v3556_v20  ;;  %v824_v7 = vmul.f32 %v2777_v25, %v3556_v20 }
 0x154   :  { %v3558_v51 = vpop.permute.xlu1 %700 }
 0x155   :  { %v821_v20 = vmul.f32 %v2778_v48, %v3558_v51 }
 0x158   :  { %v941_v5 = vpop.permute.xlu1 %940 }
 0x159   :  { %v1044_v16 = vadd.f32 %v941_v5, %v834_v54  ;;  %v1043_v17 = vadd.f32 %v941_v5, %v833_v33  ;;  %v822_v33 = vmul.f32 %v2779_v61, %v3558_v51  ;;  %v2781_v51 = vld [vmem:[%s4801_s0 + $0x88] sm:$0xff] }
 0x15b   :  { %v1104_v10 = vmax.f32 %v1044_v16, 0.0  ;;  %v1103_v49 = vmax.f32 %v1043_v17, 0.0 }
 0x15c   :  { %v936_v32 = vpop.permute.xlu1 %935 }
 0x15d   :  { %v1041_v39 = vadd.f32 %v936_v32, %v831_v29  ;;  %v1042_v35 = vadd.f32 %v936_v32, %v832_v58  ;;  %1254 = vmatprep.subr.mxu0 %v1104_v10  ;;  %v1556_v60 = vadd.f32 %v1104_v10, %v1103_v49  ;;  %v2780_v58 = vld [vmem:[%s4801_s0 + $0x80] sm:$0xff] }
 0x15e   :  { %1255 = vmatpush1.msra.mxu0 %v1103_v49 }
 0x15f   :  { %v1102_v14 = vmax.f32 %v1042_v35, 0.0  ;;  %v1101_v55 = vmax.f32 %v1041_v39, 0.0 }
 0x160   :  { %v931_v19 = vpop.permute.xlu1 %930  ;;  %v3578_v56 = vpop.permute.xlu0 %655 }
 0x161   :  { %v1039_v46 = vadd.f32 %v931_v19, %v829_v62  ;;  %v1040_v42 = vadd.f32 %v931_v19, %v830_v3  ;;  %1256 = vmatprep.subr.mxu0 %v1102_v14  ;;  %v1553_v9 = vadd.f32 %v1102_v14, %v1101_v55  ;;  %v2782_v14 = vld [vmem:[%s4801_s0 + $0x70] sm:$0xff]  ;;  %v2783_v19 = vld [vmem:[%s4801_s0 + $0x78] sm:$0xff] }
 0x162   :  { %1257 = vmatpush1.msra.mxu0 %v1101_v55 }
 0x163   :  { %v1100_v23 = vmax.f32 %v1040_v42, 0.0  ;;  %v1099_v50 = vmax.f32 %v1039_v46, 0.0 }
 0x164   :  { %v696_v53 = vpop.permute.xlu1 %695  ;;  %v926_v26 = vpop.permute.xlu0 %925 }
 0x165   :  { %v1037_v52 = vadd.f32 %v926_v26, %v827_v21  ;;  %v1038_v11 = vadd.f32 %v926_v26, %v828_v44  ;;  %1258 = vmatprep.subr.mxu0 %v1100_v23  ;;  %1557 = vadd.xlane.f32.xlu1 %v1556_v60  ;;  %v1550_v45 = vadd.f32 %v1100_v23, %v1099_v50  ;;  %v2784_v60 = vld [vmem:[%s4801_s0 + $0x60] sm:$0xff]  ;;  %v2785_v26 = vld [vmem:[%s4801_s0 + $0x68] sm:$0xff] }
 0x166   :  { %1259 = vmatpush1.msra.mxu0 %v1099_v50  ;;  %v819_v10 = vmul.f32 %v2780_v58, %v696_v53  ;;  %v820_v49 = vmul.f32 %v2781_v51, %v696_v53 }
 0x167   :  { %v1098_v36 = vmax.f32 %v1038_v11, 0.0  ;;  %v1097_v8 = vmax.f32 %v1037_v52, 0.0 }
 0x168   :  { %v691_v12 = vpop.permute.xlu1 %690  ;;  %v921_v37 = vpop.permute.xlu0 %920 }
 0x169   :  { %v1035_v57 = vadd.f32 %v921_v37, %v825_v59  ;;  %v1036_v30 = vadd.f32 %v921_v37, %v826_v47  ;;  %1260 = vmatprep.subr.mxu0 %v1098_v36  ;;  %v1547_v31 = vadd.f32 %v1098_v36, %v1097_v8  ;;  %v817_v55 = vmul.f32 %v2782_v14, %v691_v12  ;;  %v2795_v14 = vld [vmem:[%s4801_s0 + $0x8] sm:$0xff] }
 0x16a   :  { %1261 = vmatpush1.msra.mxu0 %v1097_v8  ;;  %v818_v46 = vmul.f32 %v2783_v19, %v691_v12  ;;  %v2786_v12 = vld [vmem:[%s4801_s0 + $0x50] sm:$0xff] }
 0x16b   :  { %v1096_v40 = vmax.f32 %v1036_v30, 0.0  ;;  %v1095_v2 = vmax.f32 %v1035_v57, 0.0  ;;  %1548 = vadd.xlane.f32.xlu1 %v1547_v31  ;;  %v2787_v57 = vld [vmem:[%s4801_s0 + $0x58] sm:$0xff] }
 0x16c   :  { %v686_v4 = vpop.permute.xlu1 %685  ;;  %1554 = vadd.xlane.f32.xlu0 %v1553_v9  ;;  %v916_v34 = vpop.permute.xlu0 %915 }
 0x16d   :  { %v1033_v18 = vadd.f32 %v916_v34, %v823_v38  ;;  %v1034_v43 = vadd.f32 %v916_v34, %v824_v7  ;;  %1262 = vmatprep.subr.mxu0 %v1096_v40  ;;  %v1544_v41 = vadd.f32 %v1096_v40, %v1095_v2  ;;  %v815_v53 = vmul.f32 %v2784_v60, %v686_v4  ;;  %v2789_v34 = vld [vmem:[%s4801_s0 + $0x48] sm:$0xff] }
 0x16e   :  { %1263 = vmatpush1.msra.mxu0 %v1095_v2  ;;  %v816_v52 = vmul.f32 %v2785_v26, %v686_v4  ;;  %v2788_v2 = vld [vmem:[%s4801_s0 + $0x40] sm:$0xff] }
 0x16f   :  { %v1094_v63 = vmax.f32 %v1034_v43, 0.0  ;;  %v1093_v54 = vmax.f32 %v1033_v18, 0.0 }
 0x170   :  { %v681_v5 = vpop.permute.xlu1 %680  ;;  %1551 = vadd.xlane.f32.xlu0 %v1550_v45  ;;  %v911_v16 = vpop.permute.xlu0 %910 }
 0x171   :  { %v1031_v17 = vadd.f32 %v911_v16, %v821_v20  ;;  %v1032_v15 = vadd.f32 %v911_v16, %v822_v33  ;;  %1264 = vmatprep.subr.mxu0 %v1094_v63  ;;  %v1541_v29 = vadd.f32 %v1094_v63, %v1093_v54  ;;  %v813_v37 = vmul.f32 %v2786_v12, %v681_v5  ;;  %v2790_v63 = vld [vmem:[%s4801_s0 + $0x30] sm:$0xff] }
 0x172   :  { %1265 = vmatpush1.msra.mxu0 %v1093_v54  ;;  %v814_v30 = vmul.f32 %v2787_v57, %v681_v5  ;;  %v2791_v5 = vld [vmem:[%s4801_s0 + $0x10] sm:$0xff] }
 0x173   :  { %v1092_v32 = vmax.f32 %v1032_v15, 0.0  ;;  %v1091_v39 = vmax.f32 %v1031_v17, 0.0  ;;  %1542 = vadd.xlane.f32.xlu1 %v1541_v29  ;;  %v2792_v15 = vld [vmem:[%s4801_s0 + $0x38] sm:$0xff] }
 0x174   :  { %v676_v35 = vpop.permute.xlu1 %675  ;;  %1545 = vadd.xlane.f32.xlu0 %v1544_v41  ;;  %v906_v0 = vpop.permute.xlu0 %905  ;;  %v2793_v41 = vld [vmem:[%s4801_s0 + $0x18] sm:$0xff] }
 0x175   :  { %v1029_v62 = vadd.f32 %v906_v0, %v819_v10  ;;  %v1030_v28 = vadd.f32 %v906_v0, %v820_v49  ;;  %1266 = vmatprep.subr.mxu0 %v1092_v32  ;;  %v1538_v3 = vadd.f32 %v1092_v32, %v1091_v39  ;;  %v811_v4 = vmul.f32 %v2788_v2, %v676_v35 }
 0x176   :  { %1267 = vmatpush1.msra.mxu0 %v1091_v39  ;;  %v812_v18 = vmul.f32 %v2789_v34, %v676_v35 }
 0x177   :  { %v1090_v42 = vmax.f32 %v1030_v28, 0.0  ;;  %v1089_v22 = vmax.f32 %v1029_v62, 0.0  ;;  %v2794_v28 = vld [vmem:[%s4801_s0] sm:$0xff] }
 0x178   :  { %v671_v21 = vpop.permute.xlu1 %670  ;;  %1539 = vadd.xlane.f32.xlu0 %v1538_v3  ;;  %v901_v13 = vpop.permute.xlu0 %900  ;;  %v803_v3 = vmul.f32 %v2794_v28, %v3578_v56 }
 0x179   :  { %v1027_v44 = vadd.f32 %v901_v13, %v817_v55  ;;  %v1028_v23 = vadd.f32 %v901_v13, %v818_v46  ;;  %1268 = vmatprep.subr.mxu0 %v1090_v42  ;;  %v1535_v50 = vadd.f32 %v1090_v42, %v1089_v22  ;;  %v809_v54 = vmul.f32 %v2790_v63, %v671_v21  ;;  %v2796_v46 = vld [vmem:[%s4801_s0 + $0x20] sm:$0xff] }
 0x17a   :  { %1269 = vmatpush1.msra.mxu0 %v1089_v22  ;;  %v810_v29 = vmul.f32 %v2792_v15, %v671_v21  ;;  %v804_v55 = vmul.f32 %v2795_v14, %v3578_v56  ;;  %v2797_v22 = vld [vmem:[%s4801_s0 + $0x28] sm:$0xff] }
 0x17b   :  { %v1088_v11 = vmax.f32 %v1028_v23, 0.0  ;;  %v1087_v1 = vmax.f32 %v1027_v44, 0.0  ;;  %1536 = vadd.xlane.f32.xlu1 %v1535_v50 }
 0x17c   :  { %v666_v59 = vpop.permute.xlu1 %665  ;;  %v896_v27 = vpop.permute.xlu0 %895 }
 0x17d   :  { %v1025_v47 = vadd.f32 %v896_v27, %v815_v53  ;;  %v1026_v36 = vadd.f32 %v896_v27, %v816_v52  ;;  %1270 = vmatprep.subr.mxu0 %v1088_v11  ;;  %v1532_v8 = vadd.f32 %v1088_v11, %v1087_v1  ;;  %v807_v42 = vmul.f32 %v2796_v46, %v666_v59 }
 0x17e   :  { %1271 = vmatpush1.msra.mxu0 %v1087_v1  ;;  %v808_v21 = vmul.f32 %v2797_v22, %v666_v59  ;;  %v2806_v22 = vld [vmem:[%s4801_s0 + $0x190] sm:$0xff] }
 0x17f   :  { %v1086_v24 = vmax.f32 %v1026_v36, 0.0  ;;  %v1085_v38 = vmax.f32 %v1025_v47, 0.0  ;;  %1533 = vadd.xlane.f32.xlu0 %v1532_v8 }
 0x180   :  { %v661_v31 = vpop.permute.xlu1 %660  ;;  %v891_v9 = vpop.permute.xlu0 %890 }
 0x181   :  { %v1023_v25 = vadd.f32 %v891_v9, %v813_v37  ;;  %v1024_v7 = vadd.f32 %v891_v9, %v814_v30  ;;  %1272 = vmatprep.subr.mxu0 %v1086_v24  ;;  %v1529_v40 = vadd.f32 %v1086_v24, %v1085_v38  ;;  %v805_v16 = vmul.f32 %v2791_v5, %v661_v31  ;;  %v2798_v37 = vld [vmem:[%s4801_s0 + $0x1d0] sm:$0xff]  ;;  %v2799_v30 = vld [vmem:[%s4801_s0 + $0x1d8] sm:$0xff] }
 0x182   :  { %1273 = vmatpush1.msra.mxu0 %v1085_v38  ;;  %v806_v58 = vmul.f32 %v2793_v41, %v661_v31  ;;  %v2802_v5 = vld [vmem:[%s4801_s0 + $0x1b0] sm:$0xff] }
 0x183   :  { %v1084_v43 = vmax.f32 %v1024_v7, 0.0  ;;  %v1083_v45 = vmax.f32 %v1023_v25, 0.0  ;;  %1530 = vadd.xlane.f32.xlu1 %v1529_v40 }
 0x184   :  { %v871_v48 = vpop.permute.xlu1 %870  ;;  %v886_v20 = vpop.permute.xlu0 %885 }
 0x185   :  { %v1021_v61 = vadd.f32 %v886_v20, %v811_v4  ;;  %v1022_v33 = vadd.f32 %v886_v20, %v812_v18  ;;  %1274 = vmatprep.subr.mxu0 %v1084_v43  ;;  %v1526_v17 = vadd.f32 %v1084_v43, %v1083_v45  ;;  %v1015_v49 = vadd.f32 %v871_v48, %v805_v16  ;;  %v2800_v4 = vld [vmem:[%s4801_s0 + $0x1c0] sm:$0xff]  ;;  %v2801_v18 = vld [vmem:[%s4801_s0 + $0x1c8] sm:$0xff] }
 0x186   :  { %1275 = vmatpush1.msra.mxu0 %v1083_v45  ;;  %v1016_v35 = vadd.f32 %v871_v48, %v806_v58 }
 0x187   :  { %v1082_v10 = vmax.f32 %v1022_v33, 0.0  ;;  %v1081_v51 = vmax.f32 %v1021_v61, 0.0  ;;  %1527 = vadd.xlane.f32.xlu0 %v1526_v17  ;;  %v1075_v23 = vmax.f32 %v1015_v49, 0.0  ;;  %v2803_v17 = vld [vmem:[%s4801_s0 + $0x1b8] sm:$0xff] }
 0x188   :  { %v866_v32 = vpop.permute.xlu1 %865  ;;  %v881_v39 = vpop.permute.xlu0 %880  ;;  %v1076_v26 = vmax.f32 %v1016_v35, 0.0 }
 0x189   :  { %v1019_v0 = vadd.f32 %v881_v39, %v809_v54  ;;  %v1020_v62 = vadd.f32 %v881_v39, %v810_v29  ;;  %1276 = vmatprep.subr.mxu0 %v1082_v10  ;;  %v1523_v19 = vadd.f32 %v1082_v10, %v1081_v51  ;;  %v1013_v50 = vadd.f32 %v866_v32, %v803_v3  ;;  %v2804_v39 = vld [vmem:[%s4801_s0 + $0x1a0] sm:$0xff] }
 0x18a   :  { %1277 = vmatpush1.msra.mxu0 %v1081_v51  ;;  %v1014_v60 = vadd.f32 %v866_v32, %v804_v55  ;;  %v1514_v38 = vadd.f32 %v1076_v26, %v1075_v23 }
 0x18b   :  { %v1080_v13 = vmax.f32 %v1020_v62, 0.0  ;;  %v1079_v44 = vmax.f32 %v1019_v0, 0.0  ;;  %1524 = vadd.xlane.f32.xlu1 %v1523_v19  ;;  %v1073_v12 = vmax.f32 %v1013_v50, 0.0  ;;  %v2805_v0 = vld [vmem:[%s4801_s0 + $0x1a8] sm:$0xff] }
 0x18c   :  { %v1011_v53 = vpop.permute.xlu1 %1010  ;;  %v876_v56 = vpop.permute.xlu0 %875  ;;  %v1074_v59 = vmax.f32 %v1014_v60, 0.0 }
 0x18d   :  { %v1017_v52 = vadd.f32 %v876_v56, %v807_v42  ;;  %v1018_v11 = vadd.f32 %v876_v56, %v808_v21  ;;  %1278 = vmatprep.subr.mxu0 %v1080_v13  ;;  %v1520_v1 = vadd.f32 %v1080_v13, %v1079_v44  ;;  %v2807_v13 = vld [vmem:[%s4801_s0 + $0x198] sm:$0xff] }
 0x18e   :  { %1279 = vmatpush1.msra.mxu0 %v1079_v44  ;;  %v1511_v2 = vadd.f32 %v1074_v59, %v1073_v12 }
 0x18f   :  { %1521 = vadd.xlane.f32.xlu0 %v1520_v1  ;;  %v1078_v27 = vmax.f32 %v1018_v11, 0.0  ;;  %v1077_v47 = vmax.f32 %v1017_v52, 0.0  ;;  %v2808_v11 = vld [vmem:[%s4801_s0 + $0x180] sm:$0xff] }
 0x190   :  { %v1006_v36 = vpop.permute.xlu1 %1005  ;;  %v801_v8 = vpop.permute.xlu0 %800 }
 0x191   :  { %v861_v57 = vmul.f32 %v2798_v37, %v801_v8  ;;  %v862_v24 = vmul.f32 %v2799_v30, %v801_v8  ;;  %1280 = vmatprep.subr.mxu0 %v1078_v27  ;;  %v1517_v31 = vadd.f32 %v1078_v27, %v1077_v47  ;;  %v2809_v27 = vld [vmem:[%s4801_s0 + $0x188] sm:$0xff] }
 0x192   :  { %1281 = vmatpush1.msra.mxu0 %v1077_v47 }
 0x193   :  { %1515 = vadd.xlane.f32.xlu0 %v1514_v38  ;;  %1518 = vadd.xlane.f32.xlu1 %v1517_v31  ;;  %v1072_v9 = vadd.f32 %v1011_v53, %v862_v24  ;;  %v1071_v25 = vadd.f32 %v1011_v53, %v861_v57  ;;  %v2810_v24 = vld [vmem:[%s4801_s0 + $0x170] sm:$0xff]  ;;  %v2811_v31 = vld [vmem:[%s4801_s0 + $0x178] sm:$0xff] }
 0x194   :  { %1282 = vmatprep.subr.mxu0 %v1076_v26  ;;  %v1001_v7 = vpop.permute.xlu1 %1000  ;;  %v796_v40 = vpop.permute.xlu0 %795 }
 0x195   :  { %1283 = vmatpush1.msra.mxu0 %v1075_v23  ;;  %v859_v34 = vmul.f32 %v2800_v4, %v796_v40  ;;  %v860_v43 = vmul.f32 %v2801_v18, %v796_v40  ;;  %v1132_v45 = vmax.f32 %v1072_v9, 0.0  ;;  %v1131_v48 = vmax.f32 %v1071_v25, 0.0 }
 0x196   :  { %1284 = vmatprep.subr.mxu0 %v1074_v59 }
 0x197   :  { %1285 = vmatpush1.msra.mxu0 %v1073_v12  ;;  %1512 = vadd.xlane.f32.xlu1 %v1511_v2  ;;  %v1598_v20 = vadd.f32 %v1132_v45, %v1131_v48  ;;  %v1070_v61 = vadd.f32 %v1006_v36, %v860_v43  ;;  %v1069_v33 = vadd.f32 %v1006_v36, %v859_v34  ;;  %v2812_v43 = vld [vmem:[%s4801_s0 + $0x160] sm:$0xff] }
 0x198   :  { %1290 = vmatprep.subr.mxu0 %v1132_v45  ;;  %v996_v63 = vpop.permute.xlu1 %995  ;;  %v791_v54 = vpop.permute.xlu0 %790 }
 0x199   :  { %1291 = vmatpush2.msra.mxu0 %v1131_v48  ;;  %v857_v16 = vmul.f32 %v2802_v5, %v791_v54  ;;  %v858_v15 = vmul.f32 %v2803_v17, %v791_v54  ;;  %1599 = vadd.xlane.f32.xlu0 %v1598_v20  ;;  %v1130_v29 = vmax.f32 %v1070_v61, 0.0  ;;  %v1129_v41 = vmax.f32 %v1069_v33, 0.0  ;;  %v2813_v48 = vld [vmem:[%s4801_s0 + $0x168] sm:$0xff] }
 0x19b   :  { %1292 = vmatprep.subr.mxu0 %v1130_v29  ;;  %v1595_v58 = vadd.f32 %v1130_v29, %v1129_v41  ;;  %v1068_v10 = vadd.f32 %v1001_v7, %v858_v15  ;;  %v1067_v51 = vadd.f32 %v1001_v7, %v857_v16  ;;  %v2814_v15 = vld [vmem:[%s4801_s0 + $0x150] sm:$0xff] }
 0x19c   :  { %v991_v49 = vpop.permute.xlu1 %990  ;;  %1293 = vmatpush2.msra.mxu0 %v1129_v41  ;;  %v786_v32 = vpop.permute.xlu0 %785  ;;  %v2815_v41 = vld [vmem:[%s4801_s0 + $0x158] sm:$0xff] }
 0x19d   :  { %v855_v35 = vmul.f32 %v2804_v39, %v786_v32  ;;  %v856_v62 = vmul.f32 %v2805_v0, %v786_v32  ;;  %1596 = vadd.xlane.f32.xlu1 %v1595_v58  ;;  %v1128_v28 = vmax.f32 %v1068_v10, 0.0  ;;  %v1127_v3 = vmax.f32 %v1067_v51, 0.0  ;;  %v2816_v0 = vld [vmem:[%s4801_s0 + $0x140] sm:$0xff] }
 0x19f   :  { %1294 = vmatprep.subr.mxu0 %v1128_v28  ;;  %v1592_v14 = vadd.f32 %v1128_v28, %v1127_v3  ;;  %v1066_v55 = vadd.f32 %v996_v63, %v856_v62  ;;  %v1065_v19 = vadd.f32 %v996_v63, %v855_v35  ;;  %v2817_v28 = vld [vmem:[%s4801_s0 + $0x148] sm:$0xff] }
 0x1a0   :  { %v986_v46 = vpop.permute.xlu1 %985  ;;  %1295 = vmatpush2.msra.mxu0 %v1127_v3  ;;  %v781_v42 = vpop.permute.xlu0 %780 }
 0x1a1   :  { %v853_v21 = vmul.f32 %v2806_v22, %v781_v42  ;;  %v854_v44 = vmul.f32 %v2807_v13, %v781_v42  ;;  %1593 = vadd.xlane.f32.xlu0 %v1592_v14  ;;  %v1126_v23 = vmax.f32 %v1066_v55, 0.0  ;;  %v1125_v50 = vmax.f32 %v1065_v19, 0.0  ;;  %v2818_v13 = vld [vmem:[%s4801_s0 + $0x130] sm:$0xff] }
 0x1a3   :  { %1296 = vmatprep.subr.mxu0 %v1126_v23  ;;  %v1589_v60 = vadd.f32 %v1126_v23, %v1125_v50  ;;  %v1064_v53 = vadd.f32 %v991_v49, %v854_v44  ;;  %v1063_v56 = vadd.f32 %v991_v49, %v853_v21  ;;  %v2819_v23 = vld [vmem:[%s4801_s0 + $0x138] sm:$0xff] }
 0x1a4   :  { %v981_v26 = vpop.permute.xlu1 %980  ;;  %1297 = vmatpush2.msra.mxu0 %v1125_v50  ;;  %v776_v52 = vpop.permute.xlu0 %775 }
 0x1a5   :  { %v851_v1 = vmul.f32 %v2808_v11, %v776_v52  ;;  %v852_v47 = vmul.f32 %v2809_v27, %v776_v52  ;;  %1590 = vadd.xlane.f32.xlu1 %v1589_v60  ;;  %v1124_v36 = vmax.f32 %v1064_v53, 0.0  ;;  %v1123_v8 = vmax.f32 %v1063_v56, 0.0  ;;  %v2820_v27 = vld [vmem:[%s4801_s0 + $0x120] sm:$0xff] }
 0x1a7   :  { %1298 = vmatprep.subr.mxu0 %v1124_v36  ;;  %v1586_v59 = vadd.f32 %v1124_v36, %v1123_v8  ;;  %v1062_v12 = vadd.f32 %v986_v46, %v852_v47  ;;  %v1061_v37 = vadd.f32 %v986_v46, %v851_v1  ;;  %v2821_v36 = vld [vmem:[%s4801_s0 + $0x128] sm:$0xff] }
 0x1a8   :  { %v976_v57 = vpop.permute.xlu1 %975  ;;  %1299 = vmatpush2.msra.mxu0 %v1123_v8  ;;  %v771_v30 = vpop.permute.xlu0 %770 }
 0x1a9   :  { %v849_v38 = vmul.f32 %v2810_v24, %v771_v30  ;;  %v850_v9 = vmul.f32 %v2811_v31, %v771_v30  ;;  %1587 = vadd.xlane.f32.xlu0 %v1586_v59  ;;  %v1122_v25 = vmax.f32 %v1062_v12, 0.0  ;;  %v1121_v7 = vmax.f32 %v1061_v37, 0.0 }
 0x1ab   :  { %1300 = vmatprep.subr.mxu0 %v1122_v25  ;;  %v1583_v40 = vadd.f32 %v1122_v25, %v1121_v7  ;;  %v1060_v2 = vadd.f32 %v981_v26, %v850_v9  ;;  %v1059_v4 = vadd.f32 %v981_v26, %v849_v38  ;;  %v2822_v38 = vld [vmem:[%s4801_s0 + $0x110] sm:$0xff]  ;;  %v2823_v9 = vld [vmem:[%s4801_s0 + $0x118] sm:$0xff] }
 0x1ac   :  { %v971_v34 = vpop.permute.xlu1 %970  ;;  %1301 = vmatpush2.msra.mxu0 %v1121_v7  ;;  %v766_v18 = vpop.permute.xlu0 %765 }
 0x1ad   :  { %v847_v45 = vmul.f32 %v2812_v43, %v766_v18  ;;  %v848_v20 = vmul.f32 %v2813_v48, %v766_v18  ;;  %1584 = vadd.xlane.f32.xlu1 %v1583_v40  ;;  %v1120_v61 = vmax.f32 %v1060_v2, 0.0  ;;  %v1119_v33 = vmax.f32 %v1059_v4, 0.0 }
 0x1af   :  { %1302 = vmatprep.subr.mxu0 %v1120_v61  ;;  %v1580_v63 = vadd.f32 %v1120_v61, %v1119_v33  ;;  %v1058_v54 = vadd.f32 %v976_v57, %v848_v20  ;;  %v1057_v5 = vadd.f32 %v976_v57, %v847_v45  ;;  %v2824_v20 = vld [vmem:[%s4801_s0 + $0x100] sm:$0xff] }
 0x1b0   :  { %v966_v16 = vpop.permute.xlu1 %965  ;;  %1303 = vmatpush2.msra.mxu0 %v1119_v33  ;;  %v761_v17 = vpop.permute.xlu0 %760  ;;  %v2825_v33 = vld [vmem:[%s4801_s0 + $0x108] sm:$0xff] }
 0x1b1   :  { %v845_v29 = vmul.f32 %v2814_v15, %v761_v17  ;;  %v846_v58 = vmul.f32 %v2815_v41, %v761_v17  ;;  %1581 = vadd.xlane.f32.xlu0 %v1580_v63  ;;  %v1118_v10 = vmax.f32 %v1058_v54, 0.0  ;;  %v1117_v51 = vmax.f32 %v1057_v5, 0.0  ;;  %v3752_v41 = vld [vmem:[%s4804_s3] sm:$0xff] }
 0x1b3   :  { %1304 = vmatprep.subr.mxu0 %v1118_v10  ;;  %v1577_v49 = vadd.f32 %v1118_v10, %v1117_v51  ;;  %v1056_v32 = vadd.f32 %v971_v34, %v846_v58  ;;  %v1055_v39 = vadd.f32 %v971_v34, %v845_v29  ;;  %v3757_v10 = vld [vmem:[%s4804_s3 + $0x18] sm:$0xff] }
 0x1b4   :  { %1305 = vmatpush2.msra.mxu0 %v1117_v51  ;;  %v756_v35 = vpop.permute.xlu0 %755  ;;  %v961_v19 = vpop.permute.xlu1 %960  ;;  %v3765_v51 = vld [vmem:[%s4804_s3 + $0x10] sm:$0xff] }
 0x1b5   :  { %v843_v62 = vmul.f32 %v2816_v0, %v756_v35  ;;  %v844_v3 = vmul.f32 %v2817_v28, %v756_v35  ;;  %1578 = vadd.xlane.f32.xlu1 %v1577_v49  ;;  %v1116_v14 = vmax.f32 %v1056_v32, 0.0  ;;  %v1115_v55 = vmax.f32 %v1055_v39, 0.0  ;;  %v3770_v49 = vld [vmem:[%s4804_s3 + $0x28] sm:$0xff]  ;;  %v3778_v32 = vld [vmem:[%s4804_s3 + $0x20] sm:$0xff]  ;;  %v3783_v39 = vld [vmem:[%s4804_s3 + $0x38] sm:$0xff] }
 0x1b6   :  { %v3791_v35 = vld [vmem:[%s4804_s3 + $0x30] sm:$0xff]  ;;  %v3796_v0 = vld [vmem:[%s4804_s3 + $0x48] sm:$0xff]  ;;  %v3809_v28 = vld [vmem:[%s4804_s3 + $0x58] sm:$0xff] }
 0x1b7   :  { %1306 = vmatprep.subr.mxu0 %v1116_v14  ;;  %v1574_v46 = vadd.f32 %v1116_v14, %v1115_v55  ;;  %v1054_v42 = vadd.f32 %v966_v16, %v844_v3  ;;  %v1053_v22 = vadd.f32 %v966_v16, %v843_v62  ;;  %v3804_v62 = vld [vmem:[%s4804_s3 + $0x40] sm:$0xff]  ;;  %v3817_v3 = vld [vmem:[%s4804_s3 + $0x50] sm:$0xff]  ;;  %v3822_v14 = vld [vmem:[%s4804_s3 + $0x68] sm:$0xff] }
 0x1b8   :  { %1307 = vmatpush2.msra.mxu0 %v1115_v55  ;;  %v751_v21 = vpop.permute.xlu0 %750  ;;  %v956_v11 = vpop.permute.xlu1 %955  ;;  %v3830_v55 = vld [vmem:[%s4804_s3 + $0x60] sm:$0xff] }
 0x1b9   :  { %v841_v44 = vmul.f32 %v2818_v13, %v751_v21  ;;  %v842_v50 = vmul.f32 %v2819_v23, %v751_v21  ;;  %1575 = vadd.xlane.f32.xlu0 %v1574_v46  ;;  %v1114_v60 = vmax.f32 %v1054_v42, 0.0  ;;  %v1113_v53 = vmax.f32 %v1053_v22, 0.0  ;;  %v3843_v46 = vld [vmem:[%s4804_s3 + $0x70] sm:$0xff]  ;;  %v3848_v42 = vld [vmem:[%s4804_s3 + $0x88] sm:$0xff]  ;;  %v3856_v22 = vld [vmem:[%s4804_s3 + $0x80] sm:$0xff] }
 0x1ba   :  { %v3861_v21 = vld [vmem:[%s4804_s3 + $0x98] sm:$0xff]  ;;  %v3875_v23 = vld [vmem:[%s4804_s3 + $0xa8] sm:$0xff] }
 0x1bb   :  { %1308 = vmatprep.subr.mxu0 %v1114_v60  ;;  %v1571_v56 = vadd.f32 %v1114_v60, %v1113_v53  ;;  %v1052_v26 = vadd.f32 %v961_v19, %v842_v50  ;;  %v1051_v52 = vadd.f32 %v961_v19, %v841_v44  ;;  %v3835_v19 = vld [vmem:[%s4804_s3 + $0x78] sm:$0xff]  ;;  %v3869_v44 = vld [vmem:[%s4804_s3 + $0x90] sm:$0xff]  ;;  %v3883_v50 = vld [vmem:[%s4804_s3 + $0xa0] sm:$0xff] }
 0x1bc   :  { %1309 = vmatpush2.msra.mxu0 %v1113_v53  ;;  %v746_v1 = vpop.permute.xlu0 %745  ;;  %v951_v2 = vpop.permute.xlu1 %950  ;;  %v3888_v53 = vld [vmem:[%s4804_s3 + $0xb8] sm:$0xff] }
 0x1bd   :  { %v839_v47 = vmul.f32 %v2820_v27, %v746_v1  ;;  %v840_v8 = vmul.f32 %v2821_v36, %v746_v1  ;;  %1572 = vadd.xlane.f32.xlu1 %v1571_v56  ;;  %v1112_v59 = vmax.f32 %v1052_v26, 0.0  ;;  %v1111_v12 = vmax.f32 %v1051_v52, 0.0  ;;  %v3897_v56 = vld [vmem:[%s4804_s3 + $0xb0] sm:$0xff]  ;;  %v3902_v52 = vld [vmem:[%s4804_s3 + $0xc8] sm:$0xff]  ;;  %v3911_v1 = vld [vmem:[%s4804_s3 + $0xc0] sm:$0xff] }
 0x1bf   :  { %1310 = vmatprep.subr.mxu0 %v1112_v59  ;;  %v1568_v37 = vadd.f32 %v1112_v59, %v1111_v12  ;;  %v1050_v57 = vadd.f32 %v956_v11, %v840_v8  ;;  %v1049_v30 = vadd.f32 %v956_v11, %v839_v47  ;;  %v3917_v47 = vld [vmem:[%s4804_s3 + $0xd8] sm:$0xff]  ;;  %v3926_v8 = vld [vmem:[%s4804_s3 + $0xd0] sm:$0xff] }
 0x1c0   :  { %1311 = vmatpush2.msra.mxu0 %v1111_v12  ;;  %v741_v24 = vpop.permute.xlu0 %740  ;;  %v3932_v12 = vld [vmem:[%s4804_s3 + $0xe8] sm:$0xff] }
 0x1c1   :  { %v837_v31 = vmul.f32 %v2822_v38, %v741_v24  ;;  %v838_v25 = vmul.f32 %v2823_v9, %v741_v24  ;;  %1569 = vadd.xlane.f32.xlu0 %v1568_v37  ;;  %v1110_v7 = vmax.f32 %v1050_v57, 0.0  ;;  %v1109_v40 = vmax.f32 %v1049_v30, 0.0  ;;  %v3941_v37 = vld [vmem:[%s4804_s3 + $0xe0] sm:$0xff]  ;;  %v3946_v30 = vld [vmem:[%s4804_s3 + $0xf8] sm:$0xff]  ;;  %v3955_v24 = vld [vmem:[%s4804_s3 + $0xf0] sm:$0xff] }
 0x1c2   :  { %v3969_v9 = vld [vmem:[%s4804_s3 + $0x100] sm:$0xff] }
 0x1c3   :  { %1312 = vmatprep.subr.mxu0 %v1110_v7  ;;  %v1565_v4 = vadd.f32 %v1110_v7, %v1109_v40  ;;  %v1048_v34 = vadd.f32 %v951_v2, %v838_v25  ;;  %v1047_v18 = vadd.f32 %v951_v2, %v837_v31  ;;  %v3960_v31 = vld [vmem:[%s4804_s3 + $0x108] sm:$0xff]  ;;  %v3974_v7 = vld [vmem:[%s4804_s3 + $0x118] sm:$0xff] }
 0x1c4   :  { %1313 = vmatpush2.msra.mxu0 %v1109_v40  ;;  %v736_v43 = vpop.permute.xlu0 %735  ;;  %v3983_v40 = vld [vmem:[%s4804_s3 + $0x110] sm:$0xff] }
 0x1c5   :  { %1566 = vadd.xlane.f32.xlu1 %v1565_v4  ;;  %v1108_v45 = vmax.f32 %v1048_v34, 0.0  ;;  %v1107_v48 = vmax.f32 %v1047_v18, 0.0  ;;  %v835_v61 = vmul.f32 %v2824_v20, %v736_v43  ;;  %v836_v63 = vmul.f32 %v2825_v33, %v736_v43  ;;  %v3988_v4 = vld [vmem:[%s4804_s3 + $0x128] sm:$0xff]  ;;  %v3997_v34 = vld [vmem:[%s4804_s3 + $0x120] sm:$0xff]  ;;  %v4002_v43 = vld [vmem:[%s4804_s3 + $0x138] sm:$0xff] }
 0x1c6   :  { %v4016_v20 = vld [vmem:[%s4804_s3 + $0x148] sm:$0xff]  ;;  %v4025_v33 = vld [vmem:[%s4804_s3 + $0x140] sm:$0xff] }
 0x1c7   :  { %1314 = vmatprep.subr.mxu0 %v1108_v45  ;;  %v1562_v54 = vadd.f32 %v1108_v45, %v1107_v48 }
 0x1c8   :  { %1315 = vmatpush2.msra.mxu0 %v1107_v48  ;;  %v946_v5 = vpop.permute.xlu0 %945  ;;  %v4011_v48 = vld [vmem:[%s4804_s3 + $0x130] sm:$0xff] }
 0x1c9   :  { %v1045_v16 = vadd.f32 %v946_v5, %v835_v61  ;;  %v1046_v17 = vadd.f32 %v946_v5, %v836_v63  ;;  %1563 = vadd.xlane.f32.xlu0 %v1562_v54  ;;  %v4030_v63 = vld [vmem:[%s4804_s3 + $0x158] sm:$0xff] }
 0x1cb   :  { %v1106_v15 = vmax.f32 %v1046_v17, 0.0  ;;  %v1105_v29 = vmax.f32 %v1045_v16, 0.0  ;;  %v4040_v16 = vld [vmem:[%s4804_s3 + $0x150] sm:$0xff]  ;;  %v4045_v17 = vld [vmem:[%s4804_s3 + $0x168] sm:$0xff] }
 0x1cd   :  { %1316 = vmatprep.subr.mxu0 %v1106_v15  ;;  %v1559_v58 = vadd.f32 %v1106_v15, %v1105_v29 }
 0x1ce   :  { %1317 = vmatpush2.msra.mxu0 %v1105_v29  ;;  %v4055_v29 = vld [vmem:[%s4804_s3 + $0x160] sm:$0xff] }
 0x1cf   :  { %1560 = vadd.xlane.f32.xlu1 %v1559_v58  ;;  %1319 = vmatmul.mubr.f32.vlgmr.msra.gmra.mxu0 %v3752_v41  ;;  %v4060_v58 = vld [vmem:[%s4804_s3 + $0x178] sm:$0xff] }
 0x1d0   :  { %2607 = vmatprep.mubr.msk.f32.mxu0 %vm1181_vm0, %v3757_v10 }
 0x1d3   :  { %1325 = vmatmul.mubr.f32.gmra.mxu0 %v3765_v51 }
 0x1d4   :  { %2608 = vmatprep.mubr.msk.f32.mxu0 %vm1181_vm0, %v3770_v49 }
 0x1d7   :  { %1331 = vmatmul.mubr.f32.gmra.mxu0 %v3778_v32 }
 0x1d8   :  { %2609 = vmatprep.mubr.msk.f32.mxu0 %vm1181_vm0, %v3783_v39 }
 0x1db   :  { %1337 = vmatmul.mubr.f32.gmra.mxu0 %v3791_v35 }
 0x1dc   :  { %2610 = vmatprep.mubr.msk.f32.mxu0 %vm1181_vm0, %v3796_v0 }
 0x1df   :  { %1343 = vmatmul.mubr.f32.gmra.mxu0 %v3804_v62 }
 0x1e0   :  { %2611 = vmatprep.mubr.msk.f32.mxu0 %vm1181_vm0, %v3809_v28 }
 0x1e3   :  { %1349 = vmatmul.mubr.f32.gmra.mxu0 %v3817_v3 }
 0x1e4   :  { %2612 = vmatprep.mubr.msk.f32.mxu0 %vm1181_vm0, %v3822_v14 }
 0x1e7   :  { %1355 = vmatmul.mubr.f32.gmra.mxu0 %v3830_v55 }
 0x1e8   :  { %2613 = vmatprep.mubr.msk.f32.mxu0 %vm1181_vm0, %v3835_v19 }
 0x1eb   :  { %1361 = vmatmul.mubr.f32.gmra.mxu0 %v3843_v46 }
 0x1ec   :  { %2614 = vmatprep.mubr.msk.f32.mxu0 %vm1181_vm0, %v3848_v42 }
 0x1ee   :  { %v1558_v13 = vpop.xlane.xlu1 %1557 }
 0x1ef   :  { %1367 = vmatmul.mubr.f32.gmra.mxu0 %v3856_v22  ;;  %1602 = vmatpush1.msra.mxu1 %v1558_v13 }
 0x1f0   :  { %2615 = vmatprep.mubr.msk.f32.mxu0 %vm1181_vm0, %v3861_v21  ;;  %1603 = vmatprep.subr.mxu1 %v2827_v6 }
 0x1f3   :  { %1373 = vmatmul.mubr.f32.gmra.mxu0 %v3869_v44 }
 0x1f4   :  { %2616 = vmatprep.mubr.msk.f32.mxu0 %vm1181_vm0, %v3875_v23  ;;  %v1549_v11 = vpop.xlane.xlu1 %1548 }
 0x1f5   :  { %v1555_v60 = vpop.xlane.xlu0 %1554 }
 0x1f6   :  { %1604 = vmatpush1.msra.mxu1 %v1555_v60  ;;  %v4069_v60 = vld [vmem:[%s4804_s3 + $0x170] sm:$0xff] }
 0x1f7   :  { %1379 = vmatmul.mubr.f32.gmra.mxu0 %v3883_v50  ;;  %1605 = vmatprep.subr.mxu1 %v2827_v6 }
 0x1f8   :  { %2617 = vmatprep.mubr.msk.f32.mxu0 %vm1181_vm0, %v3888_v53 }
 0x1f9   :  { %v1552_v26 = vpop.xlane.xlu0 %1551 }
 0x1fa   :  { %1606 = vmatpush1.msra.mxu1 %v1552_v26 }
 0x1fb   :  { %1385 = vmatmul.mubr.f32.gmra.mxu0 %v3897_v56  ;;  %1607 = vmatprep.subr.mxu1 %v2827_v6 }
 0x1fc   :  { %1608 = vmatpush1.msra.mxu1 %v1549_v11  ;;  %2618 = vmatprep.mubr.msk.f32.mxu0 %vm1181_vm0, %v3902_v52  ;;  %v1543_v36 = vpop.xlane.xlu1 %1542 }
 0x1fd   :  { %1609 = vmatprep.subr.mxu1 %v2827_v6  ;;  %v1546_v27 = vpop.xlane.xlu0 %1545 }
 0x1fe   :  { %1610 = vmatpush1.msra.mxu1 %v1546_v27 }
 0x1ff   :  { %1391 = vmatmul.mubr.f32.gmra.mxu0 %v3911_v1  ;;  %1611 = vmatprep.subr.mxu1 %v2827_v6 }
 0x200   :  { %1612 = vmatpush1.msra.mxu1 %v1543_v36  ;;  %2619 = vmatprep.mubr.msk.f32.mxu0 %vm1181_vm0, %v3917_v47 }
 0x201   :  { %1613 = vmatprep.subr.mxu1 %v2827_v6  ;;  %v1540_v59 = vpop.xlane.xlu0 %1539 }
 0x202   :  { %1614 = vmatpush1.msra.mxu1 %v1540_v59 }
 0x203   :  { %1397 = vmatmul.mubr.f32.gmra.mxu0 %v3926_v8  ;;  %1615 = vmatprep.subr.mxu1 %v2827_v6 }
 0x204   :  { %2620 = vmatprep.mubr.msk.f32.mxu0 %vm1181_vm0, %v3932_v12  ;;  %v1537_v57 = vpop.xlane.xlu1 %1536 }
 0x205   :  { %1616 = vmatpush1.msra.mxu1 %v1537_v57 }
 0x206   :  { %1617 = vmatprep.subr.mxu1 %v2827_v6 }
 0x207   :  { %1403 = vmatmul.mubr.f32.gmra.mxu0 %v3941_v37 }
 0x208   :  { %2621 = vmatprep.mubr.msk.f32.mxu0 %vm1181_vm0, %v3946_v30  ;;  %v1534_v38 = vpop.xlane.xlu0 %1533 }
 0x209   :  { %1618 = vmatpush1.msra.mxu1 %v1534_v38 }
 0x20a   :  { %1619 = vmatprep.subr.mxu1 %v2827_v6 }
 0x20b   :  { %1409 = vmatmul.mubr.f32.gmra.mxu0 %v3955_v24 }
 0x20c   :  { %2622 = vmatprep.mubr.msk.f32.mxu0 %vm1181_vm0, %v3960_v31  ;;  %v1531_v25 = vpop.xlane.xlu1 %1530 }
 0x20d   :  { %1620 = vmatpush1.msra.mxu1 %v1531_v25 }
 0x20e   :  { %1621 = vmatprep.subr.mxu1 %v2827_v6 }
 0x20f   :  { %1415 = vmatmul.mubr.f32.gmra.mxu0 %v3969_v9 }
 0x210   :  { %2623 = vmatprep.mubr.msk.f32.mxu0 %vm1181_vm0, %v3974_v7  ;;  %v1528_v2 = vpop.xlane.xlu0 %1527 }
 0x211   :  { %1622 = vmatpush1.msra.mxu1 %v1528_v2 }
 0x212   :  { %1623 = vmatprep.subr.mxu1 %v2827_v6 }
 0x213   :  { %1421 = vmatmul.mubr.f32.gmra.mxu0 %v3983_v40 }
 0x214   :  { %2624 = vmatprep.mubr.msk.f32.mxu0 %vm1181_vm0, %v3988_v4  ;;  %v1525_v18 = vpop.xlane.xlu1 %1524 }
 0x215   :  { %1624 = vmatpush1.msra.mxu1 %v1525_v18 }
 0x216   :  { %1625 = vmatprep.subr.mxu1 %v2827_v6 }
 0x217   :  { %1427 = vmatmul.mubr.f32.gmra.mxu0 %v3997_v34 }
 0x218   :  { %v1522_v45 = vpop.xlane.xlu0 %1521  ;;  %2625 = vmatprep.mubr.msk.f32.mxu0 %vm1181_vm0, %v4002_v43 }
 0x219   :  { %1626 = vmatpush1.msra.mxu1 %v1522_v45 }
 0x21a   :  { %1627 = vmatprep.subr.mxu1 %v2827_v6 }
 0x21b   :  { %1433 = vmatmul.mubr.f32.gmra.mxu0 %v4011_v48 }
 0x21c   :  { %v1519_v61 = vpop.xlane.xlu1 %1518  ;;  %2626 = vmatprep.mubr.msk.f32.mxu0 %vm1181_vm0, %v4016_v20  ;;  %v1516_v54 = vpop.xlane.xlu0 %1515 }
 0x21d   :  { %1628 = vmatpush1.msra.mxu1 %v1519_v61 }
 0x21e   :  { %1629 = vmatprep.subr.mxu1 %v2827_v6 }
 0x21f   :  { %1439 = vmatmul.mubr.f32.gmra.mxu0 %v4025_v33  ;;  %1630 = vmatpush1.msra.mxu1 %v1516_v54 }
 0x220   :  { %v1513_v5 = vpop.xlane.xlu1 %1512  ;;  %1631 = vmatprep.subr.mxu1 %v2827_v6  ;;  %2627 = vmatprep.mubr.msk.f32.mxu0 %vm1181_vm0, %v4030_v63 }
 0x221   :  { %1632 = vmatpush1.msra.mxu1 %v1513_v5 }
 0x222   :  { %1637 = vmatprep.subr.mxu1 %v2827_v6  ;;  %v1600_v15 = vpop.xlane.xlu0 %1599 }
 0x223   :  { %1445 = vmatmul.mubr.f32.gmra.mxu0 %v4040_v16  ;;  %1638 = vmatpush2.msra.mxu1 %v1600_v15 }
 0x224   :  { %2628 = vmatprep.mubr.msk.f32.mxu0 %vm1181_vm0, %v4045_v17  ;;  %1639 = vmatprep.subr.mxu1 %v2827_v6 }
 0x226   :  { %v1597_v13 = vpop.xlane.xlu1 %1596 }
 0x227   :  { %1451 = vmatmul.mubr.f32.gmra.mxu0 %v4055_v29  ;;  %1640 = vmatpush2.msra.mxu1 %v1597_v13 }
 0x228   :  { %2629 = vmatprep.mubr.msk.f32.mxu0 %vm1181_vm0, %v4060_v58  ;;  %1641 = vmatprep.subr.mxu1 %v2827_v6 }
 0x22a   :  { %v1594_v26 = vpop.xlane.xlu0 %1593 }
 0x22b   :  { %1457 = vmatmul.mubr.f32.gmra.mxu0 %v4069_v60  ;;  %1642 = vmatpush2.msra.mxu1 %v1594_v26 }
 0x22c   :  { %1643 = vmatprep.subr.mxu1 %v2827_v6 }
 0x22e   :  { %v1591_v11 = vpop.xlane.xlu1 %1590 }
 0x22f   :  { %1644 = vmatpush2.msra.mxu1 %v1591_v11 }
 0x230   :  { %1645 = vmatprep.subr.mxu1 %v2827_v6 }
 0x232   :  { %v1588_v27 = vpop.xlane.xlu0 %1587 }
 0x233   :  { %1646 = vmatpush2.msra.mxu1 %v1588_v27 }
 0x234   :  { %1647 = vmatprep.subr.mxu1 %v2827_v6 }
 0x236   :  { %v1585_v36 = vpop.xlane.xlu1 %1584 }
 0x237   :  { %1648 = vmatpush2.msra.mxu1 %v1585_v36 }
 0x238   :  { %1649 = vmatprep.subr.mxu1 %v2827_v6 }
 0x23a   :  { %v1582_v59 = vpop.xlane.xlu0 %1581 }
 0x23b   :  { %1650 = vmatpush2.msra.mxu1 %v1582_v59 }
 0x23c   :  { %1651 = vmatprep.subr.mxu1 %v2827_v6 }
 0x23e   :  { %v1579_v57 = vpop.xlane.xlu1 %1578 }
 0x23f   :  { %1652 = vmatpush2.msra.mxu1 %v1579_v57 }
 0x240   :  { %1653 = vmatprep.subr.mxu1 %v2827_v6 }
 0x242   :  { %v1576_v38 = vpop.xlane.xlu0 %1575 }
 0x243   :  { %1654 = vmatpush2.msra.mxu1 %v1576_v38 }
 0x244   :  { %1655 = vmatprep.subr.mxu1 %v2827_v6 }
 0x246   :  { %v1573_v25 = vpop.xlane.xlu1 %1572 }
 0x247   :  { %1656 = vmatpush2.msra.mxu1 %v1573_v25 }
 0x248   :  { %1657 = vmatprep.subr.mxu1 %v2827_v6 }
 0x24a   :  { %v1570_v2 = vpop.xlane.xlu0 %1569 }
 0x24b   :  { %1658 = vmatpush2.msra.mxu1 %v1570_v2 }
 0x24c   :  { %1659 = vmatprep.subr.mxu1 %v2827_v6 }
 0x24e   :  { %v1567_v18 = vpop.xlane.xlu1 %1566 }
 0x24f   :  { %1660 = vmatpush2.msra.mxu1 %v1567_v18 }
 0x250   :  { %1661 = vmatprep.subr.mxu1 %v2827_v6 }
 0x252   :  { %v1564_v45 = vpop.xlane.xlu0 %1563 }
 0x253   :  { %1662 = vmatpush2.msra.mxu1 %v1564_v45 }
 0x254   :  { %1663 = vmatprep.subr.mxu1 %v2827_v6 }
 0x258   :  { %v1561_v61 = vpop.xlane.xlu1 %1560 }
 0x259   :  { %1664 = vmatpush2.msra.mxu1 %v1561_v61 }
 0x25a   :  { %1666 = vmatmul.mubr.f32.vlgmr.msra.gmra.mxu1 %v3752_v41 }
 0x25b   :  { %2631 = vmatprep.mubr.msk.f32.mxu1 %vm1181_vm0, %v3757_v10 }
 0x25e   :  { %1671 = vmatmul.mubr.f32.gmra.mxu1 %v3765_v51 }
 0x25f   :  { %2632 = vmatprep.mubr.msk.f32.mxu1 %vm1181_vm0, %v3770_v49 }
 0x262   :  { %1676 = vmatmul.mubr.f32.gmra.mxu1 %v3778_v32 }
 0x263   :  { %2633 = vmatprep.mubr.msk.f32.mxu1 %vm1181_vm0, %v3783_v39 }
 0x266   :  { %1681 = vmatmul.mubr.f32.gmra.mxu1 %v3791_v35 }
 0x267   :  { %2634 = vmatprep.mubr.msk.f32.mxu1 %vm1181_vm0, %v3796_v0 }
 0x26a   :  { %1686 = vmatmul.mubr.f32.gmra.mxu1 %v3804_v62 }
 0x26b   :  { %2635 = vmatprep.mubr.msk.f32.mxu1 %vm1181_vm0, %v3809_v28 }
 0x26e   :  { %1691 = vmatmul.mubr.f32.gmra.mxu1 %v3817_v3 }
 0x26f   :  { %2636 = vmatprep.mubr.msk.f32.mxu1 %vm1181_vm0, %v3822_v14 }
 0x272   :  { %1696 = vmatmul.mubr.f32.gmra.mxu1 %v3830_v55 }
 0x273   :  { %2637 = vmatprep.mubr.msk.f32.mxu1 %vm1181_vm0, %v3835_v19 }
 0x276   :  { %1701 = vmatmul.mubr.f32.gmra.mxu1 %v3843_v46 }
 0x277   :  { %2638 = vmatprep.mubr.msk.f32.mxu1 %vm1181_vm0, %v3848_v42 }
 0x27a   :  { %1706 = vmatmul.mubr.f32.gmra.mxu1 %v3856_v22 }
 0x27b   :  { %2639 = vmatprep.mubr.msk.f32.mxu1 %vm1181_vm0, %v3861_v21 }
 0x27e   :  { %1711 = vmatmul.mubr.f32.gmra.mxu1 %v3869_v44 }
 0x27f   :  { %2640 = vmatprep.mubr.msk.f32.mxu1 %vm1181_vm0, %v3875_v23 }
 0x282   :  { %1716 = vmatmul.mubr.f32.gmra.mxu1 %v3883_v50 }
 0x283   :  { %2641 = vmatprep.mubr.msk.f32.mxu1 %vm1181_vm0, %v3888_v53 }
 0x286   :  { %1721 = vmatmul.mubr.f32.gmra.mxu1 %v3897_v56 }
 0x287   :  { %2642 = vmatprep.mubr.msk.f32.mxu1 %vm1181_vm0, %v3902_v52 }
 0x28a   :  { %1726 = vmatmul.mubr.f32.gmra.mxu1 %v3911_v1 }
 0x28b   :  { %2643 = vmatprep.mubr.msk.f32.mxu1 %vm1181_vm0, %v3917_v47 }
 0x28e   :  { %1731 = vmatmul.mubr.f32.gmra.mxu1 %v3926_v8 }
 0x28f   :  { %v4123_v6 = vpop.f32.mrf.mxu0  ;;  %2644 = vmatprep.mubr.msk.f32.mxu1 %vm1181_vm0, %v3932_v12 }
 0x290   :  { %v1858_v10 = vmul.f32 %v4123_v6, %v4123_v6 }
 0x291   :  { %v4127_v41 = vpop.f32.mrf.mxu0 }
 0x292   :  { %1736 = vmatmul.mubr.f32.gmra.mxu1 %v3941_v37  ;;  %v1859_v51 = vmul.f32 %v4127_v41, %v4127_v41 }
 0x293   :  { %v4134_v49 = vpop.f32.mrf.mxu0  ;;  %2645 = vmatprep.mubr.msk.f32.mxu1 %vm1181_vm0, %v3946_v30 }
 0x294   :  { %v1906_v32 = vadd.f32 %v1859_v51, %v1858_v10  ;;  %v1860_v35 = vmul.f32 %v4134_v49, %v4134_v49 }
 0x295   :  { %v4138_v39 = vpop.f32.mrf.mxu0 }
 0x296   :  { %1907 = vadd.xlane.f32.xlu0 %v1906_v32  ;;  %1741 = vmatmul.mubr.f32.gmra.mxu1 %v3955_v24  ;;  %v1861_v0 = vmul.f32 %v4138_v39, %v4138_v39 }
 0x297   :  { %v4145_v62 = vpop.f32.mrf.mxu0  ;;  %2646 = vmatprep.mubr.msk.f32.mxu1 %vm1181_vm0, %v3960_v31 }
 0x298   :  { %v1909_v28 = vadd.f32 %v1861_v0, %v1860_v35  ;;  %v1862_v14 = vmul.f32 %v4145_v62, %v4145_v62 }
 0x299   :  { %v4149_v3 = vpop.f32.mrf.mxu0 }
 0x29a   :  { %1910 = vadd.xlane.f32.xlu1 %v1909_v28  ;;  %1746 = vmatmul.mubr.f32.gmra.mxu1 %v3969_v9  ;;  %v1863_v55 = vmul.f32 %v4149_v3, %v4149_v3 }
 0x29b   :  { %v4156_v19 = vpop.f32.mrf.mxu0  ;;  %2647 = vmatprep.mubr.msk.f32.mxu1 %vm1181_vm0, %v3974_v7 }
 0x29c   :  { %v1912_v46 = vadd.f32 %v1863_v55, %v1862_v14  ;;  %v1864_v22 = vmul.f32 %v4156_v19, %v4156_v19 }
 0x29d   :  { %v4160_v42 = vpop.f32.mrf.mxu0 }
 0x29e   :  { %1913 = vadd.xlane.f32.xlu0 %v1912_v46  ;;  %1751 = vmatmul.mubr.f32.gmra.mxu1 %v3983_v40  ;;  %v1865_v21 = vmul.f32 %v4160_v42, %v4160_v42 }
 0x29f   :  { %v4167_v44 = vpop.f32.mrf.mxu0  ;;  %2648 = vmatprep.mubr.msk.f32.mxu1 %vm1181_vm0, %v3988_v4 }
 0x2a0   :  { %v1915_v23 = vadd.f32 %v1865_v21, %v1864_v22  ;;  %v1866_v53 = vmul.f32 %v4167_v44, %v4167_v44 }
 0x2a1   :  { %v4171_v50 = vpop.f32.mrf.mxu0 }
 0x2a2   :  { %1916 = vadd.xlane.f32.xlu1 %v1915_v23  ;;  %1756 = vmatmul.mubr.f32.gmra.mxu1 %v3997_v34  ;;  %v1867_v56 = vmul.f32 %v4171_v50, %v4171_v50 }
 0x2a3   :  { %v4178_v52 = vpop.f32.mrf.mxu0  ;;  %2649 = vmatprep.mubr.msk.f32.mxu1 %vm1181_vm0, %v4002_v43 }
 0x2a4   :  { %v1918_v1 = vadd.f32 %v1867_v56, %v1866_v53  ;;  %v1868_v8 = vmul.f32 %v4178_v52, %v4178_v52 }
 0x2a5   :  { %v4182_v47 = vpop.f32.mrf.mxu0 }
 0x2a6   :  { %1919 = vadd.xlane.f32.xlu0 %v1918_v1  ;;  %1761 = vmatmul.mubr.f32.gmra.mxu1 %v4011_v48  ;;  %v1869_v12 = vmul.f32 %v4182_v47, %v4182_v47 }
 0x2a7   :  { %v4189_v37 = vpop.f32.mrf.mxu0  ;;  %2650 = vmatprep.mubr.msk.f32.mxu1 %vm1181_vm0, %v4016_v20 }
 0x2a8   :  { %v1921_v30 = vadd.f32 %v1869_v12, %v1868_v8  ;;  %v1870_v31 = vmul.f32 %v4189_v37, %v4189_v37 }
 0x2a9   :  { %v4193_v24 = vpop.f32.mrf.mxu0 }
 0x2aa   :  { %1922 = vadd.xlane.f32.xlu1 %v1921_v30  ;;  %1766 = vmatmul.mubr.f32.gmra.mxu1 %v4025_v33  ;;  %v1871_v9 = vmul.f32 %v4193_v24, %v4193_v24 }
 0x2ab   :  { %v4200_v7 = vpop.f32.mrf.mxu0  ;;  %2651 = vmatprep.mubr.msk.f32.mxu1 %vm1181_vm0, %v4030_v63 }
 0x2ac   :  { %v1924_v40 = vadd.f32 %v1871_v9, %v1870_v31  ;;  %v1872_v34 = vmul.f32 %v4200_v7, %v4200_v7 }
 0x2ad   :  { %v4204_v4 = vpop.f32.mrf.mxu0 }
 0x2ae   :  { %1925 = vadd.xlane.f32.xlu0 %v1924_v40  ;;  %1771 = vmatmul.mubr.f32.gmra.mxu1 %v4040_v16  ;;  %v1873_v43 = vmul.f32 %v4204_v4, %v4204_v4 }
 0x2af   :  { %v4211_v48 = vpop.f32.mrf.mxu0  ;;  %2652 = vmatprep.mubr.msk.f32.mxu1 %vm1181_vm0, %v4045_v17 }
 0x2b0   :  { %v1927_v20 = vadd.f32 %v1873_v43, %v1872_v34  ;;  %v1874_v63 = vmul.f32 %v4211_v48, %v4211_v48 }
 0x2b1   :  { %v4215_v33 = vpop.f32.mrf.mxu0 }
 0x2b2   :  { %1928 = vadd.xlane.f32.xlu1 %v1927_v20  ;;  %1776 = vmatmul.mubr.f32.gmra.mxu1 %v4055_v29  ;;  %v1875_v54 = vmul.f32 %v4215_v33, %v4215_v33 }
 0x2b3   :  { %v4222_v5 = vpop.f32.mrf.mxu0  ;;  %2653 = vmatprep.mubr.msk.f32.mxu1 %vm1181_vm0, %v4060_v58 }
 0x2b4   :  { %v1930_v16 = vadd.f32 %v1875_v54, %v1874_v63  ;;  %v1876_v17 = vmul.f32 %v4222_v5, %v4222_v5 }
 0x2b5   :  { %v4226_v15 = vpop.f32.mrf.mxu0 }
 0x2b6   :  { %1931 = vadd.xlane.f32.xlu0 %v1930_v16  ;;  %1781 = vmatmul.mubr.f32.gmra.mxu1 %v4069_v60  ;;  %v1877_v29 = vmul.f32 %v4226_v15, %v4226_v15 }
 0x2b7   :  { %v4233_v13 = vpop.f32.mrf.mxu0 }
 0x2b8   :  { %v1933_v26 = vadd.f32 %v1877_v29, %v1876_v17  ;;  %v1878_v58 = vmul.f32 %v4233_v13, %v4233_v13 }
 0x2b9   :  { %v4235_v11 = vpop.f32.mrf.mxu0 }
 0x2ba   :  { %1934 = vadd.xlane.f32.xlu1 %v1933_v26  ;;  %v1879_v27 = vmul.f32 %v4235_v11, %v4235_v11 }
 0x2bb   :  { %v4241_v36 = vpop.f32.mrf.mxu0 }
 0x2bc   :  { %v1936_v60 = vadd.f32 %v1879_v27, %v1878_v58  ;;  %v1880_v57 = vmul.f32 %v4241_v36, %v4241_v36 }
 0x2bd   :  { %v4243_v59 = vpop.f32.mrf.mxu0 }
 0x2be   :  { %1937 = vadd.xlane.f32.xlu0 %v1936_v60  ;;  %v1881_v38 = vmul.f32 %v4243_v59, %v4243_v59 }
 0x2bf   :  { %v4249_v25 = vpop.f32.mrf.mxu0 }
 0x2c0   :  { %v1939_v2 = vadd.f32 %v1881_v38, %v1880_v57  ;;  %v1882_v45 = vmul.f32 %v4249_v25, %v4249_v25 }
 0x2c1   :  { %v4251_v18 = vpop.f32.mrf.mxu0 }
 0x2c2   :  { %1940 = vadd.xlane.f32.xlu1 %v1939_v2  ;;  %v1883_v61 = vmul.f32 %v4251_v18, %v4251_v18 }
 0x2c3   :  { %v4257_v10 = vpop.f32.mrf.mxu0 }
 0x2c4   :  { %v1942_v51 = vadd.f32 %v1883_v61, %v1882_v45  ;;  %v1884_v35 = vmul.f32 %v4257_v10, %v4257_v10 }
 0x2c5   :  { %v4259_v32 = vpop.f32.mrf.mxu0 }
 0x2c6   :  { %1943 = vadd.xlane.f32.xlu0 %v1942_v51  ;;  %v1885_v0 = vmul.f32 %v4259_v32, %v4259_v32 }
 0x2c7   :  { %v4265_v28 = vpop.f32.mrf.mxu0 }
 0x2c8   :  { %v1945_v14 = vadd.f32 %v1885_v0, %v1884_v35  ;;  %v1886_v46 = vmul.f32 %v4265_v28, %v4265_v28 }
 0x2c9   :  { %v4267_v55 = vpop.f32.mrf.mxu0 }
 0x2ca   :  { %1946 = vadd.xlane.f32.xlu1 %v1945_v14  ;;  %v1887_v22 = vmul.f32 %v4267_v55, %v4267_v55 }
 0x2cb   :  { %v4273_v21 = vpop.f32.mrf.mxu0 }
 0x2cc   :  { %v1948_v23 = vadd.f32 %v1887_v22, %v1886_v46  ;;  %v1888_v56 = vmul.f32 %v4273_v21, %v4273_v21 }
 0x2cd   :  { %v4275_v53 = vpop.f32.mrf.mxu0 }
 0x2ce   :  { %1949 = vadd.xlane.f32.xlu0 %v1948_v23  ;;  %v1889_v1 = vmul.f32 %v4275_v53, %v4275_v53 }
 0x2cf   :  { %v4281_v8 = vpop.f32.mrf.mxu0 }
 0x2d0   :  { %v1951_v12 = vadd.f32 %v1889_v1, %v1888_v56  ;;  %v1890_v31 = vmul.f32 %v4281_v8, %v4281_v8 }
 0x2d1   :  { %v4283_v30 = vpop.f32.mrf.mxu0 }
 0x2d2   :  { %1952 = vadd.xlane.f32.xlu1 %v1951_v12  ;;  %v1891_v9 = vmul.f32 %v4283_v30, %v4283_v30 }
 0x2d3   :  { %v4289_v40 = vpop.f32.mrf.mxu0 }
 0x2d4   :  { %v1954_v34 = vadd.f32 %v1891_v9, %v1890_v31  ;;  %v1892_v20 = vmul.f32 %v4289_v40, %v4289_v40 }
 0x2d5   :  { %v4291_v43 = vpop.f32.mrf.mxu0 }
 0x2d6   :  { %4821 = vst [vmem:[#allocation2_spill] sm:$0xff] %v4291_v43  ;;  %1955 = vadd.xlane.f32.xlu0 %v1954_v34  ;;  %v1893_v63 = vmul.f32 %v4291_v43, %v4291_v43 }
 0x2d7   :  { %v4297_v54 = vpop.f32.mrf.mxu0 }
 0x2d8   :  { %4822 = vst [vmem:[#allocation3_spill] sm:$0xff] %v4297_v54  ;;  %v1957_v16 = vadd.f32 %v1893_v63, %v1892_v20  ;;  %v1894_v29 = vmul.f32 %v4297_v54, %v4297_v54 }
 0x2d9   :  { %v4299_v17 = vpop.f32.mrf.mxu0 }
 0x2da   :  { %4823 = vst [vmem:[#allocation4_spill] sm:$0xff] %v4299_v17  ;;  %1958 = vadd.xlane.f32.xlu1 %v1957_v16  ;;  %v1895_v26 = vmul.f32 %v4299_v17, %v4299_v17 }
 0x2db   :  { %v4305_v58 = vpop.f32.mrf.mxu0 }
 0x2dc   :  { %4824 = vst [vmem:[#allocation5_spill] sm:$0xff] %v4305_v58  ;;  %v1960_v27 = vadd.f32 %v1895_v26, %v1894_v29  ;;  %v1896_v57 = vmul.f32 %v4305_v58, %v4305_v58 }
 0x2dd   :  { %v4307_v60 = vpop.f32.mrf.mxu0 }
 0x2de   :  { %4825 = vst [vmem:[#allocation6_spill] sm:$0xff] %v4307_v60  ;;  %1961 = vadd.xlane.f32.xlu0 %v1960_v27  ;;  %v1897_v38 = vmul.f32 %v4307_v60, %v4307_v60 }
 0x2df   :  { %v4313_v2 = vpop.f32.mrf.mxu0 }
 0x2e0   :  { %4826 = vst [vmem:[#allocation7_spill] sm:$0xff] %v4313_v2  ;;  %v1963_v45 = vadd.f32 %v1897_v38, %v1896_v57  ;;  %v1898_v51 = vmul.f32 %v4313_v2, %v4313_v2 }
 0x2e1   :  { %v4315_v61 = vpop.f32.mrf.mxu0 }
 0x2e2   :  { %4827 = vst [vmem:[#allocation8_spill] sm:$0xff] %v4315_v61  ;;  %1964 = vadd.xlane.f32.xlu1 %v1963_v45  ;;  %v1899_v35 = vmul.f32 %v4315_v61, %v4315_v61 }
 0x2e3   :  { %v4321_v0 = vpop.f32.mrf.mxu0 }
 0x2e4   :  { %4828 = vst [vmem:[#allocation9_spill] sm:$0xff] %v4321_v0  ;;  %v1966_v14 = vadd.f32 %v1899_v35, %v1898_v51  ;;  %v1900_v22 = vmul.f32 %v4321_v0, %v4321_v0 }
 0x2e5   :  { %v4323_v46 = vpop.f32.mrf.mxu0 }
 0x2e6   :  { %4829 = vst [vmem:[#allocation10_spill] sm:$0xff] %v4323_v46  ;;  %1967 = vadd.xlane.f32.xlu0 %v1966_v14  ;;  %v1901_v23 = vmul.f32 %v4323_v46, %v4323_v46 }
 0x2e7   :  { %v4329_v56 = vpop.f32.mrf.mxu0 }
 0x2e8   :  { %4830 = vst [vmem:[#allocation11_spill] sm:$0xff] %v4329_v56  ;;  %v1969_v1 = vadd.f32 %v1901_v23, %v1900_v22  ;;  %v1902_v31 = vmul.f32 %v4329_v56, %v4329_v56 }
 0x2e9   :  { %v4331_v12 = vpop.f32.mrf.mxu0 }
 0x2ea   :  { %4831 = vst [vmem:[#allocation12_spill] sm:$0xff] %v4331_v12  ;;  %1970 = vadd.xlane.f32.xlu1 %v1969_v1  ;;  %v1903_v9 = vmul.f32 %v4331_v12, %v4331_v12 }
 0x2eb   :  { %v4337_v34 = vpop.f32.mrf.mxu0 }
 0x2ec   :  { %4832 = vst [vmem:[#allocation13_spill] sm:$0xff] %v4337_v34  ;;  %v1972_v20 = vadd.f32 %v1903_v9, %v1902_v31  ;;  %v1904_v16 = vmul.f32 %v4337_v34, %v4337_v34 }
 0x2ed   :  { %v4339_v63 = vpop.f32.mrf.mxu0 }
 0x2ee   :  { %4833 = vst [vmem:[#allocation14_spill] sm:$0xff] %v4339_v63  ;;  %1973 = vadd.xlane.f32.xlu0 %v1972_v20  ;;  %v1905_v29 = vmul.f32 %v4339_v63, %v4339_v63 }
 0x2f0   :  { %v1975_v26 = vadd.f32 %v1905_v29, %v1904_v16 }
 0x2f2   :  { %1976 = vadd.xlane.f32.xlu1 %v1975_v26 }
 0x31a   :  { %v1667_v27 = vpop.f32.mrf.mxu1 }
 0x31b   :  { %v4345_v57 = vmul.f32 0.00390625, %v1667_v27 }
 0x31c   :  { %v1669_v38 = vpop.f32.mrf.mxu1 }
 0x31d   :  { %v2002_v45 = vmul.f32 %v4345_v57, %v4345_v57 }
 0x31e   :  { %v1672_v51 = vpop.f32.mrf.mxu1 }
 0x31f   :  { %v4349_v35 = vmul.f32 0.00390625, %v1672_v51  ;;  %v1908_v14 = vpop.xlane.xlu0 %1907 }
 0x320   :  { %v1978_v22 = vmul.f32 0.00390625, %v1908_v14  ;;  %v1674_v23 = vpop.f32.mrf.mxu1 }
 0x321   :  { %v2003_v1 = vmul.f32 %v4349_v35, %v4349_v35 }
 0x322   :  { %v2026_v31 = vsub.f32 %v1978_v22, %v2002_v45  ;;  %v1677_v9 = vpop.f32.mrf.mxu1 }
 0x323   :  { %v1911_v20 = vpop.xlane.xlu1 %1910  ;;  %v4353_v16 = vmul.f32 0.00390625, %v1677_v9 }
 0x324   :  { %v2074_v29 = vadd.f32 1e-05, %v2026_v31  ;;  %v1979_v26 = vmul.f32 0.00390625, %v1911_v20  ;;  %v1679_v27 = vpop.f32.mrf.mxu1 }
 0x325   :  { %v2004_v51 = vmul.f32 %v4353_v16, %v4353_v16 }
 0x326   :  { %2718 = vrsqrt.f32 %v2074_v29  ;;  %v2027_v38 = vsub.f32 %v1979_v26, %v2003_v1  ;;  %v1682_v63 = vpop.f32.mrf.mxu1 }
 0x327   :  { %v4357_v34 = vmul.f32 0.00390625, %v1682_v63  ;;  %v1914_v14 = vpop.xlane.xlu0 %1913 }
 0x328   :  { %v2075_v23 = vadd.f32 1e-05, %v2027_v38  ;;  %v1980_v12 = vmul.f32 0.00390625, %v1914_v14  ;;  %v1684_v56 = vpop.f32.mrf.mxu1 }
 0x329   :  { %v2005_v45 = vmul.f32 %v4357_v34, %v4357_v34 }
 0x32a   :  { %2720 = vrsqrt.f32 %v2075_v23  ;;  %v2028_v22 = vsub.f32 %v1980_v12, %v2004_v51  ;;  %v1687_v31 = vpop.f32.mrf.mxu1  ;;  %v2050_v12 = vld [vmem:[%s4805_s4] sm:$0xff] }
 0x32b   :  { %v1917_v9 = vpop.xlane.xlu1 %1916  ;;  %v4361_v20 = vmul.f32 0.00390625, %v1687_v31 }
 0x32c   :  { %v2076_v1 = vadd.f32 1e-05, %v2028_v22  ;;  %v1981_v29 = vmul.f32 0.00390625, %v1917_v9  ;;  %v1689_v26 = vpop.f32.mrf.mxu1 }
 0x32d   :  { %v2006_v63 = vmul.f32 %v4361_v20, %v4361_v20 }
 0x32e   :  { %2722 = vrsqrt.f32 %v2076_v1  ;;  %v2029_v27 = vsub.f32 %v1981_v29, %v2005_v45  ;;  %v1692_v38 = vpop.f32.mrf.mxu1 }
 0x32f   :  { %v4365_v14 = vmul.f32 0.00390625, %v1692_v38  ;;  %v1920_v56 = vpop.xlane.xlu0 %1919 }
 0x330   :  { %v2077_v23 = vadd.f32 1e-05, %v2029_v27  ;;  %v1982_v46 = vmul.f32 0.00390625, %v1920_v56  ;;  %v1694_v0 = vpop.f32.mrf.mxu1 }
 0x331   :  { %v2007_v51 = vmul.f32 %v4365_v14, %v4365_v14  ;;  %v2051_v0 = vld [vmem:[%s4805_s4 + $0x8] sm:$0xff] }
 0x332   :  { %2724 = vrsqrt.f32 %v2077_v23  ;;  %v2030_v22 = vsub.f32 %v1982_v46, %v2006_v63  ;;  %v1697_v45 = vpop.f32.mrf.mxu1 }
 0x333   :  { %v2719_v31 = vpop.eup %2718  ;;  %v1923_v9 = vpop.xlane.xlu1 %1922  ;;  %v4372_v1 = vmul.f32 0.00390625, %v1697_v45 }
 0x334   :  { %v2078_v29 = vadd.f32 1e-05, %v2030_v22  ;;  %v1983_v26 = vmul.f32 0.00390625, %v1923_v9  ;;  %v1699_v38 = vpop.f32.mrf.mxu1  ;;  %v2122_v27 = vmul.f32 %v2719_v31, %v2050_v12 }
 0x335   :  { %v2008_v23 = vmul.f32 %v4372_v1, %v4372_v1 }
 0x336   :  { %2726 = vrsqrt.f32 %v2078_v29  ;;  %v2031_v56 = vsub.f32 %v1983_v26, %v2007_v51  ;;  %2220 = vperm.xlu0 %2656, %v2122_v27   ;;  %v1702_v46 = vpop.f32.mrf.mxu1  ;;  %v2170_v22 = vmul.f32 %v2122_v27, %v4345_v57  ;;  %v2146_v29 = vld [vmem:[%s4806_s5] sm:$0xff]  ;;  %v2147_v51 = vld [vmem:[%s4806_s5 + $0x8] sm:$0xff]  ;;  %v2052_v26 = vld [vmem:[%s4805_s4 + $0x10] sm:$0xff] }
 0x337   :  { %v2721_v63 = vpop.eup %2720  ;;  %v4379_v61 = vmul.f32 0.00390625, %v1702_v46  ;;  %v1926_v45 = vpop.xlane.xlu0 %1925 }
 0x338   :  { %v2079_v9 = vadd.f32 1e-05, %v2031_v56  ;;  %v1984_v38 = vmul.f32 0.00390625, %v1926_v45  ;;  %v1704_v12 = vpop.f32.mrf.mxu1  ;;  %v2123_v31 = vmul.f32 %v2721_v63, %v2051_v0 }
 0x339   :  { %v2009_v57 = vmul.f32 %v4379_v61, %v4379_v61  ;;  %v2194_v12 = vsub.f32 %v2146_v29, %v2170_v22 }
 0x33a   :  { %2728 = vrsqrt.f32 %v2079_v9  ;;  %v2032_v27 = vsub.f32 %v1984_v38, %v2008_v23  ;;  %2225 = vperm.xlu1 %2657, %v2123_v31   ;;  %v1707_v56 = vpop.f32.mrf.mxu1  ;;  %v2171_v0 = vmul.f32 %v2123_v31, %v4349_v35  ;;  %v2053_v9 = vld [vmem:[%s4805_s4 + $0x18] sm:$0xff] }
 0x33b   :  { %v2723_v46 = vpop.eup %2722  ;;  %v1929_v63 = vpop.xlane.xlu1 %1928  ;;  %v4394_v45 = vmul.f32 0.00390625, %v1707_v56 }
 0x33c   :  { %v2080_v2 = vadd.f32 1e-05, %v2032_v27  ;;  %v1985_v60 = vmul.f32 0.00390625, %v1929_v63  ;;  %v1709_v58 = vpop.f32.mrf.mxu1  ;;  %v2195_v17 = vsub.f32 %v2147_v51, %v2171_v0  ;;  %v2124_v54 = vmul.f32 %v2723_v46, %v2052_v26 }
 0x33d   :  { %v2010_v38 = vmul.f32 %v4394_v45, %v4394_v45 }
 0x33e   :  { %2730 = vrsqrt.f32 %v2080_v2  ;;  %v2033_v23 = vsub.f32 %v1985_v60, %v2009_v57  ;;  %2393 = vperm.xlu0 %2656, %v2195_v17   ;;  %2388 = vperm.xlu1 %2657, %v2194_v12   ;;  %v1712_v35 = vpop.f32.mrf.mxu1  ;;  %v2172_v58 = vmul.f32 %v2124_v54, %v4353_v16  ;;  %v2148_v60 = vld [vmem:[%s4806_s5 + $0x10] sm:$0xff]  ;;  %v2149_v17 = vld [vmem:[%s4806_s5 + $0x18] sm:$0xff]  ;;  %v2054_v2 = vld [vmem:[%s4805_s4 + $0x20] sm:$0xff] }
 0x33f   :  { %v2725_v31 = vpop.eup %2724  ;;  %v4401_v56 = vmul.f32 0.00390625, %v1712_v35  ;;  %v1932_v22 = vpop.xlane.xlu0 %1931 }
 0x340   :  { %v2081_v29 = vadd.f32 1e-05, %v2033_v23  ;;  %v1986_v51 = vmul.f32 0.00390625, %v1932_v22  ;;  %v1714_v26 = vpop.f32.mrf.mxu1  ;;  %v2125_v27 = vmul.f32 %v2725_v31, %v2053_v9  ;;  %v2196_v23 = vsub.f32 %v2148_v60, %v2172_v58 }
 0x341   :  { %v2011_v16 = vmul.f32 %v4401_v56, %v4401_v56 }
 0x342   :  { %2732 = vrsqrt.f32 %v2081_v29  ;;  %v2034_v57 = vsub.f32 %v1986_v51, %v2010_v38  ;;  %2235 = vperm.xlu0 %2656, %v2125_v27   ;;  %2230 = vperm.xlu1 %2657, %v2124_v54   ;;  %v1717_v0 = vpop.f32.mrf.mxu1  ;;  %v2173_v46 = vmul.f32 %v2125_v27, %v4357_v34  ;;  %v2055_v29 = vld [vmem:[%s4805_s4 + $0x28] sm:$0xff] }
 0x343   :  { %v2727_v63 = vpop.eup %2726  ;;  %v1935_v12 = vpop.xlane.xlu1 %1934  ;;  %v4416_v9 = vmul.f32 0.00390625, %v1717_v0 }
 0x344   :  { %v2082_v35 = vadd.f32 1e-05, %v2034_v57  ;;  %v1987_v31 = vmul.f32 0.00390625, %v1935_v12  ;;  %v1719_v22 = vpop.f32.mrf.mxu1  ;;  %v2197_v26 = vsub.f32 %v2149_v17, %v2173_v46  ;;  %v2126_v43 = vmul.f32 %v2727_v63, %v2054_v2  ;;  %v2151_v46 = vld [vmem:[%s4806_s5 + $0x28] sm:$0xff]  ;;  %v2056_v63 = vld [vmem:[%s4805_s4 + $0x30] sm:$0xff] }
 0x345   :  { %v2012_v54 = vmul.f32 %v4416_v9, %v4416_v9 }
 0x346   :  { %2734 = vrsqrt.f32 %v2082_v35  ;;  %v2035_v38 = vsub.f32 %v1987_v31, %v2011_v16  ;;  %2403 = vperm.xlu0 %2656, %v2197_v26   ;;  %2398 = vperm.xlu1 %2657, %v2196_v23   ;;  %v1722_v34 = vpop.f32.mrf.mxu1  ;;  %v2174_v60 = vmul.f32 %v2126_v43, %v4361_v20  ;;  %v2150_v16 = vld [vmem:[%s4806_s5 + $0x20] sm:$0xff] }
 0x347   :  { %v2729_v51 = vpop.eup %2728  ;;  %v4423_v27 = vmul.f32 0.00390625, %v1722_v34  ;;  %v1938_v58 = vpop.xlane.xlu0 %1937 }
 0x348   :  { %v2083_v17 = vadd.f32 1e-05, %v2035_v38  ;;  %v1988_v2 = vmul.f32 0.00390625, %v1938_v58  ;;  %v1724_v57 = vpop.f32.mrf.mxu1  ;;  %v2127_v0 = vmul.f32 %v2729_v51, %v2055_v29  ;;  %v2198_v29 = vsub.f32 %v2150_v16, %v2174_v60 }
 0x349   :  { %v2013_v20 = vmul.f32 %v4423_v27, %v4423_v27 }
 0x34a   :  { %2736 = vrsqrt.f32 %v2083_v17  ;;  %v2036_v12 = vsub.f32 %v1988_v2, %v2012_v54  ;;  %2245 = vperm.xlu0 %2656, %v2127_v0   ;;  %2240 = vperm.xlu1 %2657, %v2126_v43   ;;  %v1727_v23 = vpop.f32.mrf.mxu1  ;;  %v2175_v35 = vmul.f32 %v2127_v0, %v4365_v14  ;;  %v2057_v17 = vld [vmem:[%s4805_s4 + $0x38] sm:$0xff] }
 0x34b   :  { %v2731_v31 = vpop.eup %2730  ;;  %v1941_v22 = vpop.xlane.xlu1 %1940  ;;  %v4438_v26 = vmul.f32 0.00390625, %v1727_v23 }
 0x34c   :  { %v2084_v38 = vadd.f32 1e-05, %v2036_v12  ;;  %v1989_v34 = vmul.f32 0.00390625, %v1941_v22  ;;  %v1729_v51 = vpop.f32.mrf.mxu1  ;;  %v2199_v58 = vsub.f32 %v2151_v46, %v2175_v35  ;;  %v2128_v57 = vmul.f32 %v2731_v31, %v2056_v63  ;;  %v2153_v35 = vld [vmem:[%s4806_s5 + $0x38] sm:$0xff]  ;;  %v2058_v31 = vld [vmem:[%s4805_s4 + $0x40] sm:$0xff] }
 0x34d   :  { %v2014_v43 = vmul.f32 %v4438_v26, %v4438_v26 }
 0x34e   :  { %2738 = vrsqrt.f32 %v2084_v38  ;;  %v2037_v54 = vsub.f32 %v1989_v34, %v2013_v20  ;;  %2413 = vperm.xlu0 %2656, %v2199_v58   ;;  %2408 = vperm.xlu1 %2657, %v2198_v29   ;;  %v1732_v14 = vpop.f32.mrf.mxu1  ;;  %v2176_v16 = vmul.f32 %v2128_v57, %v4372_v1  ;;  %v2152_v20 = vld [vmem:[%s4806_s5 + $0x30] sm:$0xff] }
 0x34f   :  { %v2733_v2 = vpop.eup %2732  ;;  %v4445_v0 = vmul.f32 0.00390625, %v1732_v14  ;;  %v1944_v60 = vpop.xlane.xlu0 %1943 }
 0x350   :  { %v2085_v46 = vadd.f32 1e-05, %v2037_v54  ;;  %v1990_v63 = vmul.f32 0.00390625, %v1944_v60  ;;  %v1734_v12 = vpop.f32.mrf.mxu1  ;;  %v2129_v23 = vmul.f32 %v2733_v2, %v2057_v17  ;;  %v2200_v17 = vsub.f32 %v2152_v20, %v2176_v16 }
 0x351   :  { %v2015_v1 = vmul.f32 %v4445_v0, %v4445_v0 }
 0x352   :  { %2740 = vrsqrt.f32 %v2085_v46  ;;  %v2038_v22 = vsub.f32 %v1990_v63, %v2014_v43  ;;  %2255 = vperm.xlu0 %2656, %v2129_v23   ;;  %2250 = vperm.xlu1 %2657, %v2128_v57   ;;  %v1737_v29 = vpop.f32.mrf.mxu1  ;;  %v2177_v38 = vmul.f32 %v2129_v23, %v4379_v61  ;;  %v2059_v46 = vld [vmem:[%s4805_s4 + $0x48] sm:$0xff] }
 0x353   :  { %v2735_v34 = vpop.eup %2734  ;;  %v1947_v51 = vpop.xlane.xlu1 %1946  ;;  %v4460_v58 = vmul.f32 0.00390625, %v1737_v29 }
 0x354   :  { %v2086_v54 = vadd.f32 1e-05, %v2038_v22  ;;  %v1991_v14 = vmul.f32 0.00390625, %v1947_v51  ;;  %v1739_v2 = vpop.f32.mrf.mxu1  ;;  %v2201_v60 = vsub.f32 %v2153_v35, %v2177_v38  ;;  %v2130_v12 = vmul.f32 %v2735_v34, %v2058_v31  ;;  %v2155_v38 = vld [vmem:[%s4806_s5 + $0x48] sm:$0xff]  ;;  %v2060_v34 = vld [vmem:[%s4805_s4 + $0x50] sm:$0xff] }
 0x355   :  { %v2016_v57 = vmul.f32 %v4460_v58, %v4460_v58 }
 0x356   :  { %2742 = vrsqrt.f32 %v2086_v54  ;;  %v2039_v43 = vsub.f32 %v1991_v14, %v2015_v1  ;;  %2423 = vperm.xlu0 %2656, %v2201_v60   ;;  %2418 = vperm.xlu1 %2657, %v2200_v17   ;;  %v1742_v61 = vpop.f32.mrf.mxu1  ;;  %v2178_v20 = vmul.f32 %v2130_v12, %v4394_v45  ;;  %v2154_v1 = vld [vmem:[%s4806_s5 + $0x40] sm:$0xff] }
 0x357   :  { %v2737_v63 = vpop.eup %2736  ;;  %v4467_v23 = vmul.f32 0.00390625, %v1742_v61  ;;  %v1950_v16 = vpop.xlane.xlu0 %1949 }
 0x358   :  { %v2087_v35 = vadd.f32 1e-05, %v2039_v43  ;;  %v1992_v31 = vmul.f32 0.00390625, %v1950_v16  ;;  %v1744_v22 = vpop.f32.mrf.mxu1  ;;  %v2131_v29 = vmul.f32 %v2737_v63, %v2059_v46  ;;  %v2202_v46 = vsub.f32 %v2154_v1, %v2178_v20 }
 0x359   :  { %v2017_v45 = vmul.f32 %v4467_v23, %v4467_v23 }
 0x35a   :  { %2744 = vrsqrt.f32 %v2087_v35  ;;  %v2040_v51 = vsub.f32 %v1992_v31, %v2016_v57  ;;  %2265 = vperm.xlu0 %2656, %v2131_v29   ;;  %2260 = vperm.xlu1 %2657, %v2130_v12   ;;  %v1747_v17 = vpop.f32.mrf.mxu1  ;;  %v2179_v54 = vmul.f32 %v2131_v29, %v4401_v56  ;;  %v2061_v35 = vld [vmem:[%s4805_s4 + $0x58] sm:$0xff] }
 0x35b   :  { %v2739_v14 = vpop.eup %2738  ;;  %v1953_v2 = vpop.xlane.xlu1 %1952  ;;  %v4482_v60 = vmul.f32 0.00390625, %v1747_v17 }
 0x35c   :  { %v2088_v43 = vadd.f32 1e-05, %v2040_v51  ;;  %v1993_v61 = vmul.f32 0.00390625, %v1953_v2  ;;  %v1749_v63 = vpop.f32.mrf.mxu1  ;;  %v2203_v16 = vsub.f32 %v2155_v38, %v2179_v54  ;;  %v2132_v22 = vmul.f32 %v2739_v14, %v2060_v34  ;;  %v2157_v54 = vld [vmem:[%s4806_s5 + $0x58] sm:$0xff]  ;;  %v2062_v14 = vld [vmem:[%s4805_s4 + $0x60] sm:$0xff] }
 0x35d   :  { %v2018_v12 = vmul.f32 %v4482_v60, %v4482_v60 }
 0x35e   :  { %2746 = vrsqrt.f32 %v2088_v43  ;;  %v2041_v57 = vsub.f32 %v1993_v61, %v2017_v45  ;;  %2433 = vperm.xlu0 %2656, %v2203_v16   ;;  %2428 = vperm.xlu1 %2657, %v2202_v46   ;;  %v1752_v56 = vpop.f32.mrf.mxu1  ;;  %v2180_v1 = vmul.f32 %v2132_v22, %v4416_v9  ;;  %v2156_v45 = vld [vmem:[%s4806_s5 + $0x50] sm:$0xff] }
 0x35f   :  { %v2741_v31 = vpop.eup %2740  ;;  %v4489_v29 = vmul.f32 0.00390625, %v1752_v56  ;;  %v1956_v20 = vpop.xlane.xlu0 %1955 }
 0x360   :  { %v2089_v38 = vadd.f32 1e-05, %v2041_v57  ;;  %v1994_v34 = vmul.f32 0.00390625, %v1956_v20  ;;  %v1754_v51 = vpop.f32.mrf.mxu1  ;;  %v2133_v17 = vmul.f32 %v2741_v31, %v2061_v35  ;;  %v2204_v35 = vsub.f32 %v2156_v45, %v2180_v1 }
 0x361   :  { %v2019_v9 = vmul.f32 %v4489_v29, %v4489_v29 }
 0x362   :  { %2748 = vrsqrt.f32 %v2089_v38  ;;  %v2042_v2 = vsub.f32 %v1994_v34, %v2018_v12  ;;  %2275 = vperm.xlu0 %2656, %v2133_v17   ;;  %2270 = vperm.xlu1 %2657, %v2132_v22   ;;  %v1757_v46 = vpop.f32.mrf.mxu1  ;;  %v2181_v43 = vmul.f32 %v2133_v17, %v4423_v27  ;;  %v2063_v38 = vld [vmem:[%s4805_s4 + $0x68] sm:$0xff] }
 0x363   :  { %v2743_v61 = vpop.eup %2742  ;;  %v1959_v63 = vpop.xlane.xlu1 %1958  ;;  %v4504_v16 = vmul.f32 0.00390625, %v1757_v46 }
 0x364   :  { %v2090_v57 = vadd.f32 1e-05, %v2042_v2  ;;  %v1995_v56 = vmul.f32 0.00390625, %v1959_v63  ;;  %v1759_v31 = vpop.f32.mrf.mxu1  ;;  %v2205_v20 = vsub.f32 %v2157_v54, %v2181_v43  ;;  %v2134_v51 = vmul.f32 %v2743_v61, %v2062_v14  ;;  %v2159_v43 = vld [vmem:[%s4806_s5 + $0x68] sm:$0xff]  ;;  %v2064_v61 = vld [vmem:[%s4805_s4 + $0x70] sm:$0xff] }
 0x365   :  { %v2020_v22 = vmul.f32 %v4504_v16, %v4504_v16 }
 0x366   :  { %2750 = vrsqrt.f32 %v2090_v57  ;;  %v2043_v12 = vsub.f32 %v1995_v56, %v2019_v9  ;;  %2443 = vperm.xlu0 %2656, %v2205_v20   ;;  %2438 = vperm.xlu1 %2657, %v2204_v35   ;;  %v1762_v27 = vpop.f32.mrf.mxu1  ;;  %v2182_v45 = vmul.f32 %v2134_v51, %v4438_v26  ;;  %v2158_v9 = vld [vmem:[%s4806_s5 + $0x60] sm:$0xff] }
 0x367   :  { %v2745_v34 = vpop.eup %2744  ;;  %v4511_v17 = vmul.f32 0.00390625, %v1762_v27  ;;  %v1962_v1 = vpop.xlane.xlu0 %1961 }
 0x368   :  { %v2091_v54 = vadd.f32 1e-05, %v2043_v12  ;;  %v1996_v14 = vmul.f32 0.00390625, %v1962_v1  ;;  %v1764_v2 = vpop.f32.mrf.mxu1  ;;  %v2135_v46 = vmul.f32 %v2745_v34, %v2063_v38  ;;  %v2206_v38 = vsub.f32 %v2158_v9, %v2182_v45 }
 0x369   :  { %v2021_v26 = vmul.f32 %v4511_v17, %v4511_v17 }
 0x36a   :  { %2752 = vrsqrt.f32 %v2091_v54  ;;  %v2044_v63 = vsub.f32 %v1996_v14, %v2020_v22  ;;  %2285 = vperm.xlu0 %2656, %v2135_v46   ;;  %2280 = vperm.xlu1 %2657, %v2134_v51   ;;  %v1767_v35 = vpop.f32.mrf.mxu1  ;;  %v2183_v57 = vmul.f32 %v2135_v46, %v4445_v0  ;;  %v2065_v54 = vld [vmem:[%s4805_s4 + $0x78] sm:$0xff] }
 0x36b   :  { %v2747_v56 = vpop.eup %2746  ;;  %v1965_v31 = vpop.xlane.xlu1 %1964  ;;  %v4526_v20 = vmul.f32 0.00390625, %v1767_v35 }
 0x36c   :  { %v2092_v12 = vadd.f32 1e-05, %v2044_v63  ;;  %v1997_v27 = vmul.f32 0.00390625, %v1965_v31  ;;  %v1769_v34 = vpop.f32.mrf.mxu1  ;;  %v2207_v1 = vsub.f32 %v2159_v43, %v2183_v57  ;;  %v2136_v2 = vmul.f32 %v2747_v56, %v2064_v61  ;;  %v2161_v57 = vld [vmem:[%s4806_s5 + $0x78] sm:$0xff]  ;;  %v2066_v56 = vld [vmem:[%s4805_s4 + $0x80] sm:$0xff] }
 0x36d   :  { %v2022_v51 = vmul.f32 %v4526_v20, %v4526_v20 }
 0x36e   :  { %2754 = vrsqrt.f32 %v2092_v12  ;;  %v2045_v22 = vsub.f32 %v1997_v27, %v2021_v26  ;;  %2453 = vperm.xlu0 %2656, %v2207_v1   ;;  %2448 = vperm.xlu1 %2657, %v2206_v38   ;;  %v1772_v0 = vpop.f32.mrf.mxu1  ;;  %v2184_v9 = vmul.f32 %v2136_v2, %v4460_v58  ;;  %v2160_v26 = vld [vmem:[%s4806_s5 + $0x70] sm:$0xff] }
 0x36f   :  { %v2749_v14 = vpop.eup %2748  ;;  %v4533_v46 = vmul.f32 0.00390625, %v1772_v0  ;;  %v1968_v45 = vpop.xlane.xlu0 %1967 }
 0x370   :  { %v2093_v43 = vadd.f32 1e-05, %v2045_v22  ;;  %v1998_v61 = vmul.f32 0.00390625, %v1968_v45  ;;  %v1774_v63 = vpop.f32.mrf.mxu1  ;;  %v2137_v35 = vmul.f32 %v2749_v14, %v2065_v54  ;;  %v2208_v54 = vsub.f32 %v2160_v26, %v2184_v9 }
 0x371   :  { %v2023_v58 = vmul.f32 %v4533_v46, %v4533_v46 }
 0x372   :  { %2756 = vrsqrt.f32 %v2093_v43  ;;  %v2046_v31 = vsub.f32 %v1998_v61, %v2022_v51  ;;  %2295 = vperm.xlu0 %2656, %v2137_v35   ;;  %2290 = vperm.xlu1 %2657, %v2136_v2   ;;  %v1777_v38 = vpop.f32.mrf.mxu1  ;;  %v2185_v12 = vmul.f32 %v2137_v35, %v4467_v23  ;;  %v2067_v43 = vld [vmem:[%s4805_s4 + $0x88] sm:$0xff] }
 0x373   :  { %v2751_v27 = vpop.eup %2750  ;;  %v1971_v34 = vpop.xlane.xlu1 %1970  ;;  %v4548_v1 = vmul.f32 0.00390625, %v1777_v38 }
 0x374   :  { %v2094_v22 = vadd.f32 1e-05, %v2046_v31  ;;  %v1999_v0 = vmul.f32 0.00390625, %v1971_v34  ;;  %v1779_v14 = vpop.f32.mrf.mxu1  ;;  %v2209_v45 = vsub.f32 %v2161_v57, %v2185_v12  ;;  %v2138_v63 = vmul.f32 %v2751_v27, %v2066_v56  ;;  %v2163_v12 = vld [vmem:[%s4806_s5 + $0x88] sm:$0xff]  ;;  %v2068_v27 = vld [vmem:[%s4805_s4 + $0x90] sm:$0xff] }
 0x375   :  { %v2024_v2 = vmul.f32 %v4548_v1, %v4548_v1 }
 0x376   :  { %2758 = vrsqrt.f32 %v2094_v22  ;;  %v2047_v51 = vsub.f32 %v1999_v0, %v2023_v58  ;;  %2463 = vperm.xlu0 %2656, %v2209_v45   ;;  %2458 = vperm.xlu1 %2657, %v2208_v54   ;;  %v1782_v23 = vpop.f32.mrf.mxu1  ;;  %v2186_v26 = vmul.f32 %v2138_v63, %v4482_v60  ;;  %v2162_v58 = vld [vmem:[%s4806_s5 + $0x80] sm:$0xff] }
 0x377   :  { %v2753_v61 = vpop.eup %2752  ;;  %v4555_v35 = vmul.f32 0.00390625, %v1782_v23  ;;  %v1974_v9 = vpop.xlane.xlu0 %1973 }
 0x378   :  { %v2095_v57 = vadd.f32 1e-05, %v2047_v51  ;;  %v2000_v56 = vmul.f32 0.00390625, %v1974_v9  ;;  %v1784_v31 = vpop.f32.mrf.mxu1  ;;  %v2139_v38 = vmul.f32 %v2753_v61, %v2067_v43  ;;  %v2210_v14 = vsub.f32 %v2162_v58, %v2186_v26  ;;  %v2069_v61 = vld [vmem:[%s4805_s4 + $0x98] sm:$0xff] }
 0x379   :  { %v2025_v60 = vmul.f32 %v4555_v35, %v4555_v35  ;;  %v2165_v26 = vld [vmem:[%s4806_s5 + $0x98] sm:$0xff]  ;;  %v2070_v31 = vld [vmem:[%s4805_s4 + $0xa0] sm:$0xff] }
 0x37a   :  { %2760 = vrsqrt.f32 %v2095_v57  ;;  %v2048_v34 = vsub.f32 %v2000_v56, %v2024_v2  ;;  %2305 = vperm.xlu0 %2656, %v2139_v38   ;;  %2300 = vperm.xlu1 %2657, %v2138_v63   ;;  %v2187_v54 = vmul.f32 %v2139_v38, %v4489_v29  ;;  %v2164_v56 = vld [vmem:[%s4806_s5 + $0x90] sm:$0xff] }
 0x37b   :  { %v2755_v22 = vpop.eup %2754  ;;  %v1977_v0 = vpop.xlane.xlu1 %1976 }
 0x37c   :  { %v2096_v45 = vadd.f32 1e-05, %v2048_v34  ;;  %v2001_v43 = vmul.f32 0.00390625, %v1977_v0  ;;  %v2211_v51 = vsub.f32 %v2163_v12, %v2187_v54  ;;  %v2140_v23 = vmul.f32 %v2755_v22, %v2068_v27  ;;  %v2167_v0 = vld [vmem:[%s4806_s5 + $0xa8] sm:$0xff] }
 0x37e   :  { %2762 = vrsqrt.f32 %v2096_v45  ;;  %v2049_v9 = vsub.f32 %v2001_v43, %v2025_v60  ;;  %2473 = vperm.xlu0 %2656, %v2211_v51   ;;  %2468 = vperm.xlu1 %2657, %v2210_v14   ;;  %v2188_v29 = vmul.f32 %v2140_v23, %v4504_v16  ;;  %v2071_v60 = vld [vmem:[%s4805_s4 + $0xa8] sm:$0xff]  ;;  %v2072_v14 = vld [vmem:[%s4805_s4 + $0xb0] sm:$0xff] }
 0x37f   :  { %v2757_v2 = vpop.eup %2756 }
 0x380   :  { %v2097_v57 = vadd.f32 1e-05, %v2049_v9  ;;  %v2141_v63 = vmul.f32 %v2757_v2, %v2069_v61  ;;  %v2212_v16 = vsub.f32 %v2164_v56, %v2188_v29  ;;  %v2073_v61 = vld [vmem:[%s4805_s4 + $0xb8] sm:$0xff] }
 0x382   :  { %2764 = vrsqrt.f32 %v2097_v57  ;;  %2315 = vperm.xlu0 %2656, %v2141_v63   ;;  %2310 = vperm.xlu1 %2657, %v2140_v23   ;;  %v2189_v38 = vmul.f32 %v2141_v63, %v4511_v17  ;;  %v2166_v17 = vld [vmem:[%s4806_s5 + $0xa0] sm:$0xff]  ;;  %v2169_v63 = vld [vmem:[%s4806_s5 + $0xb8] sm:$0xff] }
 0x383   :  { %v2759_v58 = vpop.eup %2758 }
 0x384   :  { %v2213_v12 = vsub.f32 %v2165_v26, %v2189_v38  ;;  %v2142_v27 = vmul.f32 %v2759_v58, %v2070_v31 }
 0x386   :  { %2483 = vperm.xlu0 %2656, %v2213_v12   ;;  %2478 = vperm.xlu1 %2657, %v2212_v16   ;;  %v2190_v22 = vmul.f32 %v2142_v27, %v4526_v20 }
 0x387   :  { %v2761_v34 = vpop.eup %2760 }
 0x388   :  { %v2143_v54 = vmul.f32 %v2761_v34, %v2071_v60  ;;  %v2214_v23 = vsub.f32 %v2166_v17, %v2190_v22 }
 0x38a   :  { %2325 = vperm.xlu0 %2656, %v2143_v54   ;;  %2320 = vperm.xlu1 %2657, %v2142_v27   ;;  %v2191_v45 = vmul.f32 %v2143_v54, %v4533_v46  ;;  %v2168_v46 = vld [vmem:[%s4806_s5 + $0xb0] sm:$0xff] }
 0x38b   :  { %v2763_v43 = vpop.eup %2762 }
 0x38c   :  { %v2215_v51 = vsub.f32 %v2167_v0, %v2191_v45  ;;  %v2144_v20 = vmul.f32 %v2763_v43, %v2072_v14 }
 0x38e   :  { %2493 = vperm.xlu0 %2656, %v2215_v51   ;;  %2488 = vperm.xlu1 %2657, %v2214_v23   ;;  %v2192_v57 = vmul.f32 %v2144_v20, %v4548_v1 }
 0x38f   :  { %v2765_v9 = vpop.eup %2764 }
 0x390   :  { %v2145_v2 = vmul.f32 %v2765_v9, %v2073_v61  ;;  %v2216_v56 = vsub.f32 %v2168_v46, %v2192_v57 }
 0x392   :  { %2335 = vperm.xlu0 %2656, %v2145_v2   ;;  %2330 = vperm.xlu1 %2657, %v2144_v20   ;;  %v2193_v29 = vmul.f32 %v2145_v2, %v4555_v35 }
 0x394   :  { %v2217_v26 = vsub.f32 %v2169_v63, %v2193_v29 }
 0x396   :  { %2503 = vperm.xlu0 %2656, %v2217_v26   ;;  %2498 = vperm.xlu1 %2657, %v2216_v56  }
 0x3b1   :  { %v2221_v31 = vpop.permute.xlu0 %2220 }
 0x3b2   :  { %v2338_v1 = vmul.f32 %v2221_v31, %v4123_v6  ;;  %v2339_v58 = vmul.f32 %v2221_v31, %v4127_v41 }
 0x3b5   :  { %v2226_v38 = vpop.permute.xlu1 %2225 }
 0x3b6   :  { %v2340_v12 = vmul.f32 %v2226_v38, %v4134_v49  ;;  %v2341_v16 = vmul.f32 %v2226_v38, %v4138_v39 }
 0x3b9   :  { %v2389_v27 = vpop.permute.xlu1 %2388  ;;  %v2394_v60 = vpop.permute.xlu0 %2393 }
 0x3ba   :  { %v2506_v34 = vadd.f32 %v2389_v27, %v2338_v1  ;;  %v2507_v54 = vadd.f32 %v2389_v27, %v2339_v58  ;;  %v2508_v22 = vadd.f32 %v2394_v60, %v2340_v12  ;;  %v2509_v35 = vadd.f32 %v2394_v60, %v2341_v16 }
 0x3bc   :  { %2554 = vst [vmem:[%s4807_s6] sm:$0xff] %v2506_v34  ;;  %2555 = vst [vmem:[%s4807_s6 + $0x8] sm:$0xff] %v2507_v54 }
 0x3bd   :  { %2556 = vst [vmem:[%s4807_s6 + $0x10] sm:$0xff] %v2508_v22  ;;  %2557 = vst [vmem:[%s4807_s6 + $0x18] sm:$0xff] %v2509_v35  ;;  %v2231_v6 = vpop.permute.xlu1 %2230  ;;  %v2236_v41 = vpop.permute.xlu0 %2235 }
 0x3be   :  { %v2342_v49 = vmul.f32 %v2231_v6, %v4145_v62  ;;  %v2343_v39 = vmul.f32 %v2231_v6, %v4149_v3  ;;  %v2344_v0 = vmul.f32 %v2236_v41, %v4156_v19  ;;  %v2345_v17 = vmul.f32 %v2236_v41, %v4160_v42 }
 0x3c1   :  { %v2399_v14 = vpop.permute.xlu1 %2398  ;;  %v2404_v45 = vpop.permute.xlu0 %2403 }
 0x3c2   :  { %v2510_v43 = vadd.f32 %v2399_v14, %v2342_v49  ;;  %v2511_v51 = vadd.f32 %v2399_v14, %v2343_v39  ;;  %v2512_v23 = vadd.f32 %v2404_v45, %v2344_v0  ;;  %v2513_v20 = vadd.f32 %v2404_v45, %v2345_v17 }
 0x3c4   :  { %2558 = vst [vmem:[%s4807_s6 + $0x20] sm:$0xff] %v2510_v43  ;;  %2559 = vst [vmem:[%s4807_s6 + $0x28] sm:$0xff] %v2511_v51 }
 0x3c5   :  { %2560 = vst [vmem:[%s4807_s6 + $0x30] sm:$0xff] %v2512_v23  ;;  %2561 = vst [vmem:[%s4807_s6 + $0x38] sm:$0xff] %v2513_v20  ;;  %v2241_v62 = vpop.permute.xlu1 %2240  ;;  %v2246_v3 = vpop.permute.xlu0 %2245 }
 0x3c6   :  { %v2346_v19 = vmul.f32 %v2241_v62, %v4167_v44  ;;  %v2347_v42 = vmul.f32 %v2241_v62, %v4171_v50  ;;  %v2348_v61 = vmul.f32 %v2246_v3, %v4178_v52  ;;  %v2349_v9 = vmul.f32 %v2246_v3, %v4182_v47 }
 0x3c9   :  { %v2409_v2 = vpop.permute.xlu1 %2408  ;;  %v2414_v57 = vpop.permute.xlu0 %2413 }
 0x3ca   :  { %v2514_v63 = vadd.f32 %v2409_v2, %v2346_v19  ;;  %v2515_v46 = vadd.f32 %v2409_v2, %v2347_v42  ;;  %v2516_v29 = vadd.f32 %v2414_v57, %v2348_v61  ;;  %v2517_v26 = vadd.f32 %v2414_v57, %v2349_v9 }
 0x3cc   :  { %2562 = vst [vmem:[%s4807_s6 + $0x40] sm:$0xff] %v2514_v63  ;;  %2563 = vst [vmem:[%s4807_s6 + $0x48] sm:$0xff] %v2515_v46 }
 0x3cd   :  { %2564 = vst [vmem:[%s4807_s6 + $0x50] sm:$0xff] %v2516_v29  ;;  %2565 = vst [vmem:[%s4807_s6 + $0x58] sm:$0xff] %v2517_v26  ;;  %v2251_v44 = vpop.permute.xlu1 %2250  ;;  %v2256_v50 = vpop.permute.xlu0 %2255 }
 0x3ce   :  { %v2350_v52 = vmul.f32 %v2251_v44, %v4189_v37  ;;  %v2351_v47 = vmul.f32 %v2251_v44, %v4193_v24  ;;  %v2352_v56 = vmul.f32 %v2256_v50, %v4200_v7  ;;  %v2353_v31 = vmul.f32 %v2256_v50, %v4204_v4 }
 0x3d1   :  { %v2419_v38 = vpop.permute.xlu1 %2418  ;;  %v2424_v1 = vpop.permute.xlu0 %2423 }
 0x3d2   :  { %v2518_v58 = vadd.f32 %v2419_v38, %v2350_v52  ;;  %v2519_v12 = vadd.f32 %v2419_v38, %v2351_v47  ;;  %v2520_v16 = vadd.f32 %v2424_v1, %v2352_v56  ;;  %v2521_v27 = vadd.f32 %v2424_v1, %v2353_v31  ;;  %v4834_v56 = vld [vmem:[#allocation2_spill] sm:$0xff] }
 0x3d4   :  { %2566 = vst [vmem:[%s4807_s6 + $0x60] sm:$0xff] %v2518_v58  ;;  %2567 = vst [vmem:[%s4807_s6 + $0x68] sm:$0xff] %v2519_v12 }
 0x3d5   :  { %2568 = vst [vmem:[%s4807_s6 + $0x70] sm:$0xff] %v2520_v16  ;;  %2569 = vst [vmem:[%s4807_s6 + $0x78] sm:$0xff] %v2521_v27  ;;  %v2261_v37 = vpop.permute.xlu1 %2260  ;;  %v2266_v24 = vpop.permute.xlu0 %2265 }
 0x3d6   :  { %v2354_v7 = vmul.f32 %v2261_v37, %v4211_v48  ;;  %v2355_v4 = vmul.f32 %v2261_v37, %v4215_v33  ;;  %v2356_v60 = vmul.f32 %v2266_v24, %v4222_v5  ;;  %v2357_v34 = vmul.f32 %v2266_v24, %v4226_v15  ;;  %v4836_v24 = vld [vmem:[#allocation4_spill] sm:$0xff] }
 0x3d9   :  { %v2429_v54 = vpop.permute.xlu1 %2428  ;;  %v2434_v22 = vpop.permute.xlu0 %2433 }
 0x3da   :  { %v2522_v35 = vadd.f32 %v2429_v54, %v2354_v7  ;;  %v2523_v6 = vadd.f32 %v2429_v54, %v2355_v4  ;;  %v2524_v41 = vadd.f32 %v2434_v22, %v2356_v60  ;;  %v2525_v49 = vadd.f32 %v2434_v22, %v2357_v34  ;;  %v4837_v4 = vld [vmem:[#allocation5_spill] sm:$0xff]  ;;  %v4838_v34 = vld [vmem:[#allocation6_spill] sm:$0xff] }
 0x3dc   :  { %2570 = vst [vmem:[%s4807_s6 + $0x80] sm:$0xff] %v2522_v35  ;;  %2571 = vst [vmem:[%s4807_s6 + $0x88] sm:$0xff] %v2523_v6 }
 0x3dd   :  { %2572 = vst [vmem:[%s4807_s6 + $0x90] sm:$0xff] %v2524_v41  ;;  %2573 = vst [vmem:[%s4807_s6 + $0x98] sm:$0xff] %v2525_v49  ;;  %v2271_v48 = vpop.permute.xlu1 %2270  ;;  %v2276_v33 = vpop.permute.xlu0 %2275 }
 0x3de   :  { %v2358_v5 = vmul.f32 %v2271_v48, %v4233_v13  ;;  %v2359_v15 = vmul.f32 %v2271_v48, %v4235_v11  ;;  %v2360_v39 = vmul.f32 %v2276_v33, %v4241_v36  ;;  %v2361_v0 = vmul.f32 %v2276_v33, %v4243_v59 }
 0x3e1   :  { %v2439_v17 = vpop.permute.xlu1 %2438  ;;  %v2444_v14 = vpop.permute.xlu0 %2443 }
 0x3e2   :  { %v2526_v45 = vadd.f32 %v2439_v17, %v2358_v5  ;;  %v2527_v43 = vadd.f32 %v2439_v17, %v2359_v15  ;;  %v2528_v51 = vadd.f32 %v2444_v14, %v2360_v39  ;;  %v2529_v23 = vadd.f32 %v2444_v14, %v2361_v0  ;;  %v4839_v15 = vld [vmem:[#allocation7_spill] sm:$0xff]  ;;  %v4840_v0 = vld [vmem:[#allocation8_spill] sm:$0xff]  ;;  %v4841_v14 = vld [vmem:[#allocation9_spill] sm:$0xff] }
 0x3e4   :  { %2574 = vst [vmem:[%s4807_s6 + $0xa0] sm:$0xff] %v2526_v45  ;;  %2575 = vst [vmem:[%s4807_s6 + $0xa8] sm:$0xff] %v2527_v43  ;;  %v4842_v43 = vld [vmem:[#allocation10_spill] sm:$0xff] }
 0x3e5   :  { %2576 = vst [vmem:[%s4807_s6 + $0xb0] sm:$0xff] %v2528_v51  ;;  %2577 = vst [vmem:[%s4807_s6 + $0xb8] sm:$0xff] %v2529_v23  ;;  %v2281_v13 = vpop.permute.xlu1 %2280  ;;  %v2286_v11 = vpop.permute.xlu0 %2285 }
 0x3e6   :  { %v2362_v36 = vmul.f32 %v2281_v13, %v4249_v25  ;;  %v2363_v59 = vmul.f32 %v2281_v13, %v4251_v18  ;;  %v2364_v20 = vmul.f32 %v2286_v11, %v4257_v10  ;;  %v2365_v62 = vmul.f32 %v2286_v11, %v4259_v32 }
 0x3e9   :  { %v2449_v3 = vpop.permute.xlu1 %2448  ;;  %v2454_v19 = vpop.permute.xlu0 %2453 }
 0x3ea   :  { %v2530_v42 = vadd.f32 %v2449_v3, %v2362_v36  ;;  %v2531_v61 = vadd.f32 %v2449_v3, %v2363_v59  ;;  %v2532_v9 = vadd.f32 %v2454_v19, %v2364_v20  ;;  %v2533_v2 = vadd.f32 %v2454_v19, %v2365_v62  ;;  %v4843_v19 = vld [vmem:[#allocation11_spill] sm:$0xff] }
 0x3ec   :  { %2578 = vst [vmem:[%s4807_s6 + $0xc0] sm:$0xff] %v2530_v42  ;;  %2579 = vst [vmem:[%s4807_s6 + $0xc8] sm:$0xff] %v2531_v61  ;;  %v4844_v61 = vld [vmem:[#allocation12_spill] sm:$0xff] }
 0x3ed   :  { %2580 = vst [vmem:[%s4807_s6 + $0xd0] sm:$0xff] %v2532_v9  ;;  %2581 = vst [vmem:[%s4807_s6 + $0xd8] sm:$0xff] %v2533_v2  ;;  %v2291_v25 = vpop.permute.xlu1 %2290  ;;  %v2296_v18 = vpop.permute.xlu0 %2295  ;;  %v4845_v2 = vld [vmem:[#allocation13_spill] sm:$0xff] }
 0x3ee   :  { %v2366_v10 = vmul.f32 %v2291_v25, %v4265_v28  ;;  %v2367_v32 = vmul.f32 %v2291_v25, %v4267_v55  ;;  %v2368_v57 = vmul.f32 %v2296_v18, %v4273_v21  ;;  %v2369_v63 = vmul.f32 %v2296_v18, %v4275_v53  ;;  %v4846_v18 = vld [vmem:[#allocation14_spill] sm:$0xff] }
 0x3f1   :  { %v2459_v46 = vpop.permute.xlu1 %2458  ;;  %v2464_v29 = vpop.permute.xlu0 %2463 }
 0x3f2   :  { %v2534_v26 = vadd.f32 %v2459_v46, %v2366_v10  ;;  %v2535_v44 = vadd.f32 %v2459_v46, %v2367_v32  ;;  %v2536_v50 = vadd.f32 %v2464_v29, %v2368_v57  ;;  %v2537_v52 = vadd.f32 %v2464_v29, %v2369_v63 }
 0x3f4   :  { %2582 = vst [vmem:[%s4807_s6 + $0xe0] sm:$0xff] %v2534_v26  ;;  %2583 = vst [vmem:[%s4807_s6 + $0xe8] sm:$0xff] %v2535_v44 }
 0x3f5   :  { %2584 = vst [vmem:[%s4807_s6 + $0xf0] sm:$0xff] %v2536_v50  ;;  %2585 = vst [vmem:[%s4807_s6 + $0xf8] sm:$0xff] %v2537_v52  ;;  %v2301_v28 = vpop.permute.xlu1 %2300  ;;  %v2306_v55 = vpop.permute.xlu0 %2305 }
 0x3f6   :  { %v2370_v21 = vmul.f32 %v2301_v28, %v4281_v8  ;;  %v2371_v53 = vmul.f32 %v2301_v28, %v4283_v30  ;;  %v2372_v47 = vmul.f32 %v2306_v55, %v4289_v40  ;;  %v2373_v31 = vmul.f32 %v2306_v55, %v4834_v56  ;;  %v4835_v40 = vld [vmem:[#allocation3_spill] sm:$0xff] }
 0x3f9   :  { %v2469_v38 = vpop.permute.xlu1 %2468  ;;  %v2474_v1 = vpop.permute.xlu0 %2473 }
 0x3fa   :  { %v2538_v58 = vadd.f32 %v2469_v38, %v2370_v21  ;;  %v2539_v12 = vadd.f32 %v2469_v38, %v2371_v53  ;;  %v2540_v16 = vadd.f32 %v2474_v1, %v2372_v47  ;;  %v2541_v27 = vadd.f32 %v2474_v1, %v2373_v31 }
 0x3fc   :  { %2586 = vst [vmem:[%s4807_s6 + $0x100] sm:$0xff] %v2538_v58  ;;  %2587 = vst [vmem:[%s4807_s6 + $0x108] sm:$0xff] %v2539_v12 }
 0x3fd   :  { %2588 = vst [vmem:[%s4807_s6 + $0x110] sm:$0xff] %v2540_v16  ;;  %2589 = vst [vmem:[%s4807_s6 + $0x118] sm:$0xff] %v2541_v27  ;;  %v2311_v8 = vpop.permute.xlu1 %2310  ;;  %v2316_v30 = vpop.permute.xlu0 %2315 }
 0x3fe   :  { %v2374_v37 = vmul.f32 %v2311_v8, %v4835_v40  ;;  %v2375_v7 = vmul.f32 %v2311_v8, %v4836_v24  ;;  %v2376_v60 = vmul.f32 %v2316_v30, %v4837_v4  ;;  %v2377_v54 = vmul.f32 %v2316_v30, %v4838_v34 }
 0x401   :  { %v2479_v22 = vpop.permute.xlu1 %2478  ;;  %v2484_v35 = vpop.permute.xlu0 %2483 }
 0x402   :  { %v2542_v6 = vadd.f32 %v2479_v22, %v2374_v37  ;;  %v2543_v41 = vadd.f32 %v2479_v22, %v2375_v7  ;;  %v2544_v49 = vadd.f32 %v2484_v35, %v2376_v60  ;;  %v2545_v48 = vadd.f32 %v2484_v35, %v2377_v54 }
 0x404   :  { %2590 = vst [vmem:[%s4807_s6 + $0x120] sm:$0xff] %v2542_v6  ;;  %2591 = vst [vmem:[%s4807_s6 + $0x128] sm:$0xff] %v2543_v41 }
 0x405   :  { %2592 = vst [vmem:[%s4807_s6 + $0x130] sm:$0xff] %v2544_v49  ;;  %2593 = vst [vmem:[%s4807_s6 + $0x138] sm:$0xff] %v2545_v48  ;;  %v2321_v33 = vpop.permute.xlu1 %2320  ;;  %v2326_v5 = vpop.permute.xlu0 %2325 }
 0x406   :  { %v2378_v39 = vmul.f32 %v2321_v33, %v4839_v15  ;;  %v2379_v17 = vmul.f32 %v2321_v33, %v4840_v0  ;;  %v2380_v45 = vmul.f32 %v2326_v5, %v4841_v14  ;;  %v2381_v51 = vmul.f32 %v2326_v5, %v4842_v43 }
 0x409   :  { %v2489_v23 = vpop.permute.xlu1 %2488  ;;  %v2494_v13 = vpop.permute.xlu0 %2493 }
 0x40a   :  { %v2546_v11 = vadd.f32 %v2489_v23, %v2378_v39  ;;  %v2547_v36 = vadd.f32 %v2489_v23, %v2379_v17  ;;  %v2548_v59 = vadd.f32 %v2494_v13, %v2380_v45  ;;  %v2549_v20 = vadd.f32 %v2494_v13, %v2381_v51 }
 0x40c   :  { %2594 = vst [vmem:[%s4807_s6 + $0x140] sm:$0xff] %v2546_v11  ;;  %2595 = vst [vmem:[%s4807_s6 + $0x148] sm:$0xff] %v2547_v36 }
 0x40d   :  { %2596 = vst [vmem:[%s4807_s6 + $0x150] sm:$0xff] %v2548_v59  ;;  %2597 = vst [vmem:[%s4807_s6 + $0x158] sm:$0xff] %v2549_v20  ;;  %v2331_v62 = vpop.permute.xlu1 %2330  ;;  %v2336_v3 = vpop.permute.xlu0 %2335 }
 0x40e   :  { %v2382_v42 = vmul.f32 %v2331_v62, %v4843_v19  ;;  %v2383_v9 = vmul.f32 %v2331_v62, %v4844_v61  ;;  %v2384_v25 = vmul.f32 %v2336_v3, %v4845_v2  ;;  %v2385_v10 = vmul.f32 %v2336_v3, %v4846_v18 }
 0x411   :  { %v2499_v32 = vpop.permute.xlu1 %2498  ;;  %v2504_v57 = vpop.permute.xlu0 %2503 }
 0x412   :  { %v2550_v63 = vadd.f32 %v2499_v32, %v2382_v42  ;;  %v2551_v46 = vadd.f32 %v2499_v32, %v2383_v9  ;;  %v2552_v29 = vadd.f32 %v2504_v57, %v2384_v25  ;;  %v2553_v26 = vadd.f32 %v2504_v57, %v2385_v10 }
 0x414   :  { %2598 = vst [vmem:[%s4807_s6 + $0x160] sm:$0xff] %v2550_v63  ;;  %2599 = vst [vmem:[%s4807_s6 + $0x168] sm:$0xff] %v2551_v46 }
 0x415   :  { %2600 = vst [vmem:[%s4807_s6 + $0x170] sm:$0xff] %v2552_v29  ;;  %2601 = vst [vmem:[%s4807_s6 + $0x178] sm:$0xff] %v2553_v26 }

</bundles_post_ra>
